<compile_context>
chip_gen: v5e
topology: v5e:2x2
jax: 0.10.0
libtpu: 0.0.40
codegen_flags: <defaults>
</compile_context>

<pallas_src>
import math
from functools import partial

import jax
import jax.numpy as jnp
from jax.experimental import pallas as pl
from jax.experimental.pallas import tpu as pltpu  # noqa: F401


# ----------------------------- in-kernel math ------------------------------

def _erf(x):
    # Abramowitz & Stegun 7.1.26 polynomial approximation (float32 accurate).
    a1, a2, a3, a4, a5 = 0.254829592, -0.284496736, 1.421413741, -1.453152027, 1.061405429
    p = 0.3275911
    ax = jnp.abs(x)
    t = 1.0 / (1.0 + p * ax)
    poly = ((((a5 * t + a4) * t + a3) * t + a2) * t + a1) * t
    y = 1.0 - poly * jnp.exp(-ax * ax)
    return jnp.where(x < 0, -y, y)


def _gelu(x):
    # Exact GELU (matches torch.nn.GELU default, erf-based).
    return 0.5 * x * (1.0 + _erf(x * (1.0 / math.sqrt(2.0))))


# ------------------------------ Pallas kernels ------------------------------

def _linear_gelu_kernel(x_ref, w_ref, b_ref, o_ref):
    y = jnp.dot(x_ref[...], w_ref[...], preferred_element_type=jnp.float32)
    y = y + b_ref[...]
    o_ref[...] = _gelu(y).astype(o_ref.dtype)


def _conv3x3_kernel(x_ref, w_ref, b_ref, o_ref, *, wp, act):
    """Channel-major 3x3 'valid' convolution over a flattened padded image.

    x_ref: (Cin, Mp)      padded input, flat index m = b*Hp*Wp + i*Wp + j
    w_ref: (9, Cout, Cin) per-tap weights, k = ki*3 + kj
    b_ref: (Cout, 1)
    o_ref: (Cout, Mo)     Mo = Mp - 2*wp - 2 rows of the same flat grid
                          (rows outside the valid region are junk, cropped on host)
    """
    mo = o_ref.shape[1]
    acc = jnp.zeros(o_ref.shape, jnp.float32)
    # Fully unrolled: 9 MXU GEMMs accumulated in an f32 register value,
    # no reduction grid, no scratch, no pl.when init/finalize.
    for k in range(9):
        off = (k // 3) * wp + (k % 3)
        acc = acc + jnp.dot(w_ref[k], x_ref[:, off:off + mo],
                            preferred_element_type=jnp.float32)
    y = acc + b_ref[...]
    if act == "gelu":
        y = _gelu(y)
    elif act == "tanh":
        y = jnp.tanh(y)
    o_ref[...] = y.astype(o_ref.dtype)


# ------------------------------ host wrappers -------------------------------

def _linear_gelu(z, w, b):
    B, D = z.shape
    H = w.shape[1]
    return pl.pallas_call(
        _linear_gelu_kernel,
        out_shape=jax.ShapeDtypeStruct((B, H), z.dtype),
        cost_estimate=pl.CostEstimate(
            flops=2 * B * D * H,
            transcendentals=B * H,
            bytes_accessed=4 * (B * D + D * H + 2 * B * H)),
    )(z, w, b.reshape(1, H))


def _conv3x3_flat(xpad, w_taps, bias, act):
    """3x3 valid conv of an already padded/dilated channel-major image.

    xpad: (Cin, B, Hp, Wp)  ->  (Cout, B, Hp-2, Wp-2)
    """
    cin, B, Hp, Wp = xpad.shape
    cout = w_taps.shape[1]
    Mp = B * Hp * Wp
    Mo = Mp - (2 * Wp + 2)

    out_flat = pl.pallas_call(
        partial(_conv3x3_kernel, wp=Wp, act=act),
        out_shape=jax.ShapeDtypeStruct((cout, Mo), xpad.dtype),
        cost_estimate=pl.CostEstimate(
            flops=2 * 9 * cout * cin * Mo,
            transcendentals=cout * Mo,
            bytes_accessed=4 * (cin * Mp + 9 * cout * cin + cout * Mo)),
    )(xpad.reshape(cin, Mp), w_taps, bias.reshape(cout, 1))

    # Rows whose flat position falls outside (i < Hp-2, j < Wp-2) of each image
    # are junk by construction; crop them on the padded grid (one fused XLA op).
    out_full = jnp.pad(out_flat, ((0, 0), (0, 2 * Wp + 2)))
    return out_full.reshape(cout, B, Hp, Wp)[:, :, :Hp - 2, :Wp - 2]


# ------------------------ host padding / layout glue -------------------------

def _pad1(x):  # (C, B, H, W) -> (C, B, H+2, W+2)
    return jnp.pad(x, ((0, 0), (0, 0), (1, 1), (1, 1)))


def _dilate_pad(x):
    """ConvTranspose2d(k=3, s=2, p=1, output_padding=1) == valid 3x3 conv (with
    flipped weights) over this zero-interleaved, zero-framed image.
    (C, B, H, W) -> (C, B, 2H+2, 2W+2) with x at positions (1+2i, 1+2j)."""
    # TODO(synk): fold this stride-2 zero-insertion into the conv kernel itself
    # (full decoder fusion); kept as host XLA glue because a strided VMEM
    # scatter has no clean/portable Mosaic lowering at these shapes.
    C, B, H, W = x.shape
    dp = jnp.zeros((C, B, 2 * H + 2, 2 * W + 2), x.dtype)
    return dp.at[:, :, 1:2 * H:2, 1:2 * W:2].set(x)


# weight-layout converters (PyTorch -> kernel tap weights)
def _conv_taps(w_oihw):          # (Cout, Cin, 3, 3) -> (9, Cout, Cin)
    cout, cin = w_oihw.shape[0], w_oihw.shape[1]
    return jnp.transpose(w_oihw, (2, 3, 0, 1)).reshape(9, cout, cin)


def _convT_equiv_oihw(wt):       # ConvT (Cin, Cout, 3, 3) -> equivalent-conv (Cout, Cin, 3, 3)
    return jnp.flip(jnp.transpose(wt, (1, 0, 2, 3)), axis=(2, 3))


def prepare_params(p):
    """Precompute kernel-format weights once (outside jit)."""
    return {
        "lin_w": p["lin_w"], "lin_b": p["lin_b"],
        "ct1_w9": _conv_taps(_convT_equiv_oihw(p["ct1_w"])), "ct1_b": p["ct1_b"],
        "c1_w9": _conv_taps(p["c1_w"]),                      "c1_b": p["c1_b"],
        "ct2_w9": _conv_taps(_convT_equiv_oihw(p["ct2_w"])), "ct2_b": p["ct2_b"],
        "c2_w9": _conv_taps(p["c2_w"]),                      "c2_b": p["c2_b"],
        "ct3_w9": _conv_taps(_convT_equiv_oihw(p["ct3_w"])), "ct3_b": p["ct3_b"],
    }


# ------------------------------ full forward --------------------------------

def decoder_forward(z, kp):
    B = z.shape[0]

    # Linear(latent -> 2*16*c_hid) + GELU
    h = _linear_gelu(z, kp["lin_w"], kp["lin_b"])              # (B, 32*c_hid)
    c2 = h.shape[1] // 16                                      # 2*c_hid

    # reshape(B, 2*c_hid, 4, 4) [NCHW] -> channel-major (C, B, H, W)
    x = h.reshape(B, c2, 4, 4).transpose(1, 0, 2, 3)           # (2c, B, 4, 4)

    x = _conv3x3_flat(_dilate_pad(x), kp["ct1_w9"], kp["ct1_b"], "gelu")   # 4 -> 8
    x = _conv3x3_flat(_pad1(x),       kp["c1_w9"],  kp["c1_b"],  "gelu")   # 8 -> 8
    x = _conv3x3_flat(_dilate_pad(x), kp["ct2_w9"], kp["ct2_b"], "gelu")   # 8 -> 16
    x = _conv3x3_flat(x,              kp["c2_w9"],  kp["c2_b"],  "gelu")   # 16 -> 14
    x = _conv3x3_flat(_dilate_pad(x), kp["ct3_w9"], kp["ct3_b"], "tanh")   # 14 -> 28

    # back to PyTorch NCHW
    return x.transpose(1, 0, 2, 3)                             # (B, n_in, 28, 28)


# ----------------------------- pure-JAX reference ----------------------------

def decoder_reference(z, params):
    """PyTorch-semantics reference (NCHW, exact erf GELU) in plain JAX/XLA."""
    h = jax.nn.gelu(z @ params["lin_w"] + params["lin_b"], approximate=False)
    x = h.reshape(z.shape[0], -1, 4, 4)
    dn = ("NCHW", "OIHW", "NCHW")

    def conv(x, w, b, pad):
        y = jax.lax.conv_general_dilated(x, w, (1, 1), ((pad, pad), (pad, pad)),
                                         dimension_numbers=dn)
        return y + b.reshape(1, -1, 1, 1)

    def convT(x, wt, b):  # k=3, s=2, p=1, output_padding=1
        w = _convT_equiv_oihw(wt)
        y = jax.lax.conv_general_dilated(x, w, (1, 1), ((1, 2), (1, 2)),
                                         lhs_dilation=(2, 2), dimension_numbers=dn)
        return y + b.reshape(1, -1, 1, 1)

    g = lambda t: jax.nn.gelu(t, approximate=False)
    x = g(convT(x, params["ct1_w"], params["ct1_b"]))
    x = g(conv(x, params["c1_w"], params["c1_b"], 1))
    x = g(convT(x, params["ct2_w"], params["ct2_b"]))
    x = g(conv(x, params["c2_w"], params["c2_b"], 0))
    x = jnp.tanh(convT(x, params["ct3_w"], params["ct3_b"]))
    return x


# ------------------------------ parameter init ------------------------------

def init_params(key, num_input_channels, c_hid, latent_dim):
    c2 = 2 * c_hid
    ks = jax.random.split(key, 12)
    s = 0.1

    def n(k, shape):
        return s * jax.random.normal(k, shape, jnp.float32)

    return {
        # Linear stored as (in, out)
        "lin_w": n(ks[0], (latent_dim, 2 * 16 * c_hid)),
        "lin_b": n(ks[1], (2 * 16 * c_hid,)),
        # ConvTranspose2d: PyTorch layout (Cin, Cout, 3, 3)
        "ct1_w": n(ks[2], (c2, c2, 3, 3)),
        "ct1_b": n(ks[3], (c2,)),
        # Conv2d: PyTorch layout (Cout, Cin, 3, 3)
        "c1_w": n(ks[4], (c2, c2, 3, 3)),
        "c1_b": n(ks[5], (c2,)),
        "ct2_w": n(ks[6], (c2, c_hid, 3, 3)),
        "ct2_b": n(ks[7], (c_hid,)),
        "c2_w": n(ks[8], (c_hid, c_hid, 3, 3)),
        "c2_b": n(ks[9], (c_hid,)),
        "ct3_w": n(ks[10], (c_hid, num_input_channels, 3, 3)),
        "ct3_b": n(ks[11], (num_input_channels,)),
    }


# ----------------------------------- main ------------------------------------

if __name__ == "__main__":
    B = 2
    latent_dim = 16
    c_hid = 8            # base_channel_size
    n_in = 3             # num_input_channels

    key = jax.random.PRNGKey(0)
    k_params, k_z = jax.random.split(key)

    params = init_params(k_params, n_in, c_hid, latent_dim)
    kparams = prepare_params(params)     # kernel-format weights, prepared once
    z = jax.random.normal(k_z, (B, latent_dim), jnp.float32)

    fwd = jax.jit(decoder_forward)
    out = jax.block_until_ready(fwd(z, kparams))

    assert out.shape == (B, n_in, 28, 28), out.shape
    assert bool(jnp.all(jnp.isfinite(out)))
    # Tanh output must lie in [-1, 1]
    assert float(jnp.max(jnp.abs(out))) <= 1.0 + 1e-6

    # Correctness vs. pure-JAX PyTorch-semantics reference.
    ref = decoder_reference(z, params)
    err = float(jnp.max(jnp.abs(out - ref)))
    assert err < 1e-2, f"mismatch vs reference: {err}"

    print("KERNEL_OK")
</pallas_src>

<mosaic_0001>
module attributes {stable_mosaic.version = 11 : i64} {
  func.func @_linear_gelu_kernel(%arg0: memref<2x16xf32, #tpu.memory_space<vmem>>, %arg1: memref<16x256xf32, #tpu.memory_space<vmem>>, %arg2: memref<1x256xf32, #tpu.memory_space<vmem>>, %arg3: memref<2x256xf32, #tpu.memory_space<vmem>>) attributes {dimension_semantics = [], scalar_prefetch = 0 : i64, scratch_operands = 0 : i64, tpu.core_type = #tpu.core_type<tc>} {
    %c0 = arith.constant 0 : index
    %c0_0 = arith.constant 0 : index
    %0 = vector.load %arg0[%c0, %c0_0] : memref<2x16xf32, #tpu.memory_space<vmem>>, vector<2x16xf32>
    %c0_1 = arith.constant 0 : index
    %c0_2 = arith.constant 0 : index
    %1 = vector.load %arg1[%c0_1, %c0_2] : memref<16x256xf32, #tpu.memory_space<vmem>>, vector<16x256xf32>
    %cst = arith.constant dense<0.000000e+00> : vector<2x256xf32>
    %2 = tpu.matmul %0, %1, %cst {dimension_numbers = #tpu.dot_dimension_numbers<[1], [0], [0], [1], [0, 0, 1, 1], [], []>} : vector<2x16xf32>, vector<16x256xf32>, vector<2x256xf32> -> vector<2x256xf32>
    %c0_3 = arith.constant 0 : index
    %c0_4 = arith.constant 0 : index
    %3 = vector.load %arg2[%c0_3, %c0_4] : memref<1x256xf32, #tpu.memory_space<vmem>>, vector<1x256xf32>
    %4 = vector.broadcast %3 : vector<1x256xf32> to vector<2x256xf32>
    %5 = arith.addf %2, %4 : vector<2x256xf32>
    %cst_5 = arith.constant 5.000000e-01 : f32
    %6 = vector.broadcast %cst_5 : f32 to vector<2x256xf32>
    %7 = arith.mulf %6, %5 : vector<2x256xf32>
    %cst_6 = arith.constant 0.707106769 : f32
    %8 = vector.broadcast %cst_6 : f32 to vector<2x256xf32>
    %9 = arith.mulf %5, %8 : vector<2x256xf32>
    %10 = math.absf %9 : vector<2x256xf32>
    %cst_7 = arith.constant 0.327591091 : f32
    %11 = vector.broadcast %cst_7 : f32 to vector<2x256xf32>
    %12 = arith.mulf %11, %10 : vector<2x256xf32>
    %cst_8 = arith.constant 1.000000e+00 : f32
    %13 = vector.broadcast %cst_8 : f32 to vector<2x256xf32>
    %14 = arith.addf %13, %12 : vector<2x256xf32>
    %cst_9 = arith.constant 1.000000e+00 : f32
    %15 = vector.broadcast %cst_9 : f32 to vector<2x256xf32>
    %16 = arith.divf %15, %14 : vector<2x256xf32>
    %cst_10 = arith.constant 1.06140542 : f32
    %17 = vector.broadcast %cst_10 : f32 to vector<2x256xf32>
    %18 = arith.mulf %17, %16 : vector<2x256xf32>
    %cst_11 = arith.constant -1.45315206 : f32
    %19 = vector.broadcast %cst_11 : f32 to vector<2x256xf32>
    %20 = arith.addf %18, %19 : vector<2x256xf32>
    %21 = arith.mulf %20, %16 : vector<2x256xf32>
    %cst_12 = arith.constant 1.42141378 : f32
    %22 = vector.broadcast %cst_12 : f32 to vector<2x256xf32>
    %23 = arith.addf %21, %22 : vector<2x256xf32>
    %24 = arith.mulf %23, %16 : vector<2x256xf32>
    %cst_13 = arith.constant -0.284496725 : f32
    %25 = vector.broadcast %cst_13 : f32 to vector<2x256xf32>
    %26 = arith.addf %24, %25 : vector<2x256xf32>
    %27 = arith.mulf %26, %16 : vector<2x256xf32>
    %cst_14 = arith.constant 0.254829586 : f32
    %28 = vector.broadcast %cst_14 : f32 to vector<2x256xf32>
    %29 = arith.addf %27, %28 : vector<2x256xf32>
    %30 = arith.mulf %29, %16 : vector<2x256xf32>
    %cst_15 = arith.constant 0.000000e+00 : f32
    %31 = vector.broadcast %cst_15 : f32 to vector<2x256xf32>
    %32 = arith.subf %31, %10 : vector<2x256xf32>
    %33 = arith.mulf %32, %10 : vector<2x256xf32>
    %34 = math.exp %33 : vector<2x256xf32>
    %35 = arith.mulf %30, %34 : vector<2x256xf32>
    %cst_16 = arith.constant 1.000000e+00 : f32
    %36 = vector.broadcast %cst_16 : f32 to vector<2x256xf32>
    %37 = arith.subf %36, %35 : vector<2x256xf32>
    %cst_17 = arith.constant 0.000000e+00 : f32
    %38 = vector.broadcast %cst_17 : f32 to vector<2x256xf32>
    %39 = arith.cmpf olt, %9, %38 : vector<2x256xf32>
    %cst_18 = arith.constant 0.000000e+00 : f32
    %40 = vector.broadcast %cst_18 : f32 to vector<2x256xf32>
    %41 = arith.subf %40, %37 : vector<2x256xf32>
    %42 = arith.select %39, %41, %37 : vector<2x256xi1>, vector<2x256xf32>
    %cst_19 = arith.constant 1.000000e+00 : f32
    %43 = vector.broadcast %cst_19 : f32 to vector<2x256xf32>
    %44 = arith.addf %43, %42 : vector<2x256xf32>
    %45 = arith.mulf %7, %44 : vector<2x256xf32>
    %c0_20 = arith.constant 0 : index
    %c0_21 = arith.constant 0 : index
    %46 = vector.load %arg3[%c0_20, %c0_21] : memref<2x256xf32, #tpu.memory_space<vmem>>, vector<2x256xf32>
    tpu.vector_store %arg3[%c0_20, %c0_21], %45 {strides = array<i32>} : memref<2x256xf32, #tpu.memory_space<vmem>>, vector<2x256xf32>,
    return
  }
}

module attributes {stable_mosaic.version = 11 : i64} {
  func.func @_conv3x3_kernel(%arg0: memref<16x200xf32, #tpu.memory_space<vmem>>, %arg1: memref<9x16x16xf32, #tpu.memory_space<vmem>>, %arg2: memref<16x1xf32, #tpu.memory_space<vmem>>, %arg3: memref<16x178xf32, #tpu.memory_space<vmem>>) attributes {dimension_semantics = [], scalar_prefetch = 0 : i64, scratch_operands = 0 : i64, tpu.core_type = #tpu.core_type<tc>} {
    %cst = arith.constant 0.000000e+00 : f32
    %0 = vector.broadcast %cst : f32 to vector<16x178xf32>
    %c0 = arith.constant 0 : index
    %c0_0 = arith.constant 0 : index
    %c0_1 = arith.constant 0 : index
    %1 = vector.load %arg1[%c0, %c0_0, %c0_1] : memref<9x16x16xf32, #tpu.memory_space<vmem>>, vector<1x16x16xf32>
    %2 = vector.shape_cast %1 : vector<1x16x16xf32> to vector<16x16xf32>
    %c0_2 = arith.constant 0 : index
    %c0_3 = arith.constant 0 : index
    %3 = vector.load %arg0[%c0_2, %c0_3] : memref<16x200xf32, #tpu.memory_space<vmem>>, vector<16x178xf32>
    %cst_4 = arith.constant dense<0.000000e+00> : vector<16x178xf32>
    %4 = tpu.matmul %2, %3, %cst_4 {dimension_numbers = #tpu.dot_dimension_numbers<[1], [0], [0], [1], [0, 0, 1, 1], [], []>} : vector<16x16xf32>, vector<16x178xf32>, vector<16x178xf32> -> vector<16x178xf32>
    %5 = arith.addf %0, %4 : vector<16x178xf32>
    %c1 = arith.constant 1 : index
    %c0_5 = arith.constant 0 : index
    %c0_6 = arith.constant 0 : index
    %6 = vector.load %arg1[%c1, %c0_5, %c0_6] : memref<9x16x16xf32, #tpu.memory_space<vmem>>, vector<1x16x16xf32>
    %7 = vector.shape_cast %6 : vector<1x16x16xf32> to vector<16x16xf32>
    %c0_7 = arith.constant 0 : index
    %c1_8 = arith.constant 1 : index
    %8 = vector.load %arg0[%c0_7, %c1_8] : memref<16x200xf32, #tpu.memory_space<vmem>>, vector<16x178xf32>
    %cst_9 = arith.constant dense<0.000000e+00> : vector<16x178xf32>
    %9 = tpu.matmul %7, %8, %cst_9 {dimension_numbers = #tpu.dot_dimension_numbers<[1], [0], [0], [1], [0, 0, 1, 1], [], []>} : vector<16x16xf32>, vector<16x178xf32>, vector<16x178xf32> -> vector<16x178xf32>
    %10 = arith.addf %5, %9 : vector<16x178xf32>
    %c2 = arith.constant 2 : index
    %c0_10 = arith.constant 0 : index
    %c0_11 = arith.constant 0 : index
    %11 = vector.load %arg1[%c2, %c0_10, %c0_11] : memref<9x16x16xf32, #tpu.memory_space<vmem>>, vector<1x16x16xf32>
    %12 = vector.shape_cast %11 : vector<1x16x16xf32> to vector<16x16xf32>
    %c0_12 = arith.constant 0 : index
    %c2_13 = arith.constant 2 : index
    %13 = vector.load %arg0[%c0_12, %c2_13] : memref<16x200xf32, #tpu.memory_space<vmem>>, vector<16x178xf32>
    %cst_14 = arith.constant dense<0.000000e+00> : vector<16x178xf32>
    %14 = tpu.matmul %12, %13, %cst_14 {dimension_numbers = #tpu.dot_dimension_numbers<[1], [0], [0], [1], [0, 0, 1, 1], [], []>} : vector<16x16xf32>, vector<16x178xf32>, vector<16x178xf32> -> vector<16x178xf32>
    %15 = arith.addf %10, %14 : vector<16x178xf32>
    %c3 = arith.constant 3 : index
    %c0_15 = arith.constant 0 : index
    %c0_16 = arith.constant 0 : index
    %16 = vector.load %arg1[%c3, %c0_15, %c0_16] : memref<9x16x16xf32, #tpu.memory_space<vmem>>, vector<1x16x16xf32>
    %17 = vector.shape_cast %16 : vector<1x16x16xf32> to vector<16x16xf32>
    %c0_17 = arith.constant 0 : index
    %c10 = arith.constant 10 : index
    %18 = vector.load %arg0[%c0_17, %c10] : memref<16x200xf32, #tpu.memory_space<vmem>>, vector<16x178xf32>
    %cst_18 = arith.constant dense<0.000000e+00> : vector<16x178xf32>
    %19 = tpu.matmul %17, %18, %cst_18 {dimension_numbers = #tpu.dot_dimension_numbers<[1], [0], [0], [1], [0, 0, 1, 1], [], []>} : vector<16x16xf32>, vector<16x178xf32>, vector<16x178xf32> -> vector<16x178xf32>
    %20 = arith.addf %15, %19 : vector<16x178xf32>
    %c4 = arith.constant 4 : index
    %c0_19 = arith.constant 0 : index
    %c0_20 = arith.constant 0 : index
    %21 = vector.load %arg1[%c4, %c0_19, %c0_20] : memref<9x16x16xf32, #tpu.memory_space<vmem>>, vector<1x16x16xf32>
    %22 = vector.shape_cast %21 : vector<1x16x16xf32> to vector<16x16xf32>
    %c0_21 = arith.constant 0 : index
    %c11 = arith.constant 11 : index
    %23 = vector.load %arg0[%c0_21, %c11] : memref<16x200xf32, #tpu.memory_space<vmem>>, vector<16x178xf32>
    %cst_22 = arith.constant dense<0.000000e+00> : vector<16x178xf32>
    %24 = tpu.matmul %22, %23, %cst_22 {dimension_numbers = #tpu.dot_dimension_numbers<[1], [0], [0], [1], [0, 0, 1, 1], [], []>} : vector<16x16xf32>, vector<16x178xf32>, vector<16x178xf32> -> vector<16x178xf32>
    %25 = arith.addf %20, %24 : vector<16x178xf32>
    %c5 = arith.constant 5 : index
    %c0_23 = arith.constant 0 : index
    %c0_24 = arith.constant 0 : index
    %26 = vector.load %arg1[%c5, %c0_23, %c0_24] : memref<9x16x16xf32, #tpu.memory_space<vmem>>, vector<1x16x16xf32>
    %27 = vector.shape_cast %26 : vector<1x16x16xf32> to vector<16x16xf32>
    %c0_25 = arith.constant 0 : index
    %c12 = arith.constant 12 : index
    %28 = vector.load %arg0[%c0_25, %c12] : memref<16x200xf32, #tpu.memory_space<vmem>>, vector<16x178xf32>
    %cst_26 = arith.constant dense<0.000000e+00> : vector<16x178xf32>
    %29 = tpu.matmul %27, %28, %cst_26 {dimension_numbers = #tpu.dot_dimension_numbers<[1], [0], [0], [1], [0, 0, 1, 1], [], []>} : vector<16x16xf32>, vector<16x178xf32>, vector<16x178xf32> -> vector<16x178xf32>
    %30 = arith.addf %25, %29 : vector<16x178xf32>
    %c6 = arith.constant 6 : index
    %c0_27 = arith.constant 0 : index
    %c0_28 = arith.constant 0 : index
    %31 = vector.load %arg1[%c6, %c0_27, %c0_28] : memref<9x16x16xf32, #tpu.memory_space<vmem>>, vector<1x16x16xf32>
    %32 = vector.shape_cast %31 : vector<1x16x16xf32> to vector<16x16xf32>
    %c0_29 = arith.constant 0 : index
    %c20 = arith.constant 20 : index
    %33 = vector.load %arg0[%c0_29, %c20] : memref<16x200xf32, #tpu.memory_space<vmem>>, vector<16x178xf32>
    %cst_30 = arith.constant dense<0.000000e+00> : vector<16x178xf32>
    %34 = tpu.matmul %32, %33, %cst_30 {dimension_numbers = #tpu.dot_dimension_numbers<[1], [0], [0], [1], [0, 0, 1, 1], [], []>} : vector<16x16xf32>, vector<16x178xf32>, vector<16x178xf32> -> vector<16x178xf32>
    %35 = arith.addf %30, %34 : vector<16x178xf32>
    %c7 = arith.constant 7 : index
    %c0_31 = arith.constant 0 : index
    %c0_32 = arith.constant 0 : index
    %36 = vector.load %arg1[%c7, %c0_31, %c0_32] : memref<9x16x16xf32, #tpu.memory_space<vmem>>, vector<1x16x16xf32>
    %37 = vector.shape_cast %36 : vector<1x16x16xf32> to vector<16x16xf32>
    %c0_33 = arith.constant 0 : index
    %c21 = arith.constant 21 : index
    %38 = vector.load %arg0[%c0_33, %c21] : memref<16x200xf32, #tpu.memory_space<vmem>>, vector<16x178xf32>
    %cst_34 = arith.constant dense<0.000000e+00> : vector<16x178xf32>
    %39 = tpu.matmul %37, %38, %cst_34 {dimension_numbers = #tpu.dot_dimension_numbers<[1], [0], [0], [1], [0, 0, 1, 1], [], []>} : vector<16x16xf32>, vector<16x178xf32>, vector<16x178xf32> -> vector<16x178xf32>
    %40 = arith.addf %35, %39 : vector<16x178xf32>
    %c8 = arith.constant 8 : index
    %c0_35 = arith.constant 0 : index
    %c0_36 = arith.constant 0 : index
    %41 = vector.load %arg1[%c8, %c0_35, %c0_36] : memref<9x16x16xf32, #tpu.memory_space<vmem>>, vector<1x16x16xf32>
    %42 = vector.shape_cast %41 : vector<1x16x16xf32> to vector<16x16xf32>
    %c0_37 = arith.constant 0 : index
    %c22 = arith.constant 22 : index
    %43 = vector.load %arg0[%c0_37, %c22] : memref<16x200xf32, #tpu.memory_space<vmem>>, vector<16x178xf32>
    %cst_38 = arith.constant dense<0.000000e+00> : vector<16x178xf32>
    %44 = tpu.matmul %42, %43, %cst_38 {dimension_numbers = #tpu.dot_dimension_numbers<[1], [0], [0], [1], [0, 0, 1, 1], [], []>} : vector<16x16xf32>, vector<16x178xf32>, vector<16x178xf32> -> vector<16x178xf32>
    %45 = arith.addf %40, %44 : vector<16x178xf32>
    %c0_39 = arith.constant 0 : index
    %c0_40 = arith.constant 0 : index
    %46 = vector.load %arg2[%c0_39, %c0_40] : memref<16x1xf32, #tpu.memory_space<vmem>>, vector<16x1xf32>
    %47 = vector.broadcast %46 : vector<16x1xf32> to vector<16x178xf32>
    %48 = arith.addf %45, %47 : vector<16x178xf32>
    %cst_41 = arith.constant 5.000000e-01 : f32
    %49 = vector.broadcast %cst_41 : f32 to vector<16x178xf32>
    %50 = arith.mulf %49, %48 : vector<16x178xf32>
    %cst_42 = arith.constant 0.707106769 : f32
    %51 = vector.broadcast %cst_42 : f32 to vector<16x178xf32>
    %52 = arith.mulf %48, %51 : vector<16x178xf32>
    %53 = math.absf %52 : vector<16x178xf32>
    %cst_43 = arith.constant 0.327591091 : f32
    %54 = vector.broadcast %cst_43 : f32 to vector<16x178xf32>
    %55 = arith.mulf %54, %53 : vector<16x178xf32>
    %cst_44 = arith.constant 1.000000e+00 : f32
    %56 = vector.broadcast %cst_44 : f32 to vector<16x178xf32>
    %57 = arith.addf %56, %55 : vector<16x178xf32>
    %cst_45 = arith.constant 1.000000e+00 : f32
    %58 = vector.broadcast %cst_45 : f32 to vector<16x178xf32>
    %59 = arith.divf %58, %57 : vector<16x178xf32>
    %cst_46 = arith.constant 1.06140542 : f32
    %60 = vector.broadcast %cst_46 : f32 to vector<16x178xf32>
    %61 = arith.mulf %60, %59 : vector<16x178xf32>
    %cst_47 = arith.constant -1.45315206 : f32
    %62 = vector.broadcast %cst_47 : f32 to vector<16x178xf32>
    %63 = arith.addf %61, %62 : vector<16x178xf32>
    %64 = arith.mulf %63, %59 : vector<16x178xf32>
    %cst_48 = arith.constant 1.42141378 : f32
    %65 = vector.broadcast %cst_48 : f32 to vector<16x178xf32>
    %66 = arith.addf %64, %65 : vector<16x178xf32>
    %67 = arith.mulf %66, %59 : vector<16x178xf32>
    %cst_49 = arith.constant -0.284496725 : f32
    %68 = vector.broadcast %cst_49 : f32 to vector<16x178xf32>
    %69 = arith.addf %67, %68 : vector<16x178xf32>
    %70 = arith.mulf %69, %59 : vector<16x178xf32>
    %cst_50 = arith.constant 0.254829586 : f32
    %71 = vector.broadcast %cst_50 : f32 to vector<16x178xf32>
    %72 = arith.addf %70, %71 : vector<16x178xf32>
    %73 = arith.mulf %72, %59 : vector<16x178xf32>
    %cst_51 = arith.constant 0.000000e+00 : f32
    %74 = vector.broadcast %cst_51 : f32 to vector<16x178xf32>
    %75 = arith.subf %74, %53 : vector<16x178xf32>
    %76 = arith.mulf %75, %53 : vector<16x178xf32>
    %77 = math.exp %76 : vector<16x178xf32>
    %78 = arith.mulf %73, %77 : vector<16x178xf32>
    %cst_52 = arith.constant 1.000000e+00 : f32
    %79 = vector.broadcast %cst_52 : f32 to vector<16x178xf32>
    %80 = arith.subf %79, %78 : vector<16x178xf32>
    %cst_53 = arith.constant 0.000000e+00 : f32
    %81 = vector.broadcast %cst_53 : f32 to vector<16x178xf32>
    %82 = arith.cmpf olt, %52, %81 : vector<16x178xf32>
    %cst_54 = arith.constant 0.000000e+00 : f32
    %83 = vector.broadcast %cst_54 : f32 to vector<16x178xf32>
    %84 = arith.subf %83, %80 : vector<16x178xf32>
    %85 = arith.select %82, %84, %80 : vector<16x178xi1>, vector<16x178xf32>
    %cst_55 = arith.constant 1.000000e+00 : f32
    %86 = vector.broadcast %cst_55 : f32 to vector<16x178xf32>
    %87 = arith.addf %86, %85 : vector<16x178xf32>
    %88 = arith.mulf %50, %87 : vector<16x178xf32>
    %c0_56 = arith.constant 0 : index
    %c0_57 = arith.constant 0 : index
    %89 = vector.load %arg3[%c0_56, %c0_57] : memref<16x178xf32, #tpu.memory_space<vmem>>, vector<16x178xf32>
    tpu.vector_store %arg3[%c0_56, %c0_57], %88 {strides = array<i32>} : memref<16x178xf32, #tpu.memory_space<vmem>>, vector<16x178xf32>,
    return
  }
}

module attributes {stable_mosaic.version = 11 : i64} {
  func.func @_conv3x3_kernel(%arg0: memref<16x648xf32, #tpu.memory_space<vmem>>, %arg1: memref<9x8x16xf32, #tpu.memory_space<vmem>>, %arg2: memref<8x1xf32, #tpu.memory_space<vmem>>, %arg3: memref<8x610xf32, #tpu.memory_space<vmem>>) attributes {dimension_semantics = [], scalar_prefetch = 0 : i64, scratch_operands = 0 : i64, tpu.core_type = #tpu.core_type<tc>} {
    %cst = arith.constant 0.000000e+00 : f32
    %0 = vector.broadcast %cst : f32 to vector<8x610xf32>
    %c0 = arith.constant 0 : index
    %c0_0 = arith.constant 0 : index
    %c0_1 = arith.constant 0 : index
    %1 = vector.load %arg1[%c0, %c0_0, %c0_1] : memref<9x8x16xf32, #tpu.memory_space<vmem>>, vector<1x8x16xf32>
    %2 = vector.shape_cast %1 : vector<1x8x16xf32> to vector<8x16xf32>
    %c0_2 = arith.constant 0 : index
    %c0_3 = arith.constant 0 : index
    %3 = vector.load %arg0[%c0_2, %c0_3] : memref<16x648xf32, #tpu.memory_space<vmem>>, vector<16x610xf32>
    %cst_4 = arith.constant dense<0.000000e+00> : vector<8x610xf32>
    %4 = tpu.matmul %2, %3, %cst_4 {dimension_numbers = #tpu.dot_dimension_numbers<[1], [0], [0], [1], [0, 0, 1, 1], [], []>} : vector<8x16xf32>, vector<16x610xf32>, vector<8x610xf32> -> vector<8x610xf32>
    %5 = arith.addf %0, %4 : vector<8x610xf32>
    %c1 = arith.constant 1 : index
    %c0_5 = arith.constant 0 : index
    %c0_6 = arith.constant 0 : index
    %6 = vector.load %arg1[%c1, %c0_5, %c0_6] : memref<9x8x16xf32, #tpu.memory_space<vmem>>, vector<1x8x16xf32>
    %7 = vector.shape_cast %6 : vector<1x8x16xf32> to vector<8x16xf32>
    %c0_7 = arith.constant 0 : index
    %c1_8 = arith.constant 1 : index
    %8 = vector.load %arg0[%c0_7, %c1_8] : memref<16x648xf32, #tpu.memory_space<vmem>>, vector<16x610xf32>
    %cst_9 = arith.constant dense<0.000000e+00> : vector<8x610xf32>
    %9 = tpu.matmul %7, %8, %cst_9 {dimension_numbers = #tpu.dot_dimension_numbers<[1], [0], [0], [1], [0, 0, 1, 1], [], []>} : vector<8x16xf32>, vector<16x610xf32>, vector<8x610xf32> -> vector<8x610xf32>
    %10 = arith.addf %5, %9 : vector<8x610xf32>
    %c2 = arith.constant 2 : index
    %c0_10 = arith.constant 0 : index
    %c0_11 = arith.constant 0 : index
    %11 = vector.load %arg1[%c2, %c0_10, %c0_11] : memref<9x8x16xf32, #tpu.memory_space<vmem>>, vector<1x8x16xf32>
    %12 = vector.shape_cast %11 : vector<1x8x16xf32> to vector<8x16xf32>
    %c0_12 = arith.constant 0 : index
    %c2_13 = arith.constant 2 : index
    %13 = vector.load %arg0[%c0_12, %c2_13] : memref<16x648xf32, #tpu.memory_space<vmem>>, vector<16x610xf32>
    %cst_14 = arith.constant dense<0.000000e+00> : vector<8x610xf32>
    %14 = tpu.matmul %12, %13, %cst_14 {dimension_numbers = #tpu.dot_dimension_numbers<[1], [0], [0], [1], [0, 0, 1, 1], [], []>} : vector<8x16xf32>, vector<16x610xf32>, vector<8x610xf32> -> vector<8x610xf32>
    %15 = arith.addf %10, %14 : vector<8x610xf32>
    %c3 = arith.constant 3 : index
    %c0_15 = arith.constant 0 : index
    %c0_16 = arith.constant 0 : index
    %16 = vector.load %arg1[%c3, %c0_15, %c0_16] : memref<9x8x16xf32, #tpu.memory_space<vmem>>, vector<1x8x16xf32>
    %17 = vector.shape_cast %16 : vector<1x8x16xf32> to vector<8x16xf32>
    %c0_17 = arith.constant 0 : index
    %c18 = arith.constant 18 : index
    %18 = vector.load %arg0[%c0_17, %c18] : memref<16x648xf32, #tpu.memory_space<vmem>>, vector<16x610xf32>
    %cst_18 = arith.constant dense<0.000000e+00> : vector<8x610xf32>
    %19 = tpu.matmul %17, %18, %cst_18 {dimension_numbers = #tpu.dot_dimension_numbers<[1], [0], [0], [1], [0, 0, 1, 1], [], []>} : vector<8x16xf32>, vector<16x610xf32>, vector<8x610xf32> -> vector<8x610xf32>
    %20 = arith.addf %15, %19 : vector<8x610xf32>
    %c4 = arith.constant 4 : index
    %c0_19 = arith.constant 0 : index
    %c0_20 = arith.constant 0 : index
    %21 = vector.load %arg1[%c4, %c0_19, %c0_20] : memref<9x8x16xf32, #tpu.memory_space<vmem>>, vector<1x8x16xf32>
    %22 = vector.shape_cast %21 : vector<1x8x16xf32> to vector<8x16xf32>
    %c0_21 = arith.constant 0 : index
    %c19 = arith.constant 19 : index
    %23 = vector.load %arg0[%c0_21, %c19] : memref<16x648xf32, #tpu.memory_space<vmem>>, vector<16x610xf32>
    %cst_22 = arith.constant dense<0.000000e+00> : vector<8x610xf32>
    %24 = tpu.matmul %22, %23, %cst_22 {dimension_numbers = #tpu.dot_dimension_numbers<[1], [0], [0], [1], [0, 0, 1, 1], [], []>} : vector<8x16xf32>, vector<16x610xf32>, vector<8x610xf32> -> vector<8x610xf32>
    %25 = arith.addf %20, %24 : vector<8x610xf32>
    %c5 = arith.constant 5 : index
    %c0_23 = arith.constant 0 : index
    %c0_24 = arith.constant 0 : index
    %26 = vector.load %arg1[%c5, %c0_23, %c0_24] : memref<9x8x16xf32, #tpu.memory_space<vmem>>, vector<1x8x16xf32>
    %27 = vector.shape_cast %26 : vector<1x8x16xf32> to vector<8x16xf32>
    %c0_25 = arith.constant 0 : index
    %c20 = arith.constant 20 : index
    %28 = vector.load %arg0[%c0_25, %c20] : memref<16x648xf32, #tpu.memory_space<vmem>>, vector<16x610xf32>
    %cst_26 = arith.constant dense<0.000000e+00> : vector<8x610xf32>
    %29 = tpu.matmul %27, %28, %cst_26 {dimension_numbers = #tpu.dot_dimension_numbers<[1], [0], [0], [1], [0, 0, 1, 1], [], []>} : vector<8x16xf32>, vector<16x610xf32>, vector<8x610xf32> -> vector<8x610xf32>
    %30 = arith.addf %25, %29 : vector<8x610xf32>
    %c6 = arith.constant 6 : index
    %c0_27 = arith.constant 0 : index
    %c0_28 = arith.constant 0 : index
    %31 = vector.load %arg1[%c6, %c0_27, %c0_28] : memref<9x8x16xf32, #tpu.memory_space<vmem>>, vector<1x8x16xf32>
    %32 = vector.shape_cast %31 : vector<1x8x16xf32> to vector<8x16xf32>
    %c0_29 = arith.constant 0 : index
    %c36 = arith.constant 36 : index
    %33 = vector.load %arg0[%c0_29, %c36] : memref<16x648xf32, #tpu.memory_space<vmem>>, vector<16x610xf32>
    %cst_30 = arith.constant dense<0.000000e+00> : vector<8x610xf32>
    %34 = tpu.matmul %32, %33, %cst_30 {dimension_numbers = #tpu.dot_dimension_numbers<[1], [0], [0], [1], [0, 0, 1, 1], [], []>} : vector<8x16xf32>, vector<16x610xf32>, vector<8x610xf32> -> vector<8x610xf32>
    %35 = arith.addf %30, %34 : vector<8x610xf32>
    %c7 = arith.constant 7 : index
    %c0_31 = arith.constant 0 : index
    %c0_32 = arith.constant 0 : index
    %36 = vector.load %arg1[%c7, %c0_31, %c0_32] : memref<9x8x16xf32, #tpu.memory_space<vmem>>, vector<1x8x16xf32>
    %37 = vector.shape_cast %36 : vector<1x8x16xf32> to vector<8x16xf32>
    %c0_33 = arith.constant 0 : index
    %c37 = arith.constant 37 : index
    %38 = vector.load %arg0[%c0_33, %c37] : memref<16x648xf32, #tpu.memory_space<vmem>>, vector<16x610xf32>
    %cst_34 = arith.constant dense<0.000000e+00> : vector<8x610xf32>
    %39 = tpu.matmul %37, %38, %cst_34 {dimension_numbers = #tpu.dot_dimension_numbers<[1], [0], [0], [1], [0, 0, 1, 1], [], []>} : vector<8x16xf32>, vector<16x610xf32>, vector<8x610xf32> -> vector<8x610xf32>
    %40 = arith.addf %35, %39 : vector<8x610xf32>
    %c8 = arith.constant 8 : index
    %c0_35 = arith.constant 0 : index
    %c0_36 = arith.constant 0 : index
    %41 = vector.load %arg1[%c8, %c0_35, %c0_36] : memref<9x8x16xf32, #tpu.memory_space<vmem>>, vector<1x8x16xf32>
    %42 = vector.shape_cast %41 : vector<1x8x16xf32> to vector<8x16xf32>
    %c0_37 = arith.constant 0 : index
    %c38 = arith.constant 38 : index
    %43 = vector.load %arg0[%c0_37, %c38] : memref<16x648xf32, #tpu.memory_space<vmem>>, vector<16x610xf32>
    %cst_38 = arith.constant dense<0.000000e+00> : vector<8x610xf32>
    %44 = tpu.matmul %42, %43, %cst_38 {dimension_numbers = #tpu.dot_dimension_numbers<[1], [0], [0], [1], [0, 0, 1, 1], [], []>} : vector<8x16xf32>, vector<16x610xf32>, vector<8x610xf32> -> vector<8x610xf32>
    %45 = arith.addf %40, %44 : vector<8x610xf32>
    %c0_39 = arith.constant 0 : index
    %c0_40 = arith.constant 0 : index
    %46 = vector.load %arg2[%c0_39, %c0_40] : memref<8x1xf32, #tpu.memory_space<vmem>>, vector<8x1xf32>
    %47 = vector.broadcast %46 : vector<8x1xf32> to vector<8x610xf32>
    %48 = arith.addf %45, %47 : vector<8x610xf32>
    %cst_41 = arith.constant 5.000000e-01 : f32
    %49 = vector.broadcast %cst_41 : f32 to vector<8x610xf32>
    %50 = arith.mulf %49, %48 : vector<8x610xf32>
    %cst_42 = arith.constant 0.707106769 : f32
    %51 = vector.broadcast %cst_42 : f32 to vector<8x610xf32>
    %52 = arith.mulf %48, %51 : vector<8x610xf32>
    %53 = math.absf %52 : vector<8x610xf32>
    %cst_43 = arith.constant 0.327591091 : f32
    %54 = vector.broadcast %cst_43 : f32 to vector<8x610xf32>
    %55 = arith.mulf %54, %53 : vector<8x610xf32>
    %cst_44 = arith.constant 1.000000e+00 : f32
    %56 = vector.broadcast %cst_44 : f32 to vector<8x610xf32>
    %57 = arith.addf %56, %55 : vector<8x610xf32>
    %cst_45 = arith.constant 1.000000e+00 : f32
    %58 = vector.broadcast %cst_45 : f32 to vector<8x610xf32>
    %59 = arith.divf %58, %57 : vector<8x610xf32>
    %cst_46 = arith.constant 1.06140542 : f32
    %60 = vector.broadcast %cst_46 : f32 to vector<8x610xf32>
    %61 = arith.mulf %60, %59 : vector<8x610xf32>
    %cst_47 = arith.constant -1.45315206 : f32
    %62 = vector.broadcast %cst_47 : f32 to vector<8x610xf32>
    %63 = arith.addf %61, %62 : vector<8x610xf32>
    %64 = arith.mulf %63, %59 : vector<8x610xf32>
    %cst_48 = arith.constant 1.42141378 : f32
    %65 = vector.broadcast %cst_48 : f32 to vector<8x610xf32>
    %66 = arith.addf %64, %65 : vector<8x610xf32>
    %67 = arith.mulf %66, %59 : vector<8x610xf32>
    %cst_49 = arith.constant -0.284496725 : f32
    %68 = vector.broadcast %cst_49 : f32 to vector<8x610xf32>
    %69 = arith.addf %67, %68 : vector<8x610xf32>
    %70 = arith.mulf %69, %59 : vector<8x610xf32>
    %cst_50 = arith.constant 0.254829586 : f32
    %71 = vector.broadcast %cst_50 : f32 to vector<8x610xf32>
    %72 = arith.addf %70, %71 : vector<8x610xf32>
    %73 = arith.mulf %72, %59 : vector<8x610xf32>
    %cst_51 = arith.constant 0.000000e+00 : f32
    %74 = vector.broadcast %cst_51 : f32 to vector<8x610xf32>
    %75 = arith.subf %74, %53 : vector<8x610xf32>
    %76 = arith.mulf %75, %53 : vector<8x610xf32>
    %77 = math.exp %76 : vector<8x610xf32>
    %78 = arith.mulf %73, %77 : vector<8x610xf32>
    %cst_52 = arith.constant 1.000000e+00 : f32
    %79 = vector.broadcast %cst_52 : f32 to vector<8x610xf32>
    %80 = arith.subf %79, %78 : vector<8x610xf32>
    %cst_53 = arith.constant 0.000000e+00 : f32
    %81 = vector.broadcast %cst_53 : f32 to vector<8x610xf32>
    %82 = arith.cmpf olt, %52, %81 : vector<8x610xf32>
    %cst_54 = arith.constant 0.000000e+00 : f32
    %83 = vector.broadcast %cst_54 : f32 to vector<8x610xf32>
    %84 = arith.subf %83, %80 : vector<8x610xf32>
    %85 = arith.select %82, %84, %80 : vector<8x610xi1>, vector<8x610xf32>
    %cst_55 = arith.constant 1.000000e+00 : f32
    %86 = vector.broadcast %cst_55 : f32 to vector<8x610xf32>
    %87 = arith.addf %86, %85 : vector<8x610xf32>
    %88 = arith.mulf %50, %87 : vector<8x610xf32>
    %c0_56 = arith.constant 0 : index
    %c0_57 = arith.constant 0 : index
    %89 = vector.load %arg3[%c0_56, %c0_57] : memref<8x610xf32, #tpu.memory_space<vmem>>, vector<8x610xf32>
    tpu.vector_store %arg3[%c0_56, %c0_57], %88 {strides = array<i32>} : memref<8x610xf32, #tpu.memory_space<vmem>>, vector<8x610xf32>,
    return
  }
}

module attributes {stable_mosaic.version = 11 : i64} {
  func.func @_conv3x3_kernel(%arg0: memref<8x512xf32, #tpu.memory_space<vmem>>, %arg1: memref<9x8x8xf32, #tpu.memory_space<vmem>>, %arg2: memref<8x1xf32, #tpu.memory_space<vmem>>, %arg3: memref<8x478xf32, #tpu.memory_space<vmem>>) attributes {dimension_semantics = [], scalar_prefetch = 0 : i64, scratch_operands = 0 : i64, tpu.core_type = #tpu.core_type<tc>} {
    %cst = arith.constant 0.000000e+00 : f32
    %0 = vector.broadcast %cst : f32 to vector<8x478xf32>
    %c0 = arith.constant 0 : index
    %c0_0 = arith.constant 0 : index
    %c0_1 = arith.constant 0 : index
    %1 = vector.load %arg1[%c0, %c0_0, %c0_1] : memref<9x8x8xf32, #tpu.memory_space<vmem>>, vector<1x8x8xf32>
    %2 = vector.shape_cast %1 : vector<1x8x8xf32> to vector<8x8xf32>
    %c0_2 = arith.constant 0 : index
    %c0_3 = arith.constant 0 : index
    %3 = vector.load %arg0[%c0_2, %c0_3] : memref<8x512xf32, #tpu.memory_space<vmem>>, vector<8x478xf32>
    %cst_4 = arith.constant dense<0.000000e+00> : vector<8x478xf32>
    %4 = tpu.matmul %2, %3, %cst_4 {dimension_numbers = #tpu.dot_dimension_numbers<[1], [0], [0], [1], [0, 0, 1, 1], [], []>} : vector<8x8xf32>, vector<8x478xf32>, vector<8x478xf32> -> vector<8x478xf32>
    %5 = arith.addf %0, %4 : vector<8x478xf32>
    %c1 = arith.constant 1 : index
    %c0_5 = arith.constant 0 : index
    %c0_6 = arith.constant 0 : index
    %6 = vector.load %arg1[%c1, %c0_5, %c0_6] : memref<9x8x8xf32, #tpu.memory_space<vmem>>, vector<1x8x8xf32>
    %7 = vector.shape_cast %6 : vector<1x8x8xf32> to vector<8x8xf32>
    %c0_7 = arith.constant 0 : index
    %c1_8 = arith.constant 1 : index
    %8 = vector.load %arg0[%c0_7, %c1_8] : memref<8x512xf32, #tpu.memory_space<vmem>>, vector<8x478xf32>
    %cst_9 = arith.constant dense<0.000000e+00> : vector<8x478xf32>
    %9 = tpu.matmul %7, %8, %cst_9 {dimension_numbers = #tpu.dot_dimension_numbers<[1], [0], [0], [1], [0, 0, 1, 1], [], []>} : vector<8x8xf32>, vector<8x478xf32>, vector<8x478xf32> -> vector<8x478xf32>
    %10 = arith.addf %5, %9 : vector<8x478xf32>
    %c2 = arith.constant 2 : index
    %c0_10 = arith.constant 0 : index
    %c0_11 = arith.constant 0 : index
    %11 = vector.load %arg1[%c2, %c0_10, %c0_11] : memref<9x8x8xf32, #tpu.memory_space<vmem>>, vector<1x8x8xf32>
    %12 = vector.shape_cast %11 : vector<1x8x8xf32> to vector<8x8xf32>
    %c0_12 = arith.constant 0 : index
    %c2_13 = arith.constant 2 : index
    %13 = vector.load %arg0[%c0_12, %c2_13] : memref<8x512xf32, #tpu.memory_space<vmem>>, vector<8x478xf32>
    %cst_14 = arith.constant dense<0.000000e+00> : vector<8x478xf32>
    %14 = tpu.matmul %12, %13, %cst_14 {dimension_numbers = #tpu.dot_dimension_numbers<[1], [0], [0], [1], [0, 0, 1, 1], [], []>} : vector<8x8xf32>, vector<8x478xf32>, vector<8x478xf32> -> vector<8x478xf32>
    %15 = arith.addf %10, %14 : vector<8x478xf32>
    %c3 = arith.constant 3 : index
    %c0_15 = arith.constant 0 : index
    %c0_16 = arith.constant 0 : index
    %16 = vector.load %arg1[%c3, %c0_15, %c0_16] : memref<9x8x8xf32, #tpu.memory_space<vmem>>, vector<1x8x8xf32>
    %17 = vector.shape_cast %16 : vector<1x8x8xf32> to vector<8x8xf32>
    %c0_17 = arith.constant 0 : index
    %c16 = arith.constant 16 : index
    %18 = vector.load %arg0[%c0_17, %c16] : memref<8x512xf32, #tpu.memory_space<vmem>>, vector<8x478xf32>
    %cst_18 = arith.constant dense<0.000000e+00> : vector<8x478xf32>
    %19 = tpu.matmul %17, %18, %cst_18 {dimension_numbers = #tpu.dot_dimension_numbers<[1], [0], [0], [1], [0, 0, 1, 1], [], []>} : vector<8x8xf32>, vector<8x478xf32>, vector<8x478xf32> -> vector<8x478xf32>
    %20 = arith.addf %15, %19 : vector<8x478xf32>
    %c4 = arith.constant 4 : index
    %c0_19 = arith.constant 0 : index
    %c0_20 = arith.constant 0 : index
    %21 = vector.load %arg1[%c4, %c0_19, %c0_20] : memref<9x8x8xf32, #tpu.memory_space<vmem>>, vector<1x8x8xf32>
    %22 = vector.shape_cast %21 : vector<1x8x8xf32> to vector<8x8xf32>
    %c0_21 = arith.constant 0 : index
    %c17 = arith.constant 17 : index
    %23 = vector.load %arg0[%c0_21, %c17] : memref<8x512xf32, #tpu.memory_space<vmem>>, vector<8x478xf32>
    %cst_22 = arith.constant dense<0.000000e+00> : vector<8x478xf32>
    %24 = tpu.matmul %22, %23, %cst_22 {dimension_numbers = #tpu.dot_dimension_numbers<[1], [0], [0], [1], [0, 0, 1, 1], [], []>} : vector<8x8xf32>, vector<8x478xf32>, vector<8x478xf32> -> vector<8x478xf32>
    %25 = arith.addf %20, %24 : vector<8x478xf32>
    %c5 = arith.constant 5 : index
    %c0_23 = arith.constant 0 : index
    %c0_24 = arith.constant 0 : index
    %26 = vector.load %arg1[%c5, %c0_23, %c0_24] : memref<9x8x8xf32, #tpu.memory_space<vmem>>, vector<1x8x8xf32>
    %27 = vector.shape_cast %26 : vector<1x8x8xf32> to vector<8x8xf32>
    %c0_25 = arith.constant 0 : index
    %c18 = arith.constant 18 : index
    %28 = vector.load %arg0[%c0_25, %c18] : memref<8x512xf32, #tpu.memory_space<vmem>>, vector<8x478xf32>
    %cst_26 = arith.constant dense<0.000000e+00> : vector<8x478xf32>
    %29 = tpu.matmul %27, %28, %cst_26 {dimension_numbers = #tpu.dot_dimension_numbers<[1], [0], [0], [1], [0, 0, 1, 1], [], []>} : vector<8x8xf32>, vector<8x478xf32>, vector<8x478xf32> -> vector<8x478xf32>
    %30 = arith.addf %25, %29 : vector<8x478xf32>
    %c6 = arith.constant 6 : index
    %c0_27 = arith.constant 0 : index
    %c0_28 = arith.constant 0 : index
    %31 = vector.load %arg1[%c6, %c0_27, %c0_28] : memref<9x8x8xf32, #tpu.memory_space<vmem>>, vector<1x8x8xf32>
    %32 = vector.shape_cast %31 : vector<1x8x8xf32> to vector<8x8xf32>
    %c0_29 = arith.constant 0 : index
    %c32 = arith.constant 32 : index
    %33 = vector.load %arg0[%c0_29, %c32] : memref<8x512xf32, #tpu.memory_space<vmem>>, vector<8x478xf32>
    %cst_30 = arith.constant dense<0.000000e+00> : vector<8x478xf32>
    %34 = tpu.matmul %32, %33, %cst_30 {dimension_numbers = #tpu.dot_dimension_numbers<[1], [0], [0], [1], [0, 0, 1, 1], [], []>} : vector<8x8xf32>, vector<8x478xf32>, vector<8x478xf32> -> vector<8x478xf32>
    %35 = arith.addf %30, %34 : vector<8x478xf32>
    %c7 = arith.constant 7 : index
    %c0_31 = arith.constant 0 : index
    %c0_32 = arith.constant 0 : index
    %36 = vector.load %arg1[%c7, %c0_31, %c0_32] : memref<9x8x8xf32, #tpu.memory_space<vmem>>, vector<1x8x8xf32>
    %37 = vector.shape_cast %36 : vector<1x8x8xf32> to vector<8x8xf32>
    %c0_33 = arith.constant 0 : index
    %c33 = arith.constant 33 : index
    %38 = vector.load %arg0[%c0_33, %c33] : memref<8x512xf32, #tpu.memory_space<vmem>>, vector<8x478xf32>
    %cst_34 = arith.constant dense<0.000000e+00> : vector<8x478xf32>
    %39 = tpu.matmul %37, %38, %cst_34 {dimension_numbers = #tpu.dot_dimension_numbers<[1], [0], [0], [1], [0, 0, 1, 1], [], []>} : vector<8x8xf32>, vector<8x478xf32>, vector<8x478xf32> -> vector<8x478xf32>
    %40 = arith.addf %35, %39 : vector<8x478xf32>
    %c8 = arith.constant 8 : index
    %c0_35 = arith.constant 0 : index
    %c0_36 = arith.constant 0 : index
    %41 = vector.load %arg1[%c8, %c0_35, %c0_36] : memref<9x8x8xf32, #tpu.memory_space<vmem>>, vector<1x8x8xf32>
    %42 = vector.shape_cast %41 : vector<1x8x8xf32> to vector<8x8xf32>
    %c0_37 = arith.constant 0 : index
    %c34 = arith.constant 34 : index
    %43 = vector.load %arg0[%c0_37, %c34] : memref<8x512xf32, #tpu.memory_space<vmem>>, vector<8x478xf32>
    %cst_38 = arith.constant dense<0.000000e+00> : vector<8x478xf32>
    %44 = tpu.matmul %42, %43, %cst_38 {dimension_numbers = #tpu.dot_dimension_numbers<[1], [0], [0], [1], [0, 0, 1, 1], [], []>} : vector<8x8xf32>, vector<8x478xf32>, vector<8x478xf32> -> vector<8x478xf32>
    %45 = arith.addf %40, %44 : vector<8x478xf32>
    %c0_39 = arith.constant 0 : index
    %c0_40 = arith.constant 0 : index
    %46 = vector.load %arg2[%c0_39, %c0_40] : memref<8x1xf32, #tpu.memory_space<vmem>>, vector<8x1xf32>
    %47 = vector.broadcast %46 : vector<8x1xf32> to vector<8x478xf32>
    %48 = arith.addf %45, %47 : vector<8x478xf32>
    %cst_41 = arith.constant 5.000000e-01 : f32
    %49 = vector.broadcast %cst_41 : f32 to vector<8x478xf32>
    %50 = arith.mulf %49, %48 : vector<8x478xf32>
    %cst_42 = arith.constant 0.707106769 : f32
    %51 = vector.broadcast %cst_42 : f32 to vector<8x478xf32>
    %52 = arith.mulf %48, %51 : vector<8x478xf32>
    %53 = math.absf %52 : vector<8x478xf32>
    %cst_43 = arith.constant 0.327591091 : f32
    %54 = vector.broadcast %cst_43 : f32 to vector<8x478xf32>
    %55 = arith.mulf %54, %53 : vector<8x478xf32>
    %cst_44 = arith.constant 1.000000e+00 : f32
    %56 = vector.broadcast %cst_44 : f32 to vector<8x478xf32>
    %57 = arith.addf %56, %55 : vector<8x478xf32>
    %cst_45 = arith.constant 1.000000e+00 : f32
    %58 = vector.broadcast %cst_45 : f32 to vector<8x478xf32>
    %59 = arith.divf %58, %57 : vector<8x478xf32>
    %cst_46 = arith.constant 1.06140542 : f32
    %60 = vector.broadcast %cst_46 : f32 to vector<8x478xf32>
    %61 = arith.mulf %60, %59 : vector<8x478xf32>
    %cst_47 = arith.constant -1.45315206 : f32
    %62 = vector.broadcast %cst_47 : f32 to vector<8x478xf32>
    %63 = arith.addf %61, %62 : vector<8x478xf32>
    %64 = arith.mulf %63, %59 : vector<8x478xf32>
    %cst_48 = arith.constant 1.42141378 : f32
    %65 = vector.broadcast %cst_48 : f32 to vector<8x478xf32>
    %66 = arith.addf %64, %65 : vector<8x478xf32>
    %67 = arith.mulf %66, %59 : vector<8x478xf32>
    %cst_49 = arith.constant -0.284496725 : f32
    %68 = vector.broadcast %cst_49 : f32 to vector<8x478xf32>
    %69 = arith.addf %67, %68 : vector<8x478xf32>
    %70 = arith.mulf %69, %59 : vector<8x478xf32>
    %cst_50 = arith.constant 0.254829586 : f32
    %71 = vector.broadcast %cst_50 : f32 to vector<8x478xf32>
    %72 = arith.addf %70, %71 : vector<8x478xf32>
    %73 = arith.mulf %72, %59 : vector<8x478xf32>
    %cst_51 = arith.constant 0.000000e+00 : f32
    %74 = vector.broadcast %cst_51 : f32 to vector<8x478xf32>
    %75 = arith.subf %74, %53 : vector<8x478xf32>
    %76 = arith.mulf %75, %53 : vector<8x478xf32>
    %77 = math.exp %76 : vector<8x478xf32>
    %78 = arith.mulf %73, %77 : vector<8x478xf32>
    %cst_52 = arith.constant 1.000000e+00 : f32
    %79 = vector.broadcast %cst_52 : f32 to vector<8x478xf32>
    %80 = arith.subf %79, %78 : vector<8x478xf32>
    %cst_53 = arith.constant 0.000000e+00 : f32
    %81 = vector.broadcast %cst_53 : f32 to vector<8x478xf32>
    %82 = arith.cmpf olt, %52, %81 : vector<8x478xf32>
    %cst_54 = arith.constant 0.000000e+00 : f32
    %83 = vector.broadcast %cst_54 : f32 to vector<8x478xf32>
    %84 = arith.subf %83, %80 : vector<8x478xf32>
    %85 = arith.select %82, %84, %80 : vector<8x478xi1>, vector<8x478xf32>
    %cst_55 = arith.constant 1.000000e+00 : f32
    %86 = vector.broadcast %cst_55 : f32 to vector<8x478xf32>
    %87 = arith.addf %86, %85 : vector<8x478xf32>
    %88 = arith.mulf %50, %87 : vector<8x478xf32>
    %c0_56 = arith.constant 0 : index
    %c0_57 = arith.constant 0 : index
    %89 = vector.load %arg3[%c0_56, %c0_57] : memref<8x478xf32, #tpu.memory_space<vmem>>, vector<8x478xf32>
    tpu.vector_store %arg3[%c0_56, %c0_57], %88 {strides = array<i32>} : memref<8x478xf32, #tpu.memory_space<vmem>>, vector<8x478xf32>,
    return
  }
}

module attributes {stable_mosaic.version = 11 : i64} {
  func.func @_conv3x3_kernel(%arg0: memref<8x1800xf32, #tpu.memory_space<vmem>>, %arg1: memref<9x3x8xf32, #tpu.memory_space<vmem>>, %arg2: memref<3x1xf32, #tpu.memory_space<vmem>>, %arg3: memref<3x1738xf32, #tpu.memory_space<vmem>>) attributes {dimension_semantics = [], scalar_prefetch = 0 : i64, scratch_operands = 0 : i64, tpu.core_type = #tpu.core_type<tc>} {
    %cst = arith.constant 0.000000e+00 : f32
    %0 = vector.broadcast %cst : f32 to vector<3x1738xf32>
    %c0 = arith.constant 0 : index
    %c0_0 = arith.constant 0 : index
    %c0_1 = arith.constant 0 : index
    %1 = vector.load %arg1[%c0, %c0_0, %c0_1] : memref<9x3x8xf32, #tpu.memory_space<vmem>>, vector<1x3x8xf32>
    %2 = vector.shape_cast %1 : vector<1x3x8xf32> to vector<3x8xf32>
    %c0_2 = arith.constant 0 : index
    %c0_3 = arith.constant 0 : index
    %3 = vector.load %arg0[%c0_2, %c0_3] : memref<8x1800xf32, #tpu.memory_space<vmem>>, vector<8x1738xf32>
    %cst_4 = arith.constant dense<0.000000e+00> : vector<3x1738xf32>
    %4 = tpu.matmul %2, %3, %cst_4 {dimension_numbers = #tpu.dot_dimension_numbers<[1], [0], [0], [1], [0, 0, 1, 1], [], []>} : vector<3x8xf32>, vector<8x1738xf32>, vector<3x1738xf32> -> vector<3x1738xf32>
    %5 = arith.addf %0, %4 : vector<3x1738xf32>
    %c1 = arith.constant 1 : index
    %c0_5 = arith.constant 0 : index
    %c0_6 = arith.constant 0 : index
    %6 = vector.load %arg1[%c1, %c0_5, %c0_6] : memref<9x3x8xf32, #tpu.memory_space<vmem>>, vector<1x3x8xf32>
    %7 = vector.shape_cast %6 : vector<1x3x8xf32> to vector<3x8xf32>
    %c0_7 = arith.constant 0 : index
    %c1_8 = arith.constant 1 : index
    %8 = vector.load %arg0[%c0_7, %c1_8] : memref<8x1800xf32, #tpu.memory_space<vmem>>, vector<8x1738xf32>
    %cst_9 = arith.constant dense<0.000000e+00> : vector<3x1738xf32>
    %9 = tpu.matmul %7, %8, %cst_9 {dimension_numbers = #tpu.dot_dimension_numbers<[1], [0], [0], [1], [0, 0, 1, 1], [], []>} : vector<3x8xf32>, vector<8x1738xf32>, vector<3x1738xf32> -> vector<3x1738xf32>
    %10 = arith.addf %5, %9 : vector<3x1738xf32>
    %c2 = arith.constant 2 : index
    %c0_10 = arith.constant 0 : index
    %c0_11 = arith.constant 0 : index
    %11 = vector.load %arg1[%c2, %c0_10, %c0_11] : memref<9x3x8xf32, #tpu.memory_space<vmem>>, vector<1x3x8xf32>
    %12 = vector.shape_cast %11 : vector<1x3x8xf32> to vector<3x8xf32>
    %c0_12 = arith.constant 0 : index
    %c2_13 = arith.constant 2 : index
    %13 = vector.load %arg0[%c0_12, %c2_13] : memref<8x1800xf32, #tpu.memory_space<vmem>>, vector<8x1738xf32>
    %cst_14 = arith.constant dense<0.000000e+00> : vector<3x1738xf32>
    %14 = tpu.matmul %12, %13, %cst_14 {dimension_numbers = #tpu.dot_dimension_numbers<[1], [0], [0], [1], [0, 0, 1, 1], [], []>} : vector<3x8xf32>, vector<8x1738xf32>, vector<3x1738xf32> -> vector<3x1738xf32>
    %15 = arith.addf %10, %14 : vector<3x1738xf32>
    %c3 = arith.constant 3 : index
    %c0_15 = arith.constant 0 : index
    %c0_16 = arith.constant 0 : index
    %16 = vector.load %arg1[%c3, %c0_15, %c0_16] : memref<9x3x8xf32, #tpu.memory_space<vmem>>, vector<1x3x8xf32>
    %17 = vector.shape_cast %16 : vector<1x3x8xf32> to vector<3x8xf32>
    %c0_17 = arith.constant 0 : index
    %c30 = arith.constant 30 : index
    %18 = vector.load %arg0[%c0_17, %c30] : memref<8x1800xf32, #tpu.memory_space<vmem>>, vector<8x1738xf32>
    %cst_18 = arith.constant dense<0.000000e+00> : vector<3x1738xf32>
    %19 = tpu.matmul %17, %18, %cst_18 {dimension_numbers = #tpu.dot_dimension_numbers<[1], [0], [0], [1], [0, 0, 1, 1], [], []>} : vector<3x8xf32>, vector<8x1738xf32>, vector<3x1738xf32> -> vector<3x1738xf32>
    %20 = arith.addf %15, %19 : vector<3x1738xf32>
    %c4 = arith.constant 4 : index
    %c0_19 = arith.constant 0 : index
    %c0_20 = arith.constant 0 : index
    %21 = vector.load %arg1[%c4, %c0_19, %c0_20] : memref<9x3x8xf32, #tpu.memory_space<vmem>>, vector<1x3x8xf32>
    %22 = vector.shape_cast %21 : vector<1x3x8xf32> to vector<3x8xf32>
    %c0_21 = arith.constant 0 : index
    %c31 = arith.constant 31 : index
    %23 = vector.load %arg0[%c0_21, %c31] : memref<8x1800xf32, #tpu.memory_space<vmem>>, vector<8x1738xf32>
    %cst_22 = arith.constant dense<0.000000e+00> : vector<3x1738xf32>
    %24 = tpu.matmul %22, %23, %cst_22 {dimension_numbers = #tpu.dot_dimension_numbers<[1], [0], [0], [1], [0, 0, 1, 1], [], []>} : vector<3x8xf32>, vector<8x1738xf32>, vector<3x1738xf32> -> vector<3x1738xf32>
    %25 = arith.addf %20, %24 : vector<3x1738xf32>
    %c5 = arith.constant 5 : index
    %c0_23 = arith.constant 0 : index
    %c0_24 = arith.constant 0 : index
    %26 = vector.load %arg1[%c5, %c0_23, %c0_24] : memref<9x3x8xf32, #tpu.memory_space<vmem>>, vector<1x3x8xf32>
    %27 = vector.shape_cast %26 : vector<1x3x8xf32> to vector<3x8xf32>
    %c0_25 = arith.constant 0 : index
    %c32 = arith.constant 32 : index
    %28 = vector.load %arg0[%c0_25, %c32] : memref<8x1800xf32, #tpu.memory_space<vmem>>, vector<8x1738xf32>
    %cst_26 = arith.constant dense<0.000000e+00> : vector<3x1738xf32>
    %29 = tpu.matmul %27, %28, %cst_26 {dimension_numbers = #tpu.dot_dimension_numbers<[1], [0], [0], [1], [0, 0, 1, 1], [], []>} : vector<3x8xf32>, vector<8x1738xf32>, vector<3x1738xf32> -> vector<3x1738xf32>
    %30 = arith.addf %25, %29 : vector<3x1738xf32>
    %c6 = arith.constant 6 : index
    %c0_27 = arith.constant 0 : index
    %c0_28 = arith.constant 0 : index
    %31 = vector.load %arg1[%c6, %c0_27, %c0_28] : memref<9x3x8xf32, #tpu.memory_space<vmem>>, vector<1x3x8xf32>
    %32 = vector.shape_cast %31 : vector<1x3x8xf32> to vector<3x8xf32>
    %c0_29 = arith.constant 0 : index
    %c60 = arith.constant 60 : index
    %33 = vector.load %arg0[%c0_29, %c60] : memref<8x1800xf32, #tpu.memory_space<vmem>>, vector<8x1738xf32>
    %cst_30 = arith.constant dense<0.000000e+00> : vector<3x1738xf32>
    %34 = tpu.matmul %32, %33, %cst_30 {dimension_numbers = #tpu.dot_dimension_numbers<[1], [0], [0], [1], [0, 0, 1, 1], [], []>} : vector<3x8xf32>, vector<8x1738xf32>, vector<3x1738xf32> -> vector<3x1738xf32>
    %35 = arith.addf %30, %34 : vector<3x1738xf32>
    %c7 = arith.constant 7 : index
    %c0_31 = arith.constant 0 : index
    %c0_32 = arith.constant 0 : index
    %36 = vector.load %arg1[%c7, %c0_31, %c0_32] : memref<9x3x8xf32, #tpu.memory_space<vmem>>, vector<1x3x8xf32>
    %37 = vector.shape_cast %36 : vector<1x3x8xf32> to vector<3x8xf32>
    %c0_33 = arith.constant 0 : index
    %c61 = arith.constant 61 : index
    %38 = vector.load %arg0[%c0_33, %c61] : memref<8x1800xf32, #tpu.memory_space<vmem>>, vector<8x1738xf32>
    %cst_34 = arith.constant dense<0.000000e+00> : vector<3x1738xf32>
    %39 = tpu.matmul %37, %38, %cst_34 {dimension_numbers = #tpu.dot_dimension_numbers<[1], [0], [0], [1], [0, 0, 1, 1], [], []>} : vector<3x8xf32>, vector<8x1738xf32>, vector<3x1738xf32> -> vector<3x1738xf32>
    %40 = arith.addf %35, %39 : vector<3x1738xf32>
    %c8 = arith.constant 8 : index
    %c0_35 = arith.constant 0 : index
    %c0_36 = arith.constant 0 : index
    %41 = vector.load %arg1[%c8, %c0_35, %c0_36] : memref<9x3x8xf32, #tpu.memory_space<vmem>>, vector<1x3x8xf32>
    %42 = vector.shape_cast %41 : vector<1x3x8xf32> to vector<3x8xf32>
    %c0_37 = arith.constant 0 : index
    %c62 = arith.constant 62 : index
    %43 = vector.load %arg0[%c0_37, %c62] : memref<8x1800xf32, #tpu.memory_space<vmem>>, vector<8x1738xf32>
    %cst_38 = arith.constant dense<0.000000e+00> : vector<3x1738xf32>
    %44 = tpu.matmul %42, %43, %cst_38 {dimension_numbers = #tpu.dot_dimension_numbers<[1], [0], [0], [1], [0, 0, 1, 1], [], []>} : vector<3x8xf32>, vector<8x1738xf32>, vector<3x1738xf32> -> vector<3x1738xf32>
    %45 = arith.addf %40, %44 : vector<3x1738xf32>
    %c0_39 = arith.constant 0 : index
    %c0_40 = arith.constant 0 : index
    %46 = vector.load %arg2[%c0_39, %c0_40] : memref<3x1xf32, #tpu.memory_space<vmem>>, vector<3x1xf32>
    %47 = vector.broadcast %46 : vector<3x1xf32> to vector<3x1738xf32>
    %48 = arith.addf %45, %47 : vector<3x1738xf32>
    %49 = math.tanh %48 : vector<3x1738xf32>
    %c0_41 = arith.constant 0 : index
    %c0_42 = arith.constant 0 : index
    %50 = vector.load %arg3[%c0_41, %c0_42] : memref<3x1738xf32, #tpu.memory_space<vmem>>, vector<3x1738xf32>
    tpu.vector_store %arg3[%c0_41, %c0_42], %49 {strides = array<i32>} : memref<3x1738xf32, #tpu.memory_space<vmem>>, vector<3x1738xf32>,
    return
  }
}

</mosaic_0001>

<bundles_post_ra>
// kernel: decoder_forward.6
= control target key start
LH: loop header
LB: loop body
LE: loop exit
PB: predicated region body
PF: predicated region fallthrough
CT: control target
= control target key end

     0   :  { %8 = vsyncpa [#allocation3], 0  ;;  %s216_s15 = smov [#allocation2]   ;;  %s217_s17 = smov 256   ;;  %s267_s0 = inlined_call_operand.vmem [shape: f32[2,16], index: 0, kind: input, shape index: {}]   ;;  %s268_s1 = inlined_call_operand.hbm [shape: f32[16,256], index: 1, kind: input, shape index: {}]   ;;  %s269_s2 = inlined_call_operand.vmem [shape: f32[1,256], index: 2, kind: input, shape index: {}]   ;;  %s270_s3 = inlined_call_operand.vmem [shape: f32[2,256], index: 3, kind: output, shape index: {}]  }
   0x1   :  { %s15_s14 = sshll.u32 %s268_s1, 4  ;;  %s17_s16 = sshll.u32 %s216_s15, 4  ;;  %s16_s14 = int_to_ptr.hbm [resolvable:$true] %s15_s14  ;;  %s18_s16 = int_to_ptr.vmem [resolvable:$true] %s17_s16 }
   0x2   :  { %s218_s18 = smov 16  }
   0x3   :  { %23 = dma.hbm_to_vmem [thread:$0]  %s16_s14, 512, %s18_s16, [#allocation3], %s217_s17, %s217_s17, %s218_s18  }
   0x4   :  { %214 = dma.done.wait [#allocation3], 512  }
   0x5   :  { %215 = vsyncadd [#allocation3], 4294966784  ;;  %v33_v0 = vld [vmem:[#allocation2 + $0x10] sm:$0xff]  ;;  %v34_v1 = vld [vmem:[#allocation2 + $0x18] sm:$0xff]  ;;  %vm41_vm0 = vcmask 130048   ;;  %vm168_vm11 = vcmask 1041408  }
   0x6   :  { %v31_v2 = vld [vmem:[#allocation2] sm:$0xff]  ;;  %59 = vmatpush.msra.mxu0 %v33_v0  ;;  %79 = vmatpush.msra.mxu1 %v34_v1  ;;  %v32_v3 = vld [vmem:[#allocation2 + $0x8] sm:$0xff] }
   0x7   :  { %v30_v4 = vld [vmem:[%s267_s0] sm:$0x3] }
   0x8   :  { %60 = vmatpush.msra.mxu0 %v31_v2  ;;  %80 = vmatpush.msra.mxu1 %v32_v3  ;;  %v35_v5 = vld [vmem:[%s269_s2] sm:$0x3] }
   0x9   :  { %177 = vmatmul.msk.f32.vlgmr.msra.gmra.mxu0 %vm41_vm0, %v30_v4  ;;  %178 = vmatmul.msk.f32.vlgmr.msra.gmra.mxu1 %vm41_vm0, %v30_v4  ;;  %v37_v6 = vperm.slane %v35_v5, 0  ;;  %v38_v7 = vperm.slane %v35_v5, 1 }
  0x86   :  { %v62_v8 = vpop.f32.mrf.mxu0  ;;  %v82_v9 = vpop.f32.mrf.mxu1 }
  0x87   :  { %v248_v10 = vadd.f32 %v62_v8, %v37_v6  ;;  %v250_v11 = vadd.f32 %v82_v9, %v38_v7 }
  0x89   :  { %v253_v12 = vmul.f32 0.70710677, %v248_v10  ;;  %v256_v13 = vmul.f32 0.70710677, %v250_v11 }
  0x8b   :  { %v89_v14 = vand.u32 2147483647, %v253_v12  ;;  %v90_v15 = vand.u32 2147483647, %v256_v13  ;;  %vm155_vm9 = vcmp.lt.f32.partialorder %v253_v12, 0.0  ;;  %vm156_vm10 = vcmp.lt.f32.partialorder %v256_v13, 0.0 }
  0x8d   :  { %v91_v16 = vmul.f32 0.3275911, %v89_v14  ;;  %v92_v17 = vmul.f32 0.3275911, %v90_v15  ;;  %v143_v38 = vsub.f32 0.0, %v89_v14  ;;  %v144_v42 = vsub.f32 0.0, %v90_v15 }
  0x8f   :  { %v93_v18 = vadd.f32 1.0, %v91_v16  ;;  %v94_v19 = vadd.f32 1.0, %v92_v17  ;;  %v145_v45 = vmul.f32 %v143_v38, %v89_v14  ;;  %v146_v48 = vmul.f32 %v144_v42, %v90_v15 }
  0x90   :  { %v86_v15 = vmul.f32 0.5, %v250_v11  ;;  %v85_v17 = vmul.f32 0.5, %v248_v10 }
  0x91   :  { %182 = vrcp.f32 %v93_v18  ;;  %v106_v25 = vand.u32 2147483648, %v93_v18  ;;  %v104_v28 = vand.u32 2147483647, %v93_v18  ;;  %v121_v29 = vand.u32 2147483648, %v94_v19 }
  0x92   :  { %184 = vrcp.f32 %v94_v19  ;;  %v119_v31 = vand.u32 2147483647, %v94_v19  ;;  %vm100_vm3 = vweird.f32 %v93_v18  ;;  %vm115_vm5 = vweird.f32 %v94_v19 }
  0x93   :  { %v107_v33 = vor.u32 1.1754944e-38, %v106_v25  ;;  %vm105_vm6 = vcmp.eq.f32.partialorder %v104_v28, 8.507059e+37  ;;  %v122_v36 = vor.u32 1.1754944e-38, %v121_v29  ;;  %v147_v51 = vmul.f32 1.442695, %v145_v45 }
  0x94   :  { %vm120_vm8 = vcmp.eq.f32.partialorder %v119_v31, 8.507059e+37  ;;  %v149_v54 = vmul.f32 1.442695, %v146_v48 }
  0x95   :  { %186 = vpow2.f32 %v147_v51 }
  0x96   :  { %188 = vpow2.f32 %v149_v54 }
  0x97   :  { %v183_v20 = vpop.eup %182 }
  0x98   :  { %v185_v21 = vpop.eup %184  ;;  %v96_v22 = vmul.f32 %v183_v20, %v93_v18  ;;  %vm101_vm1 = vweird.f32 %v183_v20 }
  0x99   :  { %v111_v23 = vmul.f32 %v185_v21, %v94_v19  ;;  %vm116_vm2 = vweird.f32 %v185_v21  ;;  %vm102_vm4 = vmor %vm100_vm3, %vm101_vm1 }
  0x9a   :  { %v97_v24 = vsub.f32 1.0, %v96_v22  ;;  %vm117_vm7 = vmor %vm115_vm5, %vm116_vm2 }
  0x9b   :  { %v112_v26 = vsub.f32 1.0, %v111_v23  ;;  %v187_v63 = vpop.eup %186 }
  0x9c   :  { %v98_v27 = vmul.f32 %v183_v20, %v97_v24  ;;  %v189_v1 = vpop.eup %188 }
  0x9d   :  { %v113_v30 = vmul.f32 %v185_v21, %v112_v26 }
  0x9e   :  { %v99_v32 = vadd.f32 %v183_v20, %v98_v27 }
  0x9f   :  { %v114_v34 = vadd.f32 %v185_v21, %v113_v30 }
  0xa0   :  { %v103_v35 = vsel %vm102_vm4, %v183_v20, %v99_v32 }
  0xa1   :  { %v108_v37 = vsel %vm105_vm6, %v107_v33, %v103_v35  ;;  %v118_v39 = vsel %vm117_vm7, %v185_v21, %v114_v34 }
  0xa2   :  { %v125_v40 = vmul.f32 1.0614054, %v108_v37  ;;  %v123_v41 = vsel %vm120_vm8, %v122_v36, %v118_v39 }
  0xa3   :  { %v126_v43 = vmul.f32 1.0614054, %v123_v41 }
  0xa4   :  { %v127_v44 = vadd.f32 -1.4531521, %v125_v40 }
  0xa5   :  { %v128_v46 = vadd.f32 -1.4531521, %v126_v43 }
  0xa6   :  { %v129_v47 = vmul.f32 %v127_v44, %v108_v37 }
  0xa7   :  { %v130_v49 = vmul.f32 %v128_v46, %v123_v41 }
  0xa8   :  { %v131_v50 = vadd.f32 1.4214138, %v129_v47 }
  0xa9   :  { %v132_v52 = vadd.f32 1.4214138, %v130_v49 }
  0xaa   :  { %v133_v53 = vmul.f32 %v131_v50, %v108_v37 }
  0xab   :  { %v134_v55 = vmul.f32 %v132_v52, %v123_v41 }
  0xac   :  { %v135_v56 = vadd.f32 -0.28449672, %v133_v53 }
  0xad   :  { %v136_v57 = vadd.f32 -0.28449672, %v134_v55 }
  0xae   :  { %v137_v58 = vmul.f32 %v135_v56, %v108_v37 }
  0xaf   :  { %v138_v59 = vmul.f32 %v136_v57, %v123_v41 }
  0xb0   :  { %v139_v60 = vadd.f32 0.2548296, %v137_v58 }
  0xb1   :  { %v140_v61 = vadd.f32 0.2548296, %v138_v59 }
  0xb2   :  { %v141_v62 = vmul.f32 %v139_v60, %v108_v37 }
  0xb3   :  { %v142_v0 = vmul.f32 %v140_v61, %v123_v41 }
  0xb4   :  { %v151_v2 = vmul.f32 %v187_v63, %v141_v62 }
  0xb5   :  { %v152_v3 = vmul.f32 %v189_v1, %v142_v0 }
  0xb6   :  { %v153_v4 = vsub.f32 1.0, %v151_v2 }
  0xb7   :  { %v154_v5 = vsub.f32 1.0, %v152_v3 }
  0xb8   :  { %v157_v6 = vsub.f32 0.0, %v153_v4 }
  0xb9   :  { %v158_v7 = vsub.f32 0.0, %v154_v5 }
  0xba   :  { %v159_v8 = vsel %vm155_vm9, %v157_v6, %v153_v4 }
  0xbb   :  { %v160_v9 = vsel %vm156_vm10, %v158_v7, %v154_v5  ;;  %v161_v14 = vadd.f32 1.0, %v159_v8 }
  0xbc   :  { %v162_v16 = vadd.f32 1.0, %v160_v9 }
  0xbd   :  { %v163_v19 = vmul.f32 %v161_v14, %v85_v17 }
  0xbe   :  { %v164_v18 = vmul.f32 %v162_v16, %v86_v15 }
  0xc0   :  { %v167_v20 = vrot.slane %v164_v18, 6 }
  0xc2   :  { %v169_v21 = vsel %vm168_vm11, %v163_v19, %v167_v20 }
  0xc3   :  { %171 = vst [vmem:[%s270_s3] sm:$0xf] %v169_v21 }
  0xc4   :  { %176 = vsyncpa [#allocation3], 1 }

// kernel: decoder_forward.7
= control target key start
LH: loop header
LB: loop body
LE: loop exit
PB: predicated region body
PF: predicated region fallthrough
CT: control target
= control target key end

     0   :  { %s1014_s16 = smov 127   ;;  %s1015_s17 = smov 126   ;;  %vm35_vm0 = vcmask 1039360   ;;  %vm158_vm1 = vcmask 1031168   ;;  %vm42_vm2 = vcmask 130048   ;;  %vm232_vm3 = vcmask 965632   ;;  %s1248_s0 = inlined_call_operand.vmem [shape: f32[16,200], index: 0, kind: input, shape index: {}]   ;;  %s1249_s1 = inlined_call_operand.vmem [shape: f32[9,16,16], index: 1, kind: input, shape index: {}]   ;;  %s1250_s2 = inlined_call_operand.vmem [shape: f32[16,1], index: 2, kind: input, shape index: {}]   ;;  %s1251_s3 = inlined_call_operand.vmem [shape: f32[16,178], index: 3, kind: output, shape index: {}]  }
   0x1   :  { %v1046_v0 = vld [vmem:[%s1248_s0 + $0x10] sm:$0xff]  ;;  %v1051_v1 = vld [vmem:[%s1248_s0 + $0x18] sm:$0xff]  ;;  %v1058_v3 = vld [vmem:[%s1248_s0] sm:$0xff]  ;;  %s1016_s22 = smov 118   ;;  %s1017_s23 = smov 117   ;;  %vm306_vm4 = vcmask 957440  }
   0x2   :  { %v915_v2 = vpack.i.bf16 %v1051_v1, %v1046_v0  ;;  %v1063_v4 = vld [vmem:[%s1248_s0 + $0x8] sm:$0xff]  ;;  %s1018_s24 = smov 116   ;;  %s1019_s25 = smov 108   ;;  %v851_v19 = vld [vmem:[%s1249_s1 + $0x18] sm:$0xff]  ;;  %v850_v27 = vld [vmem:[%s1249_s1 + $0x10] sm:$0xff]  ;;  %vm380_vm5 = vcmask 949248  }
   0x3   :  { %v920_v5 = vpack.i.bf16 %v1063_v4, %v1058_v3  ;;  %s1020_s26 = smov 107   ;;  %s1021_s0 = smov 106   ;;  %v14_v40 = vld [vmem:[%s1249_s1] sm:$0xff]  ;;  %vm454_vm6 = vcmask 883712   ;;  %v15_v55 = vld [vmem:[%s1249_s1 + $0x8] sm:$0xff]  ;;  %vm528_vm7 = vcmask 875520  }
   0x4   :  { %916 = vrot.lane.b32.xlu0 %v915_v2, %s1014_s16  ;;  %926 = vrot.lane.b32.xlu1 %v915_v2, %s1015_s17  ;;  %v860_v46 = vld [vmem:[%s1249_s1 + $0x20] sm:$0xff]  ;;  %v861_v59 = vld [vmem:[%s1249_s1 + $0x28] sm:$0xff]  ;;  %vm602_vm8 = vcmask 867328  }
   0x5   :  { %936 = vrot.lane.b32.xlu2 %v915_v2, %s1016_s22 }
   0xc   :  { %921 = vrot.lane.b32.xlu0 %v920_v5, %s1014_s16  ;;  %931 = vrot.lane.b32.xlu1 %v920_v5, %s1015_s17 }
   0xd   :  { %941 = vrot.lane.b32.xlu2 %v920_v5, %s1016_s22 }
  0x14   :  { %946 = vrot.lane.b32.xlu0 %v915_v2, %s1017_s23  ;;  %951 = vrot.lane.b32.xlu1 %v920_v5, %s1017_s23 }
  0x15   :  { %956 = vrot.lane.b32.xlu2 %v915_v2, %s1018_s24 }
  0x1c   :  { %966 = vrot.lane.b32.xlu1 %v915_v2, %s1019_s25  ;;  %961 = vrot.lane.b32.xlu0 %v920_v5, %s1018_s24 }
  0x1d   :  { %971 = vrot.lane.b32.xlu2 %v920_v5, %s1019_s25 }
  0x24   :  { %976 = vrot.lane.b32.xlu0 %v915_v2, %s1020_s26  ;;  %981 = vrot.lane.b32.xlu1 %v920_v5, %s1020_s26 }
  0x25   :  { %986 = vrot.lane.b32.xlu2 %v915_v2, %s1021_s0 }
  0x2c   :  { %991 = vrot.lane.b32.xlu0 %v920_v5, %s1021_s0 }
  0x5f   :  { %v937_v6 = vpop.permute.xlu2 %936 }
  0x60   :  { %v939_v21 = vunpack.i.h.bf16 %v937_v6  ;;  %v938_v22 = vunpack.i.l.bf16 %v937_v6 }
  0x62   :  { %v234_v28 = vsel %vm232_vm3, %v938_v22, %v939_v21  ;;  %v885_v22 = vld [vmem:[%s1249_s1 + $0x68] sm:$0xff] }
  0x67   :  { %v942_v12 = vpop.permute.xlu2 %941 }
  0x68   :  { %v944_v29 = vunpack.i.h.bf16 %v942_v12  ;;  %v943_v30 = vunpack.i.l.bf16 %v942_v12 }
  0x6a   :  { %v233_v41 = vsel %vm232_vm3, %v943_v30, %v944_v29 }
  0x6f   :  { %v957_v26 = vpop.permute.xlu2 %956 }
  0x70   :  { %v959_v33 = vunpack.i.h.bf16 %v957_v26  ;;  %v958_v34 = vunpack.i.l.bf16 %v957_v26  ;;  %v897_v26 = vld [vmem:[%s1249_s1 + $0x88] sm:$0xff] }
  0x72   :  { %v382_v45 = vsel %vm380_vm5, %v958_v34, %v959_v33 }
  0x76   :  { %v917_v7 = vpop.permute.xlu0 %916  ;;  %v927_v8 = vpop.permute.xlu1 %926 }
  0x77   :  { %v919_v9 = vunpack.i.h.bf16 %v917_v7  ;;  %v918_v10 = vunpack.i.l.bf16 %v917_v7  ;;  %v928_v14 = vunpack.i.l.bf16 %v927_v8  ;;  %v929_v15 = vunpack.i.h.bf16 %v927_v8  ;;  %v972_v43 = vpop.permute.xlu2 %971  ;;  %v872_v8 = vld [vmem:[%s1249_s1 + $0x40] sm:$0xff] }
  0x78   :  { %v974_v47 = vunpack.i.h.bf16 %v972_v43  ;;  %v973_v48 = vunpack.i.l.bf16 %v972_v43 }
  0x79   :  { %86 = vmatpush.msra.mxu1 %v919_v9  ;;  %904 = vmatpush.msra.mxu3 %v919_v9  ;;  %v37_v11 = vsel %vm35_vm0, %v918_v10, %v919_v9  ;;  %v160_v23 = vsel %vm158_vm1, %v928_v14, %v929_v15 }
  0x7a   :  { %63 = vmatpush.msra.mxu0 %v37_v11  ;;  %902 = vmatpush.msra.mxu2 %v37_v11  ;;  %v455_v58 = vsel %vm454_vm6, %v973_v48, %v974_v47 }
  0x7e   :  { %v922_v13 = vpop.permute.xlu0 %921  ;;  %v932_v16 = vpop.permute.xlu1 %931 }
  0x7f   :  { %v924_v17 = vunpack.i.h.bf16 %v922_v13  ;;  %v923_v18 = vunpack.i.l.bf16 %v922_v13  ;;  %v933_v24 = vunpack.i.l.bf16 %v932_v16  ;;  %v934_v25 = vunpack.i.h.bf16 %v932_v16  ;;  %v867_v13 = vld [vmem:[%s1249_s1 + $0x38] sm:$0xff]  ;;  %v878_v16 = vld [vmem:[%s1249_s1 + $0x50] sm:$0xff] }
  0x81   :  { %87 = vmatpush.msra.mxu1 %v924_v17  ;;  %905 = vmatpush.msra.mxu3 %v924_v17  ;;  %v36_v20 = vsel %vm35_vm0, %v923_v18, %v924_v17  ;;  %v159_v32 = vsel %vm158_vm1, %v933_v24, %v934_v25  ;;  %v665_v17 = vld [vmem:[%s1250_s2] sm:$0xff]  ;;  %v666_v18 = vld [vmem:[%s1250_s2 + $0x8] sm:$0xff] }
  0x82   :  { %64 = vmatpush.msra.mxu0 %v36_v20  ;;  %903 = vmatpush.msra.mxu2 %v36_v20  ;;  %v884_v20 = vld [vmem:[%s1249_s1 + $0x60] sm:$0xff] }
  0x83   :  { %855 = vmatmul.msk.f32.vlgmr.msra.gmra.mxu3 %vm42_vm2, %v851_v19  ;;  %853 = vmatmul.msk.f32.vlgmr.msra.gmra.mxu2 %vm42_vm2, %v851_v19  ;;  %v1022_v19 = vmov 0   ;;  %v896_v24 = vld [vmem:[%s1249_s1 + $0x80] sm:$0xff] }
  0x84   :  { %115 = vmatpush.msrb.mxu2 %v1046_v0  ;;  %138 = vmatpush.msrb.mxu3 %v1051_v1  ;;  %v987_v0 = vpop.permute.xlu2 %986 }
  0x85   :  { %208 = vmatpush.msrb.mxu1 %v929_v15  ;;  %185 = vmatpush.msrb.mxu0 %v160_v23  ;;  %v989_v5 = vunpack.i.h.bf16 %v987_v0  ;;  %v988_v6 = vunpack.i.l.bf16 %v987_v0  ;;  %v873_v15 = vld [vmem:[%s1249_s1 + $0x48] sm:$0xff]  ;;  %v890_v23 = vld [vmem:[%s1249_s1 + $0x70] sm:$0xff] }
  0x86   :  { %116 = vmatpush.msrb.mxu2 %v1058_v3  ;;  %139 = vmatpush.msrb.mxu3 %v1063_v4  ;;  %v947_v31 = vpop.permute.xlu0 %946  ;;  %v952_v35 = vpop.permute.xlu1 %951  ;;  %v866_v3 = vld [vmem:[%s1249_s1 + $0x30] sm:$0xff] }
  0x87   :  { %854 = vmatmul.msk.f32.vlgmr.msra.gmra.mxu1 %vm42_vm2, %v850_v27  ;;  %v949_v36 = vunpack.i.h.bf16 %v947_v31  ;;  %v948_v37 = vunpack.i.l.bf16 %v947_v31  ;;  %v954_v38 = vunpack.i.h.bf16 %v952_v35  ;;  %v953_v39 = vunpack.i.l.bf16 %v952_v35  ;;  %852 = vmatmul.msk.f32.vlgmr.msra.gmra.mxu0 %vm42_vm2, %v850_v27 }
  0x88   :  { %282 = vmatpush.msra.mxu3 %v939_v21  ;;  %259 = vmatpush.msra.mxu2 %v234_v28  ;;  %v604_v9 = vsel %vm602_vm8, %v988_v6, %v989_v5  ;;  %v879_v21 = vld [vmem:[%s1249_s1 + $0x58] sm:$0xff] }
  0x89   :  { %209 = vmatpush.msrb.mxu1 %v934_v25  ;;  %186 = vmatpush.msrb.mxu0 %v159_v32  ;;  %v308_v42 = vsel %vm306_vm4, %v948_v37, %v949_v36  ;;  %v307_v44 = vsel %vm306_vm4, %v953_v39, %v954_v38  ;;  %v891_v25 = vld [vmem:[%s1249_s1 + $0x78] sm:$0xff] }
  0x8a   :  { %283 = vmatpush.msra.mxu3 %v944_v29  ;;  %260 = vmatpush.msra.mxu2 %v233_v41 }
  0x8b   :  { %356 = vmatpush.msra.mxu1 %v949_v36  ;;  %858 = vmatmul.msk.f32.vlgmr.msrb.gmra.mxu3 %vm42_vm2, %v14_v40 }
  0x8c   :  { %856 = vmatmul.msk.f32.vlgmr.msrb.gmra.mxu2 %vm42_vm2, %v14_v40  ;;  %333 = vmatpush.msra.mxu0 %v308_v42 }
  0x8d   :  { %357 = vmatpush.msra.mxu1 %v954_v38  ;;  %430 = vmatpush.msrb.mxu3 %v959_v33 }
  0x8e   :  { %334 = vmatpush.msra.mxu0 %v307_v44  ;;  %407 = vmatpush.msrb.mxu2 %v382_v45  ;;  %v967_v49 = vpop.permute.xlu1 %966  ;;  %v962_v50 = vpop.permute.xlu0 %961 }
  0x8f   :  { %864 = vmatmul.msk.f32.vlgmr.msrb.gmra.mxu1 %vm42_vm2, %v860_v46  ;;  %v969_v51 = vunpack.i.h.bf16 %v967_v49  ;;  %v968_v52 = vunpack.i.l.bf16 %v967_v49  ;;  %v964_v53 = vunpack.i.h.bf16 %v962_v50  ;;  %v963_v54 = vunpack.i.l.bf16 %v962_v50  ;;  %862 = vmatmul.msk.f32.vlgmr.msrb.gmra.mxu0 %vm42_vm2, %v860_v46 }
  0x90   :  { %995 = vset.pattern.permute.xlu1 %v1022_v19  ;;  %996 = vset.pattern.permute.xlu2 %v1022_v19 }
  0x91   :  { %431 = vmatpush.msrb.mxu3 %v964_v53  ;;  %504 = vmatpush.msrb.mxu1 %v969_v51  ;;  %v381_v56 = vsel %vm380_vm5, %v963_v54, %v964_v53  ;;  %v456_v57 = vsel %vm454_vm6, %v968_v52, %v969_v51 }
  0x92   :  { %408 = vmatpush.msrb.mxu2 %v381_v56  ;;  %481 = vmatpush.msrb.mxu0 %v456_v57 }
  0x93   :  { %859 = vmatmul.msk.f32.gmra.mxu3 %vm42_vm2, %v15_v55  ;;  %505 = vmatpush.msrb.mxu1 %v974_v47 }
  0x94   :  { %857 = vmatmul.msk.f32.gmra.mxu2 %vm42_vm2, %v15_v55  ;;  %482 = vmatpush.msrb.mxu0 %v455_v58 }
  0x95   :  { %669 = vperm.xlu1 %995, %v665_v17   ;;  %674 = vperm.xlu2 %996, %v666_v18  }
  0x96   :  { %v977_v60 = vpop.permute.xlu0 %976  ;;  %v982_v61 = vpop.permute.xlu1 %981  ;;  %997 = vset.pattern.permute.xlu0 %v1022_v19 }
  0x97   :  { %865 = vmatmul.msk.f32.gmra.mxu1 %vm42_vm2, %v861_v59  ;;  %v979_v62 = vunpack.i.h.bf16 %v977_v60  ;;  %v978_v63 = vunpack.i.l.bf16 %v977_v60  ;;  %v984_v1 = vunpack.i.h.bf16 %v982_v61  ;;  %v983_v2 = vunpack.i.l.bf16 %v982_v61  ;;  %863 = vmatmul.msk.f32.gmra.mxu0 %vm42_vm2, %v861_v59 }
  0x99   :  { %v530_v4 = vsel %vm528_vm7, %v978_v63, %v979_v62  ;;  %v529_v7 = vsel %vm528_vm7, %v983_v2, %v984_v1 }
  0x9b   :  { %870 = vmatmul.msk.f32.vlgmr.msra.gmra.mxu3 %vm42_vm2, %v866_v3 }
  0x9c   :  { %868 = vmatmul.msk.f32.vlgmr.msra.gmra.mxu2 %vm42_vm2, %v866_v3  ;;  %578 = vmatpush.msra.mxu3 %v979_v62 }
  0x9d   :  { %555 = vmatpush.msra.mxu2 %v530_v4 }
  0x9e   :  { %579 = vmatpush.msra.mxu3 %v984_v1  ;;  %v992_v10 = vpop.permute.xlu0 %991 }
  0x9f   :  { %556 = vmatpush.msra.mxu2 %v529_v7  ;;  %876 = vmatmul.msk.f32.vlgmr.msra.gmra.mxu1 %vm42_vm2, %v872_v8  ;;  %v994_v11 = vunpack.i.h.bf16 %v992_v10  ;;  %v993_v12 = vunpack.i.l.bf16 %v992_v10 }
  0xa0   :  { %874 = vmatmul.msk.f32.vlgmr.msra.gmra.mxu0 %vm42_vm2, %v872_v8  ;;  %652 = vmatpush.msra.mxu1 %v989_v5 }
  0xa1   :  { %629 = vmatpush.msra.mxu0 %v604_v9  ;;  %v603_v14 = vsel %vm602_vm8, %v993_v12, %v994_v11 }
  0xa2   :  { %653 = vmatpush.msra.mxu1 %v994_v11 }
  0xa3   :  { %871 = vmatmul.msk.f32.gmra.mxu3 %vm42_vm2, %v867_v13  ;;  %630 = vmatpush.msra.mxu0 %v603_v14 }
  0xa4   :  { %869 = vmatmul.msk.f32.gmra.mxu2 %vm42_vm2, %v867_v13 }
  0xa7   :  { %877 = vmatmul.msk.f32.gmra.mxu1 %vm42_vm2, %v873_v15 }
  0xa8   :  { %875 = vmatmul.msk.f32.gmra.mxu0 %vm42_vm2, %v873_v15 }
  0xab   :  { %882 = vmatmul.msk.f32.vlgmr.msrb.gmra.mxu3 %vm42_vm2, %v878_v16 }
  0xac   :  { %880 = vmatmul.msk.f32.vlgmr.msrb.gmra.mxu2 %vm42_vm2, %v878_v16 }
  0xaf   :  { %888 = vmatmul.msk.f32.vlgmr.msrb.gmra.mxu1 %vm42_vm2, %v884_v20 }
  0xb0   :  { %886 = vmatmul.msk.f32.vlgmr.msrb.gmra.mxu0 %vm42_vm2, %v884_v20 }
  0xb3   :  { %883 = vmatmul.msk.f32.gmra.mxu3 %vm42_vm2, %v879_v21 }
  0xb4   :  { %881 = vmatmul.msk.f32.gmra.mxu2 %vm42_vm2, %v879_v21 }
  0xb7   :  { %889 = vmatmul.msk.f32.gmra.mxu1 %vm42_vm2, %v885_v22 }
  0xb8   :  { %887 = vmatmul.msk.f32.gmra.mxu0 %vm42_vm2, %v885_v22 }
  0xbb   :  { %894 = vmatmul.msk.f32.vlgmr.msra.gmra.mxu3 %vm42_vm2, %v890_v23 }
  0xbc   :  { %892 = vmatmul.msk.f32.vlgmr.msra.gmra.mxu2 %vm42_vm2, %v890_v23 }
  0xbf   :  { %900 = vmatmul.msk.f32.vlgmr.msra.gmra.mxu1 %vm42_vm2, %v896_v24 }
  0xc0   :  { %898 = vmatmul.msk.f32.vlgmr.msra.gmra.mxu0 %vm42_vm2, %v896_v24 }
  0xc3   :  { %895 = vmatmul.msk.f32.gmra.mxu3 %vm42_vm2, %v891_v25 }
  0xc4   :  { %893 = vmatmul.msk.f32.gmra.mxu2 %vm42_vm2, %v891_v25 }
  0xc7   :  { %901 = vmatmul.msk.f32.gmra.mxu1 %vm42_vm2, %v897_v26 }
  0xc8   :  { %899 = vmatmul.msk.f32.gmra.mxu0 %vm42_vm2, %v897_v26 }
 0x104   :  { %v89_v27 = vpop.f32.mrf.mxu1  ;;  %v66_v28 = vpop.f32.mrf.mxu0 }
 0x106   :  { %v92_v29 = vpop.f32.mrf.mxu3  ;;  %v69_v30 = vpop.f32.mrf.mxu2 }
 0x107   :  { %v670_v17 = vpop.permute.xlu1 %669 }
 0x10c   :  { %v211_v31 = vpop.f32.mrf.mxu1  ;;  %v188_v32 = vpop.f32.mrf.mxu0 }
 0x10e   :  { %v141_v33 = vpop.f32.mrf.mxu3 }
 0x10f   :  { %v118_v34 = vpop.f32.mrf.mxu2  ;;  %v142_v48 = vadd.f32 %v141_v33, %v89_v27 }
 0x110   :  { %v119_v49 = vadd.f32 %v118_v34, %v66_v28 }
 0x111   :  { %v218_v53 = vadd.f32 %v211_v31, %v142_v48 }
 0x112   :  { %v217_v54 = vadd.f32 %v188_v32, %v119_v49 }
 0x114   :  { %v214_v35 = vpop.f32.mrf.mxu1  ;;  %v191_v36 = vpop.f32.mrf.mxu0 }
 0x116   :  { %v144_v37 = vpop.f32.mrf.mxu3 }
 0x117   :  { %v121_v38 = vpop.f32.mrf.mxu2  ;;  %v145_v59 = vadd.f32 %v144_v37, %v92_v29 }
 0x118   :  { %v122_v60 = vadd.f32 %v121_v38, %v69_v30 }
 0x119   :  { %v220_v3 = vadd.f32 %v214_v35, %v145_v59 }
 0x11a   :  { %v219_v4 = vadd.f32 %v191_v36, %v122_v60 }
 0x11c   :  { %v359_v39 = vpop.f32.mrf.mxu1 }
 0x11d   :  { %v336_v40 = vpop.f32.mrf.mxu0 }
 0x11e   :  { %v285_v41 = vpop.f32.mrf.mxu3 }
 0x11f   :  { %v262_v42 = vpop.f32.mrf.mxu2  ;;  %v292_v55 = vadd.f32 %v285_v41, %v218_v53 }
 0x120   :  { %v291_v56 = vadd.f32 %v262_v42, %v217_v54 }
 0x121   :  { %v366_v63 = vadd.f32 %v359_v39, %v292_v55 }
 0x122   :  { %v365_v0 = vadd.f32 %v336_v40, %v291_v56  ;;  %v675_v40 = vpop.permute.xlu2 %674 }
 0x124   :  { %v362_v43 = vpop.f32.mrf.mxu1 }
 0x125   :  { %v339_v44 = vpop.f32.mrf.mxu0 }
 0x126   :  { %v288_v45 = vpop.f32.mrf.mxu3 }
 0x127   :  { %v265_v46 = vpop.f32.mrf.mxu2  ;;  %v294_v5 = vadd.f32 %v288_v45, %v220_v3 }
 0x128   :  { %v293_v6 = vadd.f32 %v265_v46, %v219_v4 }
 0x129   :  { %v368_v15 = vadd.f32 %v362_v43, %v294_v5 }
 0x12a   :  { %v367_v16 = vadd.f32 %v339_v44, %v293_v6 }
 0x12c   :  { %v507_v47 = vpop.f32.mrf.mxu1 }
 0x12d   :  { %v484_v50 = vpop.f32.mrf.mxu0 }
 0x12e   :  { %v433_v51 = vpop.f32.mrf.mxu3 }
 0x12f   :  { %v410_v52 = vpop.f32.mrf.mxu2  ;;  %v440_v1 = vadd.f32 %v433_v51, %v366_v63 }
 0x130   :  { %v439_v2 = vadd.f32 %v410_v52, %v365_v0 }
 0x131   :  { %v514_v7 = vadd.f32 %v507_v47, %v440_v1 }
 0x132   :  { %v513_v8 = vadd.f32 %v484_v50, %v439_v2 }
 0x134   :  { %v510_v57 = vpop.f32.mrf.mxu1 }
 0x135   :  { %v487_v58 = vpop.f32.mrf.mxu0 }
 0x136   :  { %v436_v61 = vpop.f32.mrf.mxu3 }
 0x137   :  { %v413_v62 = vpop.f32.mrf.mxu2  ;;  %v442_v20 = vadd.f32 %v436_v61, %v368_v15 }
 0x138   :  { %v441_v21 = vadd.f32 %v413_v62, %v367_v16 }
 0x139   :  { %v516_v26 = vadd.f32 %v510_v57, %v442_v20 }
 0x13a   :  { %v515_v27 = vadd.f32 %v487_v58, %v441_v21 }
 0x13c   :  { %v655_v9 = vpop.f32.mrf.mxu1 }
 0x13d   :  { %v632_v10 = vpop.f32.mrf.mxu0 }
 0x13e   :  { %v581_v11 = vpop.f32.mrf.mxu3 }
 0x13f   :  { %v558_v12 = vpop.f32.mrf.mxu2  ;;  %v588_v13 = vadd.f32 %v581_v11, %v514_v7 }
 0x140   :  { %v587_v14 = vadd.f32 %v558_v12, %v513_v8 }
 0x141   :  { %v662_v18 = vadd.f32 %v655_v9, %v588_v13 }
 0x142   :  { %v661_v19 = vadd.f32 %v632_v10, %v587_v14 }
 0x143   :  { %v1179_v23 = vadd.f32 %v670_v17, %v662_v18 }
 0x144   :  { %v1177_v22 = vadd.f32 %v670_v17, %v661_v19  ;;  %v658_v32 = vpop.f32.mrf.mxu1 }
 0x145   :  { %v1185_v25 = vmul.f32 0.70710677, %v1179_v23  ;;  %v635_v33 = vpop.f32.mrf.mxu0 }
 0x146   :  { %v1182_v24 = vmul.f32 0.70710677, %v1177_v22  ;;  %v584_v28 = vpop.f32.mrf.mxu3 }
 0x147   :  { %v561_v29 = vpop.f32.mrf.mxu2  ;;  %v690_v31 = vand.u32 2147483647, %v1185_v25  ;;  %v590_v34 = vadd.f32 %v584_v28, %v516_v26 }
 0x148   :  { %v689_v30 = vand.u32 2147483647, %v1182_v24  ;;  %v589_v35 = vadd.f32 %v561_v29, %v515_v27 }
 0x149   :  { %v694_v37 = vmul.f32 0.3275911, %v690_v31  ;;  %v664_v38 = vadd.f32 %v658_v32, %v590_v34  ;;  %v798_v57 = vsub.f32 0.0, %v690_v31 }
 0x14a   :  { %v693_v36 = vmul.f32 0.3275911, %v689_v30  ;;  %v663_v39 = vadd.f32 %v635_v33, %v589_v35  ;;  %v797_v47 = vsub.f32 0.0, %v689_v30 }
 0x14b   :  { %v698_v42 = vadd.f32 1.0, %v694_v37  ;;  %v1191_v44 = vadd.f32 %v675_v40, %v664_v38  ;;  %v802_v5 = vmul.f32 %v798_v57, %v690_v31 }
 0x14c   :  { %v697_v41 = vadd.f32 1.0, %v693_v36  ;;  %v1189_v43 = vadd.f32 %v675_v40, %v663_v39  ;;  %v801_v58 = vmul.f32 %v797_v47, %v689_v30 }
 0x14d   :  { %v1197_v46 = vmul.f32 0.70710677, %v1191_v44  ;;  %v727_v1 = vand.u32 2147483648, %v698_v42  ;;  %v725_v3 = vand.u32 2147483647, %v698_v42  ;;  %vm721_vm13 = vweird.f32 %v698_v42 }
 0x14e   :  { %998 = vrcp.f32 %v697_v41  ;;  %v1194_v45 = vmul.f32 0.70710677, %v1189_v43  ;;  %v712_v59 = vand.u32 2147483648, %v697_v41  ;;  %v710_v0 = vand.u32 2147483647, %v697_v41 }
 0x14f   :  { %1000 = vrcp.f32 %v698_v42  ;;  %v1203_v50 = vand.u32 2147483647, %v1197_v46  ;;  %vm706_vm11 = vweird.f32 %v697_v41  ;;  %v728_v9 = vor.u32 1.1754944e-38, %v727_v1 }
 0x150   :  { %v1200_v49 = vand.u32 2147483647, %v1194_v45  ;;  %v713_v6 = vor.u32 1.1754944e-38, %v712_v59  ;;  %vm711_vm14 = vcmp.eq.f32.partialorder %v710_v0, 8.507059e+37  ;;  %vm726_vm0 = vcmp.eq.f32.partialorder %v725_v3, 8.507059e+37 }
 0x151   :  { %v696_v55 = vmul.f32 0.3275911, %v1203_v50  ;;  %v805_v12 = vmul.f32 1.442695, %v801_v58  ;;  %v807_v15 = vmul.f32 1.442695, %v802_v5 }
 0x152   :  { %v695_v54 = vmul.f32 0.3275911, %v1200_v49 }
 0x153   :  { %v1209_v62 = vadd.f32 1.0, %v696_v55 }
 0x154   :  { %v999_v48 = vpop.eup %998  ;;  %v1207_v61 = vadd.f32 1.0, %v695_v54 }
 0x155   :  { %v1001_v51 = vpop.eup %1000  ;;  %v702_v52 = vmul.f32 %v999_v48, %v697_v41  ;;  %vm707_vm9 = vweird.f32 %v999_v48  ;;  %v757_v35 = vand.u32 2147483648, %v1209_v62  ;;  %v755_v38 = vand.u32 2147483647, %v1209_v62 }
 0x156   :  { %v717_v53 = vmul.f32 %v1001_v51, %v698_v42  ;;  %vm722_vm10 = vweird.f32 %v1001_v51  ;;  %1002 = vrcp.f32 %v1207_v61  ;;  %vm708_vm12 = vmor %vm706_vm11, %vm707_vm9  ;;  %v740_v30 = vand.u32 2147483647, %v1207_v61 }
 0x157   :  { %v703_v56 = vsub.f32 1.0, %v702_v52  ;;  %1004 = vrcp.f32 %v1209_v62  ;;  %vm723_vm15 = vmor %vm721_vm13, %vm722_vm10  ;;  %v742_v31 = vand.u32 2147483648, %v1207_v61  ;;  %vm736_vm3 = vweird.f32 %v1207_v61 }
 0x158   :  { %v718_v60 = vsub.f32 1.0, %v717_v53  ;;  %1006 = vpow2.f32 %v805_v12  ;;  %v799_v41 = vsub.f32 0.0, %v1200_v49  ;;  %vm751_vm5 = vweird.f32 %v1209_v62 }
 0x159   :  { %v704_v63 = vmul.f32 %v999_v48, %v703_v56  ;;  %1008 = vpow2.f32 %v807_v15  ;;  %vm741_vm6 = vcmp.eq.f32.partialorder %v740_v30, 8.507059e+37  ;;  %v758_v55 = vor.u32 1.1754944e-38, %v757_v35 }
 0x15a   :  { %v719_v2 = vmul.f32 %v1001_v51, %v718_v60  ;;  %vm756_vm8 = vcmp.eq.f32.partialorder %v755_v38, 8.507059e+37  ;;  %v803_v5 = vmul.f32 %v799_v41, %v1200_v49  ;;  %vm821_vm9 = vcmp.lt.f32.partialorder %v1182_v24, 0.0 }
 0x15b   :  { %v705_v4 = vadd.f32 %v999_v48, %v704_v63  ;;  %v800_v63 = vsub.f32 0.0, %v1203_v50  ;;  %vm822_vm10 = vcmp.lt.f32.partialorder %v1185_v25, 0.0  ;;  %vm842_vm11 = vcmask 408576  }
 0x15c   :  { %v720_v7 = vadd.f32 %v1001_v51, %v719_v2  ;;  %v1003_v16 = vpop.eup %1002  ;;  %vm824_vm13 = vcmp.lt.f32.partialorder %v1197_v46, 0.0 }
 0x15d   :  { %v709_v8 = vsel %vm708_vm12, %v999_v48, %v705_v4  ;;  %v1005_v18 = vpop.eup %1004  ;;  %v732_v20 = vmul.f32 %v1003_v16, %v1207_v61  ;;  %vm737_vm1 = vweird.f32 %v1003_v16  ;;  %v743_v48 = vor.u32 1.1754944e-38, %v742_v31 }
 0x15e   :  { %v714_v10 = vsel %vm711_vm14, %v713_v6, %v709_v8  ;;  %v724_v11 = vsel %vm723_vm15, %v1001_v51, %v720_v7  ;;  %v747_v26 = vmul.f32 %v1005_v18, %v1209_v62  ;;  %vm752_vm2 = vweird.f32 %v1005_v18  ;;  %v1007_v42 = vpop.eup %1006  ;;  %vm738_vm4 = vmor %vm736_vm3, %vm737_vm1 }
 0x15f   :  { %v729_v13 = vsel %vm726_vm0, %v728_v9, %v724_v11  ;;  %v761_v14 = vmul.f32 1.0614054, %v714_v10  ;;  %v733_v28 = vsub.f32 1.0, %v732_v20  ;;  %v1009_v52 = vpop.eup %1008  ;;  %vm753_vm7 = vmor %vm751_vm5, %vm752_vm2  ;;  %v804_v8 = vmul.f32 %v800_v63, %v1203_v50 }
 0x160   :  { %v762_v17 = vmul.f32 1.0614054, %v729_v13  ;;  %v748_v32 = vsub.f32 1.0, %v747_v26  ;;  %vm823_vm12 = vcmp.lt.f32.partialorder %v1194_v45, 0.0 }
 0x161   :  { %v765_v19 = vadd.f32 -1.4531521, %v761_v14  ;;  %v734_v34 = vmul.f32 %v1003_v16, %v733_v28  ;;  %v811_v20 = vmul.f32 1.442695, %v804_v8 }
 0x162   :  { %v766_v21 = vadd.f32 -1.4531521, %v762_v17  ;;  %v749_v37 = vmul.f32 %v1005_v18, %v748_v32  ;;  %v809_v17 = vmul.f32 1.442695, %v803_v5 }
 0x163   :  { %v769_v27 = vmul.f32 %v765_v19, %v714_v10  ;;  %v735_v40 = vadd.f32 %v1003_v16, %v734_v34 }
 0x164   :  { %v770_v29 = vmul.f32 %v766_v21, %v729_v13  ;;  %v750_v51 = vadd.f32 %v1005_v18, %v749_v37  ;;  %1010 = vpow2.f32 %v809_v17 }
 0x165   :  { %v773_v33 = vadd.f32 1.4214138, %v769_v27  ;;  %v739_v54 = vsel %vm738_vm4, %v1003_v16, %v735_v40  ;;  %1012 = vpow2.f32 %v811_v20 }
 0x166   :  { %v774_v36 = vadd.f32 1.4214138, %v770_v29  ;;  %v744_v57 = vsel %vm741_vm6, %v743_v48, %v739_v54  ;;  %v754_v58 = vsel %vm753_vm7, %v1005_v18, %v750_v51  ;;  %v681_v29 = vmul.f32 0.5, %v1177_v22 }
 0x167   :  { %v777_v39 = vmul.f32 %v773_v33, %v714_v10  ;;  %v759_v60 = vsel %vm756_vm8, %v758_v55, %v754_v58  ;;  %v763_v61 = vmul.f32 1.0614054, %v744_v57  ;;  %v682_v33 = vmul.f32 0.5, %v1179_v23 }
 0x168   :  { %v778_v47 = vmul.f32 %v774_v36, %v729_v13  ;;  %v764_v1 = vmul.f32 1.0614054, %v759_v60  ;;  %v684_v55 = vmul.f32 0.5, %v1191_v44 }
 0x169   :  { %v781_v53 = vadd.f32 -0.28449672, %v777_v39  ;;  %v767_v62 = vadd.f32 -1.4531521, %v763_v61 }
 0x16a   :  { %v782_v56 = vadd.f32 -0.28449672, %v778_v47  ;;  %v768_v4 = vadd.f32 -1.4531521, %v764_v1  ;;  %v1011_v39 = vpop.eup %1010 }
 0x16b   :  { %v785_v59 = vmul.f32 %v781_v53, %v714_v10  ;;  %v771_v7 = vmul.f32 %v767_v62, %v744_v57  ;;  %v1013_v40 = vpop.eup %1012 }
 0x16c   :  { %v786_v0 = vmul.f32 %v782_v56, %v729_v13  ;;  %v772_v11 = vmul.f32 %v768_v4, %v759_v60 }
 0x16d   :  { %v789_v2 = vadd.f32 0.2548296, %v785_v59  ;;  %v775_v14 = vadd.f32 1.4214138, %v771_v7 }
 0x16e   :  { %v790_v3 = vadd.f32 0.2548296, %v786_v0  ;;  %v776_v16 = vadd.f32 1.4214138, %v772_v11 }
 0x16f   :  { %v793_v6 = vmul.f32 %v789_v2, %v714_v10  ;;  %v779_v19 = vmul.f32 %v775_v14, %v744_v57 }
 0x170   :  { %v794_v9 = vmul.f32 %v790_v3, %v729_v13  ;;  %v780_v26 = vmul.f32 %v776_v16, %v759_v60 }
 0x171   :  { %v813_v12 = vmul.f32 %v1007_v42, %v793_v6  ;;  %v783_v28 = vadd.f32 -0.28449672, %v779_v19 }
 0x172   :  { %v814_v15 = vmul.f32 %v1009_v52, %v794_v9  ;;  %v784_v10 = vadd.f32 -0.28449672, %v780_v26  ;;  %v683_v52 = vmul.f32 0.5, %v1189_v43 }
 0x173   :  { %v817_v18 = vsub.f32 1.0, %v813_v12  ;;  %v787_v13 = vmul.f32 %v783_v28, %v744_v57 }
 0x174   :  { %v818_v21 = vsub.f32 1.0, %v814_v15  ;;  %v788_v32 = vmul.f32 %v784_v10, %v759_v60 }
 0x175   :  { %v825_v27 = vsub.f32 0.0, %v817_v18  ;;  %v791_v35 = vadd.f32 0.2548296, %v787_v13 }
 0x176   :  { %v826_v49 = vsub.f32 0.0, %v818_v21  ;;  %v792_v24 = vadd.f32 0.2548296, %v788_v32 }
 0x177   :  { %v829_v50 = vsel %vm821_vm9, %v825_v27, %v817_v18  ;;  %v795_v38 = vmul.f32 %v791_v35, %v744_v57 }
 0x178   :  { %v830_v30 = vsel %vm822_vm10, %v826_v49, %v818_v21  ;;  %v833_v31 = vadd.f32 1.0, %v829_v50  ;;  %v796_v25 = vmul.f32 %v792_v24, %v759_v60 }
 0x179   :  { %v834_v34 = vadd.f32 1.0, %v830_v30  ;;  %v815_v22 = vmul.f32 %v1011_v39, %v795_v38 }
 0x17a   :  { %v837_v36 = vmul.f32 %v833_v31, %v681_v29  ;;  %v816_v23 = vmul.f32 %v1013_v40, %v796_v25 }
 0x17b   :  { %v838_v37 = vmul.f32 %v834_v34, %v682_v33  ;;  %v819_v41 = vsub.f32 1.0, %v815_v22 }
 0x17c   :  { %841 = vst [vmem:[%s1251_s3] sm:$0xff] %v837_v36  ;;  %v820_v42 = vsub.f32 1.0, %v816_v23 }
 0x17d   :  { %843 = vst.msk [vmem:[%s1251_s3 + $0x8] sm:$0xff] %vm842_vm11, %v838_v37  ;;  %v827_v47 = vsub.f32 0.0, %v819_v41 }
 0x17e   :  { %v828_v48 = vsub.f32 0.0, %v820_v42 }
 0x17f   :  { %v831_v51 = vsel %vm823_vm12, %v827_v47, %v819_v41 }
 0x180   :  { %v832_v53 = vsel %vm824_vm13, %v828_v48, %v820_v42  ;;  %v835_v54 = vadd.f32 1.0, %v831_v51 }
 0x181   :  { %v836_v56 = vadd.f32 1.0, %v832_v53 }
 0x182   :  { %v839_v57 = vmul.f32 %v835_v54, %v683_v52 }
 0x183   :  { %v840_v58 = vmul.f32 %v836_v56, %v684_v55 }
 0x184   :  { %844 = vst [vmem:[%s1251_s3 + $0x10] sm:$0xff] %v839_v57 }
 0x185   :  { %845 = vst.msk [vmem:[%s1251_s3 + $0x18] sm:$0xff] %vm842_vm11, %v840_v58 }

// kernel: decoder_forward.9
= control target key start
LH: loop header
LB: loop body
LE: loop exit
PB: predicated region body
PF: predicated region fallthrough
CT: control target
= control target key end

     0   :  { %s1888_s22 = smov 127   ;;  %s1889_s6 = smov 126   ;;  %vm57_vm0 = vcmask 1039360   ;;  %vm76_vm1 = vcmask 130048   ;;  %vm305_vm2 = vcmask 1031168   ;;  %vm454_vm3 = vcmask 900096   ;;  %s2351_s0 = inlined_call_operand.vmem [shape: f32[16,648], index: 0, kind: input, shape index: {}]   ;;  %s2352_s1 = inlined_call_operand.vmem [shape: f32[9,8,16], index: 1, kind: input, shape index: {}]   ;;  %s2353_s2 = inlined_call_operand.vmem [shape: f32[8,1], index: 2, kind: input, shape index: {}]   ;;  %s2354_s3 = inlined_call_operand.vmem [shape: f32[8,610], index: 3, kind: output, shape index: {}]  }
   0x1   :  { %v1920_v0 = vld [vmem:[%s2351_s0 + $0x40] sm:$0xff]  ;;  %v1925_v1 = vld [vmem:[%s2351_s0 + $0x48] sm:$0xff]  ;;  %v1930_v2 = vld [vmem:[%s2351_s0 + $0x30] sm:$0xff]  ;;  %s1890_s7 = smov 110   ;;  %s1891_s8 = smov 109   ;;  %vm603_vm4 = vcmask 891904  }
   0x2   :  { %v1934_v3 = vpack.i.bf16 %v1925_v1, %v1920_v0  ;;  %v1939_v4 = vld [vmem:[%s2351_s0 + $0x38] sm:$0xff]  ;;  %v1954_v7 = vld [vmem:[%s2351_s0 + $0x20] sm:$0xff]  ;;  %v1960_v8 = vld [vmem:[%s2351_s0 + $0x10] sm:$0xff]  ;;  %s1892_s9 = smov 108   ;;  %s1893_s10 = smov 92   ;;  %vm752_vm5 = vcmask 883712  }
   0x3   :  { %v1943_v5 = vpack.i.bf16 %v1939_v4, %v1930_v2  ;;  %v1948_v6 = vld [vmem:[%s2351_s0 + $0x18] sm:$0xff]  ;;  %v1965_v9 = vld [vmem:[%s2351_s0 + $0x50] sm:$0xff]  ;;  %v1974_v11 = vld [vmem:[%s2351_s0] sm:$0xff]  ;;  %v1711_v20 = vpack.i.bf16 %v1960_v8, %v1920_v0  ;;  %v1751_v21 = vpack.i.bf16 %v1920_v0, %v1939_v4  ;;  %s1894_s15 = smov 91   ;;  %s1895_s16 = smov 90   ;;  %vm929_vm6 = vcmask 752640  }
   0x4   :  { %1662 = vrot.lane.b32.xlu1 %v1934_v3, %s1888_s22  ;;  %v1969_v10 = vpack.i.bf16 %v1954_v7, %v1948_v6  ;;  %v1979_v12 = vld [vmem:[%s2351_s0 + $0x8] sm:$0xff]  ;;  %v1666_v13 = vpack.i.bf16 %v1960_v8, %v1965_v9  ;;  %v1681_v16 = vpack.i.bf16 %v1974_v11, %v1920_v0  ;;  %v1691_v17 = vpack.i.bf16 %v1948_v6, %v1925_v1  ;;  %v892_v26 = vld [vmem:[%s2351_s0 + $0x58] sm:$0xff] }
   0x5   :  { %1652 = vrot.lane.b32.xlu0 %v1943_v5, %s1888_s22  ;;  %v1656_v14 = vpack.i.bf16 %v1979_v12, %v1974_v11  ;;  %v1686_v15 = vpack.i.bf16 %v1960_v8, %v1979_v12  ;;  %v1701_v18 = vpack.i.bf16 %v1954_v7, %v1965_v9  ;;  %v1716_v19 = vpack.i.bf16 %v1965_v9, %v1925_v1  ;;  %v886_v28 = vld [vmem:[%s2351_s0 + $0x28] sm:$0xff] }
   0x6   :  { %1672 = vrot.lane.b32.xlu2 %v1969_v10, %s1888_s22  ;;  %v1761_v22 = vpack.i.bf16 %v1948_v6, %v1960_v8  ;;  %v1756_v23 = vpack.i.bf16 %v1979_v12, %v1925_v1  ;;  %v1766_v24 = vpack.i.bf16 %v1965_v9, %v1930_v2  ;;  %v1771_v25 = vpack.i.bf16 %v1954_v7, %v1974_v11  ;;  %v1589_v55 = vld [vmem:[%s2352_s1 + $0x8] sm:$0xff] }
   0x7   :  { %v1796_v27 = vpack.i.bf16 %v892_v26, %v1965_v9  ;;  %v1806_v29 = vpack.i.bf16 %v886_v28, %v1954_v7  ;;  %v1826_v30 = vpack.i.bf16 %v1948_v6, %v892_v26  ;;  %v1861_v33 = vpack.i.bf16 %v886_v28, %v892_v26 }
   0x8   :  { %vm1084_vm7 = vcmask 744448   ;;  %vm1239_vm8 = vcmask 736256  }
   0xc   :  { %1667 = vrot.lane.b32.xlu1 %v1666_v13, %s1888_s22 }
   0xd   :  { %1657 = vrot.lane.b32.xlu0 %v1656_v14, %s1888_s22 }
   0xe   :  { %1677 = vrot.lane.b32.xlu2 %v1943_v5, %s1889_s6 }
  0x14   :  { %1687 = vrot.lane.b32.xlu1 %v1686_v15, %s1889_s6 }
  0x15   :  { %1682 = vrot.lane.b32.xlu0 %v1681_v16, %s1889_s6 }
  0x16   :  { %1692 = vrot.lane.b32.xlu2 %v1691_v17, %s1889_s6 }
  0x1c   :  { %1702 = vrot.lane.b32.xlu1 %v1701_v18, %s1889_s6  ;;  %v14_v18 = vld [vmem:[%s2352_s1] sm:$0xff] }
  0x1d   :  { %1697 = vrot.lane.b32.xlu0 %v1943_v5, %s1890_s7 }
  0x1e   :  { %1707 = vrot.lane.b32.xlu2 %v1656_v14, %s1890_s7 }
  0x24   :  { %1717 = vrot.lane.b32.xlu1 %v1716_v19, %s1890_s7 }
  0x25   :  { %1712 = vrot.lane.b32.xlu0 %v1711_v20, %s1890_s7 }
  0x26   :  { %1722 = vrot.lane.b32.xlu2 %v1969_v10, %s1890_s7 }
  0x2c   :  { %1732 = vrot.lane.b32.xlu1 %v1656_v14, %s1891_s8 }
  0x2d   :  { %1727 = vrot.lane.b32.xlu0 %v1943_v5, %s1891_s8 }
  0x2e   :  { %1737 = vrot.lane.b32.xlu2 %v1934_v3, %s1891_s8 }
  0x34   :  { %1747 = vrot.lane.b32.xlu1 %v1969_v10, %s1891_s8 }
  0x35   :  { %1742 = vrot.lane.b32.xlu0 %v1666_v13, %s1891_s8 }
  0x36   :  { %1752 = vrot.lane.b32.xlu2 %v1751_v21, %s1892_s9 }
  0x3c   :  { %1762 = vrot.lane.b32.xlu1 %v1761_v22, %s1892_s9 }
  0x3d   :  { %1757 = vrot.lane.b32.xlu0 %v1756_v23, %s1892_s9 }
  0x3e   :  { %1767 = vrot.lane.b32.xlu2 %v1766_v24, %s1892_s9 }
  0x44   :  { %1777 = vrot.lane.b32.xlu1 %v1943_v5, %s1893_s10 }
  0x45   :  { %1772 = vrot.lane.b32.xlu0 %v1771_v25, %s1892_s9 }
  0x46   :  { %1782 = vrot.lane.b32.xlu2 %v1681_v16, %s1893_s10 }
  0x4c   :  { %1792 = vrot.lane.b32.xlu1 %v1691_v17, %s1893_s10 }
  0x4d   :  { %1787 = vrot.lane.b32.xlu0 %v1686_v15, %s1893_s10 }
  0x4e   :  { %1797 = vrot.lane.b32.xlu2 %v1796_v27, %s1893_s10 }
  0x54   :  { %1807 = vrot.lane.b32.xlu1 %v1806_v29, %s1893_s10 }
  0x55   :  { %1802 = vrot.lane.b32.xlu0 %v1943_v5, %s1894_s15 }
  0x56   :  { %1812 = vrot.lane.b32.xlu2 %v1656_v14, %s1894_s15 }
  0x5c   :  { %1822 = vrot.lane.b32.xlu1 %v1716_v19, %s1894_s15 }
  0x5d   :  { %1817 = vrot.lane.b32.xlu0 %v1711_v20, %s1894_s15 }
  0x5e   :  { %1827 = vrot.lane.b32.xlu2 %v1826_v30, %s1894_s15 }
  0x60   :  { %v1673_v31 = vpop.permute.xlu2 %1672 }
  0x61   :  { %v1674_v46 = vunpack.i.l.bf16 %v1673_v31  ;;  %v1675_v52 = vunpack.i.h.bf16 %v1673_v31 }
  0x63   :  { %v61_v60 = vsel %vm57_vm0, %v1674_v46, %v1675_v52 }
  0x64   :  { %1837 = vrot.lane.b32.xlu1 %v1943_v5, %s1895_s16 }
  0x65   :  { %1832 = vrot.lane.b32.xlu0 %v1806_v29, %s1894_s15 }
  0x66   :  { %1842 = vrot.lane.b32.xlu2 %v1656_v14, %s1895_s16 }
  0x68   :  { %v2026_v32 = vpop.permute.xlu2 %1677 }
  0x69   :  { %v1680_v58 = vunpack.i.h.bf16 %v2026_v32  ;;  %v1679_v59 = vunpack.i.l.bf16 %v2026_v32 }
  0x6c   :  { %1852 = vrot.lane.b32.xlu1 %v1666_v13, %s1895_s16 }
  0x6d   :  { %1847 = vrot.lane.b32.xlu0 %v1934_v3, %s1895_s16 }
  0x6e   :  { %1857 = vrot.lane.b32.xlu2 %v1969_v10, %s1895_s16  ;;  %v310_v10 = vsel %vm305_vm2, %v1679_v59, %v1680_v58 }
  0x70   :  { %v2030_v34 = vpop.permute.xlu2 %1692 }
  0x71   :  { %v1694_v63 = vunpack.i.l.bf16 %v2030_v34  ;;  %v1695_v16 = vunpack.i.h.bf16 %v2030_v34 }
  0x75   :  { %1862 = vrot.lane.b32.xlu0 %v1861_v33, %s1895_s16 }
  0x76   :  { %v1663_v35 = vpop.permute.xlu1 %1662 }
  0x77   :  { %v1665_v36 = vunpack.i.h.bf16 %v1663_v35  ;;  %v1664_v37 = vunpack.i.l.bf16 %v1663_v35  ;;  %v1653_v38 = vpop.permute.xlu0 %1652 }
  0x78   :  { %v1655_v39 = vunpack.i.h.bf16 %v1653_v38  ;;  %v1654_v40 = vunpack.i.l.bf16 %v1653_v38  ;;  %v2035_v44 = vpop.permute.xlu2 %1707 }
  0x79   :  { %v64_v41 = vsel %vm57_vm0, %v1664_v37, %v1665_v36 }
  0x7a   :  { %v62_v42 = vsel %vm57_vm0, %v1654_v40, %v1655_v39  ;;  %v63_v43 = vsel %vm57_vm0, %v1655_v39, %v1664_v37  ;;  %134 = vmatpush.msra.mxu2 %v64_v41 }
  0x7b   :  { %94 = vmatpush.msra.mxu0 %v62_v42  ;;  %114 = vmatpush.msra.mxu1 %v63_v43 }
  0x7e   :  { %v1668_v45 = vpop.permute.xlu1 %1667 }
  0x7f   :  { %v1670_v47 = vunpack.i.h.bf16 %v1668_v45  ;;  %v1669_v48 = vunpack.i.l.bf16 %v1668_v45  ;;  %v1658_v49 = vpop.permute.xlu0 %1657 }
  0x80   :  { %v1660_v50 = vunpack.i.h.bf16 %v1658_v49  ;;  %v1659_v51 = vunpack.i.l.bf16 %v1658_v49  ;;  %v2050_v61 = vpop.permute.xlu2 %1722 }
  0x81   :  { %v60_v53 = vsel %vm57_vm0, %v1670_v47, %v1674_v46  ;;  %v65_v54 = vsel %vm57_vm0, %v1665_v36, %v1669_v48  ;;  %v1724_v29 = vunpack.i.l.bf16 %v2050_v61 }
  0x82   :  { %v58_v56 = vsel %vm57_vm0, %v1659_v51, %v1660_v50  ;;  %v59_v57 = vsel %vm57_vm0, %v1660_v50, %v1670_v47  ;;  %135 = vmatpush.msra.mxu2 %v60_v53  ;;  %154 = vmatpush.msra.mxu3 %v65_v54 }
  0x83   :  { %95 = vmatpush.msra.mxu0 %v58_v56  ;;  %115 = vmatpush.msra.mxu1 %v59_v57 }
  0x84   :  { %1590 = vmatmul.msk.f32.vlgmr.msra.gmra.mxu0 %vm76_vm1, %v1589_v55  ;;  %1591 = vmatmul.msk.f32.vlgmr.msra.gmra.mxu1 %vm76_vm1, %v1589_v55 }
  0x85   :  { %1592 = vmatmul.msk.f32.vlgmr.msra.gmra.mxu2 %vm76_vm1, %v1589_v55  ;;  %174 = vmatpush.msrb.mxu0 %v1669_v48 }
  0x86   :  { %155 = vmatpush.msra.mxu3 %v61_v60  ;;  %217 = vmatpush.msrb.mxu2 %v1939_v4  ;;  %v1688_v62 = vpop.permute.xlu1 %1687 }
  0x87   :  { %1593 = vmatmul.msk.f32.vlgmr.msra.gmra.mxu3 %vm76_vm1, %v1589_v55  ;;  %175 = vmatpush.msrb.mxu0 %v1675_v52  ;;  %v1689_v3 = vunpack.i.l.bf16 %v1688_v62  ;;  %v1683_v5 = vpop.permute.xlu0 %1682  ;;  %v1690_v13 = vunpack.i.h.bf16 %v1688_v62 }
  0x88   :  { %v1685_v14 = vunpack.i.h.bf16 %v1683_v5  ;;  %v1684_v15 = vunpack.i.l.bf16 %v1683_v5  ;;  %218 = vmatpush.msrb.mxu2 %v1979_v12  ;;  %237 = vmatpush.msrb.mxu3 %v1920_v0  ;;  %v2078_v21 = vpop.permute.xlu2 %1737 }
  0x89   :  { %197 = vmatpush.msrb.mxu1 %v1930_v2  ;;  %257 = vmatpush.msra.mxu0 %v1925_v1  ;;  %v307_v1 = vsel %vm305_vm2, %v1689_v3, %v1690_v13  ;;  %v308_v2 = vsel %vm305_vm2, %v1690_v13, %v1695_v16  ;;  %v1740_v34 = vunpack.i.h.bf16 %v2078_v21  ;;  %v1739_v41 = vunpack.i.l.bf16 %v2078_v21 }
  0x8a   :  { %341 = vmatpush.msra.mxu2 %v310_v10  ;;  %238 = vmatpush.msrb.mxu3 %v1960_v8  ;;  %v306_v4 = vsel %vm305_vm2, %v1685_v14, %v1689_v3  ;;  %v311_v17 = vsel %vm305_vm2, %v1680_v58, %v1684_v15  ;;  %v312_v0 = vsel %vm305_vm2, %v1684_v15, %v1694_v63  ;;  %v1612_v14 = vld [vmem:[%s2352_s1 + $0x20] sm:$0xff] }
  0x8b   :  { %198 = vmatpush.msrb.mxu1 %v1974_v11  ;;  %258 = vmatpush.msra.mxu0 %v1948_v6  ;;  %v1710_v11 = vunpack.i.h.bf16 %v2035_v44  ;;  %v1709_v6 = vunpack.i.l.bf16 %v2035_v44  ;;  %v610_v42 = vsel %vm603_vm4, %v1739_v41, %v1740_v34  ;;  %v1606_v44 = vld [vmem:[%s2352_s1 + $0x18] sm:$0xff] }
  0x8c   :  { %342 = vmatpush.msra.mxu2 %v306_v4  ;;  %361 = vmatpush.msra.mxu3 %v311_v17 }
  0x8d   :  { %1594 = vmatmul.msk.f32.vlgmr.msrb.gmra.mxu0 %vm76_vm1, %v1589_v55  ;;  %1595 = vmatmul.msk.f32.vlgmr.msrb.gmra.mxu1 %vm76_vm1, %v14_v18  ;;  %v455_v27 = vsel %vm454_vm3, %v1709_v6, %v1710_v11 }
  0x8e   :  { %1596 = vmatmul.msk.f32.vlgmr.msrb.gmra.mxu2 %vm76_vm1, %v14_v18  ;;  %381 = vmatpush.msrb.mxu0 %v312_v0  ;;  %v1703_v8 = vpop.permute.xlu1 %1702 }
  0x8f   :  { %362 = vmatpush.msra.mxu3 %v307_v1  ;;  %v1705_v12 = vunpack.i.h.bf16 %v1703_v8  ;;  %v1704_v19 = vunpack.i.l.bf16 %v1703_v8  ;;  %v1698_v20 = vpop.permute.xlu0 %1697  ;;  %277 = vmatpush.msra.mxu1 %v1965_v9  ;;  %v1600_v9 = vld [vmem:[%s2352_s1 + $0x10] sm:$0xff] }
  0x90   :  { %1597 = vmatmul.msk.f32.vlgmr.msrb.gmra.mxu3 %vm76_vm1, %v14_v18  ;;  %382 = vmatpush.msrb.mxu0 %v308_v2  ;;  %v1700_v22 = vunpack.i.h.bf16 %v1698_v20  ;;  %v1699_v23 = vunpack.i.l.bf16 %v1698_v20  ;;  %v2098_v38 = vpop.permute.xlu2 %1752 }
  0x91   :  { %278 = vmatpush.msra.mxu1 %v1954_v7  ;;  %421 = vmatpush.msrb.mxu2 %v1704_v19  ;;  %v313_v24 = vsel %vm305_vm2, %v1694_v63, %v1704_v19  ;;  %v309_v26 = vsel %vm305_vm2, %v1695_v16, %v1705_v12  ;;  %v1725_v7 = vunpack.i.h.bf16 %v2050_v61  ;;  %v1755_v57 = vunpack.i.h.bf16 %v2098_v38 }
  0x92   :  { %v459_v25 = vsel %vm454_vm3, %v1699_v23, %v1700_v22  ;;  %v1754_v61 = vunpack.i.l.bf16 %v2098_v38 }
  0x93   :  { %401 = vmatpush.msrb.mxu1 %v313_v24  ;;  %490 = vmatpush.msrb.mxu3 %v459_v25  ;;  %v458_v37 = vsel %vm454_vm3, %v1724_v29, %v1725_v7 }
  0x94   :  { %422 = vmatpush.msrb.mxu2 %v1705_v12  ;;  %v758_v17 = vsel %vm752_vm5, %v1754_v61, %v1755_v57 }
  0x95   :  { %402 = vmatpush.msrb.mxu1 %v309_v26  ;;  %1598 = vmatmul.msk.f32.vlgmr.msra.gmra.mxu0 %vm76_vm1, %v14_v18 }
  0x96   :  { %1599 = vmatmul.msk.f32.vlgmr.msra.gmra.mxu1 %vm76_vm1, %v14_v18  ;;  %1601 = vmatmul.msk.f32.vlgmr.msra.gmra.mxu2 %vm76_vm1, %v1600_v9  ;;  %v1718_v28 = vpop.permute.xlu1 %1717 }
  0x97   :  { %491 = vmatpush.msrb.mxu3 %v455_v27  ;;  %v1720_v30 = vunpack.i.h.bf16 %v1718_v28  ;;  %v1719_v31 = vunpack.i.l.bf16 %v1718_v28  ;;  %v1713_v32 = vpop.permute.xlu0 %1712 }
  0x98   :  { %1602 = vmatmul.msk.f32.vlgmr.msra.gmra.mxu3 %vm76_vm1, %v1600_v9  ;;  %v1714_v33 = vunpack.i.l.bf16 %v1713_v32  ;;  %v1715_v35 = vunpack.i.h.bf16 %v1713_v32  ;;  %v2116_v55 = vpop.permute.xlu2 %1767 }
  0x99   :  { %570 = vmatpush.msra.mxu3 %v1720_v30  ;;  %v462_v36 = vsel %vm454_vm3, %v1719_v31, %v1720_v30  ;;  %v1769_v3 = vunpack.i.l.bf16 %v2116_v55  ;;  %v1770_v18 = vunpack.i.h.bf16 %v2116_v55 }
  0x9a   :  { %v460_v39 = vsel %vm454_vm3, %v1700_v22, %v1714_v33  ;;  %v461_v40 = vsel %vm454_vm3, %v1714_v33, %v1719_v31  ;;  %550 = vmatpush.msra.mxu2 %v462_v36  ;;  %v456_v43 = vsel %vm454_vm3, %v1710_v11, %v1715_v35  ;;  %v457_v45 = vsel %vm454_vm3, %v1715_v35, %v1724_v29  ;;  %v1618_v22 = vld [vmem:[%s2352_s1 + $0x28] sm:$0xff] }
  0x9b   :  { %510 = vmatpush.msra.mxu0 %v460_v39  ;;  %530 = vmatpush.msra.mxu1 %v461_v40  ;;  %v757_v4 = vsel %vm752_vm5, %v1769_v3, %v1754_v61 }
  0x9c   :  { %571 = vmatpush.msra.mxu3 %v1725_v7  ;;  %551 = vmatpush.msra.mxu2 %v458_v37 }
  0x9d   :  { %1603 = vmatmul.msk.f32.vlgmr.msrb.gmra.mxu0 %vm76_vm1, %v1600_v9  ;;  %531 = vmatpush.msra.mxu1 %v457_v45 }
  0x9e   :  { %1604 = vmatmul.msk.f32.vlgmr.msrb.gmra.mxu1 %vm76_vm1, %v1600_v9  ;;  %1605 = vmatmul.msk.f32.vlgmr.msrb.gmra.mxu2 %vm76_vm1, %v1600_v9  ;;  %v1733_v46 = vpop.permute.xlu1 %1732 }
  0x9f   :  { %511 = vmatpush.msra.mxu0 %v456_v43  ;;  %v1735_v47 = vunpack.i.h.bf16 %v1733_v46  ;;  %v1734_v48 = vunpack.i.l.bf16 %v1733_v46  ;;  %v1728_v49 = vpop.permute.xlu0 %1727  ;;  %679 = vmatpush.msrb.mxu2 %v610_v42 }
  0xa0   :  { %1607 = vmatmul.msk.f32.vlgmr.msrb.gmra.mxu3 %vm76_vm1, %v1606_v44  ;;  %v1730_v50 = vunpack.i.h.bf16 %v1728_v49  ;;  %v1729_v51 = vunpack.i.l.bf16 %v1728_v49  ;;  %v2132_v16 = vpop.permute.xlu2 %1782 }
  0xa1   :  { %v604_v54 = vsel %vm603_vm4, %v1734_v48, %v1735_v47  ;;  %v1784_v23 = vunpack.i.l.bf16 %v2132_v16  ;;  %v1785_v39 = vunpack.i.h.bf16 %v2132_v16 }
  0xa2   :  { %v608_v52 = vsel %vm603_vm4, %v1729_v51, %v1730_v50  ;;  %v609_v53 = vsel %vm603_vm4, %v1730_v50, %v1739_v41 }
  0xa3   :  { %639 = vmatpush.msrb.mxu0 %v608_v52  ;;  %659 = vmatpush.msrb.mxu1 %v609_v53 }
  0xa5   :  { %1608 = vmatmul.msk.f32.vlgmr.msra.gmra.mxu0 %vm76_vm1, %v1606_v44 }
  0xa6   :  { %1609 = vmatmul.msk.f32.vlgmr.msra.gmra.mxu1 %vm76_vm1, %v1606_v44  ;;  %1610 = vmatmul.msk.f32.vlgmr.msra.gmra.mxu2 %vm76_vm1, %v1606_v44  ;;  %v1748_v56 = vpop.permute.xlu1 %1747 }
  0xa7   :  { %640 = vmatpush.msrb.mxu0 %v604_v54  ;;  %v1750_v58 = vunpack.i.h.bf16 %v1748_v56  ;;  %v1749_v59 = vunpack.i.l.bf16 %v1748_v56  ;;  %v1743_v60 = vpop.permute.xlu0 %1742 }
  0xa8   :  { %1611 = vmatmul.msk.f32.vlgmr.msra.gmra.mxu3 %vm76_vm1, %v1606_v44  ;;  %v1745_v62 = vunpack.i.h.bf16 %v1743_v60  ;;  %v1744_v63 = vunpack.i.l.bf16 %v1743_v60  ;;  %v1798_v24 = vpop.permute.xlu2 %1797  ;;  %v1624_v44 = vld [vmem:[%s2352_s1 + $0x30] sm:$0xff] }
  0xa9   :  { %v607_v15 = vsel %vm603_vm4, %v1749_v59, %v1750_v58  ;;  %v1799_v33 = vunpack.i.l.bf16 %v1798_v24  ;;  %v1800_v36 = vunpack.i.h.bf16 %v1798_v24 }
  0xaa   :  { %719 = vmatpush.msra.mxu0 %v1744_v63  ;;  %v605_v5 = vsel %vm603_vm4, %v1735_v47, %v1745_v62  ;;  %v606_v10 = vsel %vm603_vm4, %v1745_v62, %v1749_v59  ;;  %v611_v13 = vsel %vm603_vm4, %v1740_v34, %v1744_v63  ;;  %v1896_v62 = vmov 0  }
  0xab   :  { %660 = vmatpush.msrb.mxu1 %v605_v5  ;;  %680 = vmatpush.msrb.mxu2 %v606_v10  ;;  %v939_v48 = vsel %vm929_vm6, %v1799_v33, %v1800_v36  ;;  %v1630_v5 = vld [vmem:[%s2352_s1 + $0x38] sm:$0xff] }
  0xac   :  { %699 = vmatpush.msrb.mxu3 %v611_v13  ;;  %720 = vmatpush.msra.mxu0 %v1750_v58  ;;  %v1368_v58 = vld [vmem:[%s2353_s2] sm:$0xff] }
  0xad   :  { %1613 = vmatmul.msk.f32.vlgmr.msrb.gmra.mxu0 %vm76_vm1, %v1612_v14  ;;  %788 = vmatpush.msra.mxu1 %v757_v4 }
  0xae   :  { %1614 = vmatmul.msk.f32.vlgmr.msrb.gmra.mxu1 %vm76_vm1, %v1612_v14  ;;  %1615 = vmatmul.msk.f32.vlgmr.msrb.gmra.mxu2 %vm76_vm1, %v1612_v14  ;;  %v1763_v0 = vpop.permute.xlu1 %1762 }
  0xaf   :  { %700 = vmatpush.msrb.mxu3 %v607_v15  ;;  %v1765_v1 = vunpack.i.h.bf16 %v1763_v0  ;;  %v1764_v2 = vunpack.i.l.bf16 %v1763_v0  ;;  %v1758_v8 = vpop.permute.xlu0 %1757  ;;  %808 = vmatpush.msra.mxu2 %v758_v17 }
  0xb0   :  { %1616 = vmatmul.msk.f32.vlgmr.msrb.gmra.mxu3 %vm76_vm1, %v1612_v14  ;;  %v1760_v11 = vunpack.i.h.bf16 %v1758_v8  ;;  %v1759_v6 = vunpack.i.l.bf16 %v1758_v8  ;;  %v2158_v38 = vpop.permute.xlu2 %1812  ;;  %1866 = vset.pattern.permute.xlu1 %v1896_v62 }
  0xb1   :  { %v755_v21 = vsel %vm752_vm5, %v1764_v2, %v1765_v1  ;;  %v1815_v51 = vunpack.i.h.bf16 %v2158_v38  ;;  %v1814_v52 = vunpack.i.l.bf16 %v2158_v38  ;;  %1867 = vset.pattern.permute.xlu0 %v1896_v62  ;;  %1371 = vperm.xlu1 %1866, %v1368_v58  }
  0xb2   :  { %v754_v12 = vsel %vm752_vm5, %v1760_v11, %v1764_v2  ;;  %v759_v19 = vsel %vm752_vm5, %v1755_v57, %v1759_v6  ;;  %v760_v20 = vsel %vm752_vm5, %v1759_v6, %v1770_v18 }
  0xb3   :  { %809 = vmatpush.msra.mxu2 %v754_v12  ;;  %828 = vmatpush.msra.mxu3 %v759_v19  ;;  %v1085_v3 = vsel %vm1084_vm7, %v1814_v52, %v1815_v51 }
  0xb4   :  { %848 = vmatpush.msrb.mxu0 %v760_v20 }
  0xb5   :  { %1617 = vmatmul.msk.f32.vlgmr.msra.gmra.mxu0 %vm76_vm1, %v1612_v14  ;;  %829 = vmatpush.msra.mxu3 %v755_v21 }
  0xb6   :  { %1620 = vmatmul.msk.f32.vlgmr.msra.gmra.mxu2 %vm76_vm1, %v1618_v22  ;;  %v1778_v25 = vpop.permute.xlu1 %1777 }
  0xb7   :  { %v1780_v9 = vunpack.i.h.bf16 %v1778_v25  ;;  %v1779_v26 = vunpack.i.l.bf16 %v1778_v25  ;;  %v1773_v27 = vpop.permute.xlu0 %1772 }
  0xb8   :  { %1621 = vmatmul.msk.f32.vlgmr.msra.gmra.mxu3 %vm76_vm1, %v1618_v22  ;;  %v1775_v7 = vunpack.i.h.bf16 %v1773_v27  ;;  %v1774_v28 = vunpack.i.l.bf16 %v1773_v27  ;;  %v1828_v61 = vpop.permute.xlu2 %1827 }
  0xb9   :  { %v935_v29 = vsel %vm929_vm6, %v1779_v26, %v1780_v9  ;;  %v936_v30 = vsel %vm929_vm6, %v1780_v9, %v1784_v23  ;;  %v1829_v10 = vunpack.i.l.bf16 %v1828_v61  ;;  %v1830_v4 = vunpack.i.h.bf16 %v1828_v61 }
  0xba   :  { %v753_v31 = vsel %vm752_vm5, %v1774_v28, %v1760_v11  ;;  %v756_v32 = vsel %vm752_vm5, %v1765_v1, %v1775_v7  ;;  %967 = vmatpush.msrb.mxu2 %v935_v29  ;;  %987 = vmatpush.msrb.mxu3 %v936_v30  ;;  %v1636_v29 = vld [vmem:[%s2352_s1 + $0x40] sm:$0xff] }
  0xbb   :  { %789 = vmatpush.msra.mxu1 %v753_v31  ;;  %849 = vmatpush.msrb.mxu0 %v756_v32 }
  0xbc   :  { %1619 = vmatmul.msk.f32.vlgmr.msra.gmra.mxu1 %vm76_vm1, %v1618_v22 }
  0xbd   :  { %1622 = vmatmul.msk.f32.vlgmr.msrb.gmra.mxu0 %vm76_vm1, %v1618_v22  ;;  %868 = vmatpush.msrb.mxu1 %v1770_v18 }
  0xbe   :  { %v1793_v34 = vpop.permute.xlu1 %1792 }
  0xbf   :  { %869 = vmatpush.msrb.mxu1 %v1775_v7  ;;  %v1794_v35 = vunpack.i.l.bf16 %v1793_v34  ;;  %v1788_v37 = vpop.permute.xlu0 %1787  ;;  %v1795_v40 = vunpack.i.h.bf16 %v1793_v34 }
  0xc0   :  { %v1790_v41 = vunpack.i.h.bf16 %v1788_v37  ;;  %v1789_v42 = vunpack.i.l.bf16 %v1788_v37  ;;  %v1843_v2 = vpop.permute.xlu2 %1842 }
  0xc1   :  { %v937_v43 = vsel %vm929_vm6, %v1784_v23, %v1794_v35  ;;  %v938_v45 = vsel %vm929_vm6, %v1794_v35, %v1799_v33  ;;  %v1845_v20 = vunpack.i.h.bf16 %v1843_v2  ;;  %v1844_v21 = vunpack.i.l.bf16 %v1843_v2 }
  0xc2   :  { %v930_v46 = vsel %vm929_vm6, %v1785_v39, %v1789_v42  ;;  %v931_v47 = vsel %vm929_vm6, %v1789_v42, %v1790_v41  ;;  %1007 = vmatpush.msra.mxu0 %v937_v43  ;;  %1027 = vmatpush.msra.mxu1 %v938_v45  ;;  %v932_v49 = vsel %vm929_vm6, %v1790_v41, %v1795_v40 }
  0xc3   :  { %968 = vmatpush.msrb.mxu2 %v930_v46  ;;  %988 = vmatpush.msrb.mxu3 %v931_v47  ;;  %v1240_v28 = vsel %vm1239_vm8, %v1844_v21, %v1845_v20 }
  0xc4   :  { %1623 = vmatmul.msk.f32.vlgmr.msrb.gmra.mxu1 %vm76_vm1, %v1618_v22  ;;  %1625 = vmatmul.msk.f32.vlgmr.msrb.gmra.mxu2 %vm76_vm1, %v1624_v44 }
  0xc5   :  { %1626 = vmatmul.msk.f32.vlgmr.msrb.gmra.mxu3 %vm76_vm1, %v1624_v44  ;;  %1008 = vmatpush.msra.mxu0 %v932_v49 }
  0xc6   :  { %1627 = vmatmul.msk.f32.vlgmr.msra.gmra.mxu0 %vm76_vm1, %v1624_v44  ;;  %v1808_v50 = vpop.permute.xlu1 %1807  ;;  %1047 = vmatpush.msra.mxu2 %v939_v48 }
  0xc7   :  { %v1810_v53 = vunpack.i.h.bf16 %v1808_v50  ;;  %v1809_v54 = vunpack.i.l.bf16 %v1808_v50  ;;  %v1803_v55 = vpop.permute.xlu0 %1802 }
  0xc8   :  { %v1805_v56 = vunpack.i.h.bf16 %v1803_v55  ;;  %v1804_v57 = vunpack.i.l.bf16 %v1803_v55  ;;  %v1858_v30 = vpop.permute.xlu2 %1857 }
  0xc9   :  { %v933_v59 = vsel %vm929_vm6, %v1795_v40, %v1809_v54  ;;  %v934_v60 = vsel %vm929_vm6, %v1809_v54, %v1810_v53  ;;  %v1859_v32 = vunpack.i.l.bf16 %v1858_v30  ;;  %v1860_v35 = vunpack.i.h.bf16 %v1858_v30 }
  0xca   :  { %1028 = vmatpush.msra.mxu1 %v933_v59  ;;  %1048 = vmatpush.msra.mxu2 %v934_v60  ;;  %v1090_v63 = vsel %vm1084_vm7, %v1804_v57, %v1805_v56 }
  0xcb   :  { %1122 = vmatpush.msra.mxu3 %v1090_v63  ;;  %v1243_v43 = vsel %vm1239_vm8, %v1859_v32, %v1860_v35 }
  0xcc   :  { %1628 = vmatmul.msk.f32.vlgmr.msra.gmra.mxu1 %vm76_vm1, %v1624_v44  ;;  %1629 = vmatmul.msk.f32.vlgmr.msra.gmra.mxu2 %vm76_vm1, %v1624_v44 }
  0xcd   :  { %1123 = vmatpush.msra.mxu3 %v1085_v3 }
  0xce   :  { %1631 = vmatmul.msk.f32.vlgmr.msra.gmra.mxu3 %vm76_vm1, %v1630_v5  ;;  %v1823_v13 = vpop.permute.xlu1 %1822 }
  0xcf   :  { %v1825_v14 = vunpack.i.h.bf16 %v1823_v13  ;;  %v1824_v15 = vunpack.i.l.bf16 %v1823_v13  ;;  %v1818_v16 = vpop.permute.xlu0 %1817 }
  0xd0   :  { %v1820_v17 = vunpack.i.h.bf16 %v1818_v16  ;;  %v1819_v18 = vunpack.i.l.bf16 %v1818_v16 }
  0xd1   :  { %v1093_v0 = vsel %vm1084_vm7, %v1824_v15, %v1825_v14  ;;  %v1094_v1 = vsel %vm1084_vm7, %v1825_v14, %v1829_v10 }
  0xd2   :  { %v1091_v8 = vsel %vm1084_vm7, %v1805_v56, %v1819_v18  ;;  %v1092_v11 = vsel %vm1084_vm7, %v1819_v18, %v1824_v15  ;;  %1182 = vmatpush.msrb.mxu2 %v1093_v0  ;;  %v1086_v6 = vsel %vm1084_vm7, %v1815_v51, %v1820_v17  ;;  %v1087_v12 = vsel %vm1084_vm7, %v1820_v17, %v1830_v4 }
  0xd3   :  { %1142 = vmatpush.msrb.mxu0 %v1091_v8  ;;  %1162 = vmatpush.msrb.mxu1 %v1092_v11 }
  0xd4   :  { %1202 = vmatpush.msrb.mxu3 %v1094_v1 }
  0xd5   :  { %1143 = vmatpush.msrb.mxu0 %v1086_v6  ;;  %1163 = vmatpush.msrb.mxu1 %v1087_v12 }
  0xd6   :  { %1632 = vmatmul.msk.f32.vlgmr.msrb.gmra.mxu0 %vm76_vm1, %v1630_v5  ;;  %1633 = vmatmul.msk.f32.vlgmr.msrb.gmra.mxu1 %vm76_vm1, %v1630_v5  ;;  %v1838_v19 = vpop.permute.xlu1 %1837 }
  0xd7   :  { %v1840_v22 = vunpack.i.h.bf16 %v1838_v19  ;;  %v1839_v23 = vunpack.i.l.bf16 %v1838_v19  ;;  %v1833_v24 = vpop.permute.xlu0 %1832 }
  0xd8   :  { %v1835_v25 = vunpack.i.h.bf16 %v1833_v24  ;;  %v1834_v9 = vunpack.i.l.bf16 %v1833_v24 }
  0xd9   :  { %v1245_v26 = vsel %vm1239_vm8, %v1839_v23, %v1840_v22 }
  0xda   :  { %v1088_v27 = vsel %vm1084_vm7, %v1830_v4, %v1834_v9  ;;  %v1089_v7 = vsel %vm1084_vm7, %v1834_v9, %v1835_v25  ;;  %1277 = vmatpush.msra.mxu0 %v1245_v26 }
  0xdb   :  { %1183 = vmatpush.msrb.mxu2 %v1088_v27  ;;  %1203 = vmatpush.msrb.mxu3 %v1089_v7 }
  0xdc   :  { %1634 = vmatmul.msk.f32.vlgmr.msrb.gmra.mxu2 %vm76_vm1, %v1630_v5  ;;  %1635 = vmatmul.msk.f32.vlgmr.msrb.gmra.mxu3 %vm76_vm1, %v1630_v5 }
  0xdd   :  { %1278 = vmatpush.msra.mxu0 %v1240_v28 }
  0xde   :  { %1637 = vmatmul.msk.f32.vlgmr.msra.gmra.mxu0 %vm76_vm1, %v1636_v29  ;;  %v1853_v31 = vpop.permute.xlu1 %1852 }
  0xdf   :  { %v1854_v33 = vunpack.i.l.bf16 %v1853_v31  ;;  %v1848_v34 = vpop.permute.xlu0 %1847  ;;  %v1855_v36 = vunpack.i.h.bf16 %v1853_v31 }
  0xe0   :  { %v1850_v37 = vunpack.i.h.bf16 %v1848_v34  ;;  %v1849_v38 = vunpack.i.l.bf16 %v1848_v34 }
  0xe1   :  { %v1242_v42 = vsel %vm1239_vm8, %v1855_v36, %v1859_v32  ;;  %v1241_v44 = vsel %vm1239_vm8, %v1845_v20, %v1855_v36 }
  0xe2   :  { %v1246_v39 = vsel %vm1239_vm8, %v1840_v22, %v1849_v38  ;;  %v1247_v40 = vsel %vm1239_vm8, %v1849_v38, %v1850_v37  ;;  %v1248_v41 = vsel %vm1239_vm8, %v1850_v37, %v1854_v33 }
  0xe3   :  { %1297 = vmatpush.msra.mxu1 %v1246_v39  ;;  %1317 = vmatpush.msra.mxu2 %v1247_v40 }
  0xe4   :  { %1337 = vmatpush.msra.mxu3 %v1248_v41 }
  0xe5   :  { %1298 = vmatpush.msra.mxu1 %v1241_v44  ;;  %1318 = vmatpush.msra.mxu2 %v1242_v42 }
  0xe6   :  { %1338 = vmatpush.msra.mxu3 %v1243_v43  ;;  %1638 = vmatmul.msk.f32.vlgmr.msra.gmra.mxu1 %vm76_vm1, %v1636_v29 }
  0xe7   :  { %1639 = vmatmul.msk.f32.vlgmr.msra.gmra.mxu2 %vm76_vm1, %v1636_v29  ;;  %1640 = vmatmul.msk.f32.vlgmr.msra.gmra.mxu3 %vm76_vm1, %v1636_v29  ;;  %v1863_v45 = vpop.permute.xlu0 %1862 }
  0xe8   :  { %v1865_v46 = vunpack.i.h.bf16 %v1863_v45  ;;  %v1864_v47 = vunpack.i.l.bf16 %v1863_v45 }
  0xea   :  { %v1249_v48 = vsel %vm1239_vm8, %v1854_v33, %v1864_v47  ;;  %v1244_v49 = vsel %vm1239_vm8, %v1860_v35, %v1865_v46 }
  0xeb   :  { %1357 = vmatpush.msrb.mxu0 %v1249_v48 }
  0xed   :  { %1358 = vmatpush.msrb.mxu0 %v1244_v49 }
  0xee   :  { %1641 = vmatmul.msk.f32.vlgmr.msrb.gmra.mxu0 %vm76_vm1, %v1636_v29 }
 0x101   :  { %v97_v50 = vpop.f32.mrf.mxu0  ;;  %v117_v51 = vpop.f32.mrf.mxu1 }
 0x108   :  { %v137_v55 = vpop.f32.mrf.mxu2 }
 0x10a   :  { %v177_v52 = vpop.f32.mrf.mxu0  ;;  %v157_v53 = vpop.f32.mrf.mxu3 }
 0x10b   :  { %v200_v54 = vpop.f32.mrf.mxu1 }
 0x10c   :  { %v201_v21 = vadd.f32 %v200_v54, %v97_v50 }
 0x111   :  { %v220_v61 = vpop.f32.mrf.mxu2 }
 0x112   :  { %v260_v56 = vpop.f32.mrf.mxu0  ;;  %v221_v27 = vadd.f32 %v220_v61, %v117_v51 }
 0x113   :  { %v261_v57 = vadd.f32 %v260_v56, %v157_v53  ;;  %v280_v58 = vpop.f32.mrf.mxu1  ;;  %v240_v60 = vpop.f32.mrf.mxu3 }
 0x114   :  { %v2219_v59 = vadd.f32 %v280_v58, %v177_v52  ;;  %v241_v36 = vadd.f32 %v240_v60, %v137_v55 }
 0x119   :  { %v344_v3 = vpop.f32.mrf.mxu2 }
 0x11a   :  { %v384_v62 = vpop.f32.mrf.mxu0  ;;  %v427_v23 = vadd.f32 %v344_v3, %v201_v21 }
 0x11b   :  { %v364_v63 = vpop.f32.mrf.mxu3  ;;  %v404_v5 = vpop.f32.mrf.mxu1  ;;  %v429_v43 = vadd.f32 %v384_v62, %v241_v36 }
 0x11c   :  { %v428_v30 = vadd.f32 %v364_v63, %v221_v27  ;;  %v430_v44 = vadd.f32 %v404_v5, %v261_v57 }
 0x121   :  { %v424_v14 = vpop.f32.mrf.mxu2 }
 0x122   :  { %v513_v10 = vpop.f32.mrf.mxu0  ;;  %v431_v60 = vadd.f32 %v424_v14, %v2219_v59 }
 0x123   :  { %v493_v13 = vpop.f32.mrf.mxu3  ;;  %v533_v15 = vpop.f32.mrf.mxu1  ;;  %v577_v32 = vadd.f32 %v513_v10, %v428_v30 }
 0x124   :  { %v576_v25 = vadd.f32 %v493_v13, %v427_v23  ;;  %v2221_v35 = vpop.permute.xlu1 %1371  ;;  %v578_v47 = vadd.f32 %v533_v15, %v429_v43 }
 0x129   :  { %v553_v17 = vpop.f32.mrf.mxu2 }
 0x12a   :  { %v642_v16 = vpop.f32.mrf.mxu0  ;;  %v579_v48 = vadd.f32 %v553_v17, %v430_v44 }
 0x12b   :  { %v573_v4 = vpop.f32.mrf.mxu3  ;;  %v662_v18 = vpop.f32.mrf.mxu1  ;;  %v725_v7 = vadd.f32 %v642_v16, %v576_v25 }
 0x12c   :  { %v726_v39 = vadd.f32 %v662_v18, %v577_v32  ;;  %v580_v3 = vadd.f32 %v573_v4, %v431_v60 }
 0x131   :  { %v682_v2 = vpop.f32.mrf.mxu2 }
 0x132   :  { %v722_v0 = vpop.f32.mrf.mxu0  ;;  %v727_v53 = vadd.f32 %v682_v2, %v578_v47 }
 0x133   :  { %v702_v1 = vpop.f32.mrf.mxu3  ;;  %v729_v13 = vadd.f32 %v722_v0, %v580_v3 }
 0x134   :  { %v728_v55 = vadd.f32 %v702_v1, %v579_v48 }
 0x139   :  { %v791_v8 = vpop.f32.mrf.mxu1  ;;  %v811_v12 = vpop.f32.mrf.mxu2 }
 0x13a   :  { %v851_v11 = vpop.f32.mrf.mxu0  ;;  %v874_v28 = vadd.f32 %v791_v8, %v725_v7  ;;  %v875_v41 = vadd.f32 %v811_v12, %v726_v39 }
 0x13b   :  { %v831_v6 = vpop.f32.mrf.mxu3  ;;  %v877_v57 = vadd.f32 %v851_v11, %v728_v55 }
 0x13c   :  { %v876_v61 = vadd.f32 %v831_v6, %v727_v53 }
 0x141   :  { %v871_v19 = vpop.f32.mrf.mxu1 }
 0x142   :  { %v878_v2 = vadd.f32 %v871_v19, %v729_v13 }
 0x143   :  { %v1010_v20 = vpop.f32.mrf.mxu0 }
 0x144   :  { %v1055_v5 = vadd.f32 %v1010_v20, %v876_v61 }
 0x147   :  { %v970_v24 = vpop.f32.mrf.mxu2 }
 0x148   :  { %v990_v22 = vpop.f32.mrf.mxu3  ;;  %v1053_v31 = vadd.f32 %v970_v24, %v874_v28 }
 0x149   :  { %v1030_v9 = vpop.f32.mrf.mxu1  ;;  %v1054_v45 = vadd.f32 %v990_v22, %v875_v41 }
 0x14a   :  { %v1056_v10 = vadd.f32 %v1030_v9, %v877_v57 }
 0x14f   :  { %v1050_v33 = vpop.f32.mrf.mxu2 }
 0x150   :  { %v1057_v11 = vadd.f32 %v1050_v33, %v878_v2 }
 0x151   :  { %v1125_v29 = vpop.f32.mrf.mxu3 }
 0x152   :  { %v1208_v34 = vadd.f32 %v1125_v29, %v1053_v31 }
 0x153   :  { %v1145_v26 = vpop.f32.mrf.mxu0  ;;  %v1165_v37 = vpop.f32.mrf.mxu1 }
 0x154   :  { %v1209_v49 = vadd.f32 %v1145_v26, %v1054_v45  ;;  %v1210_v15 = vadd.f32 %v1165_v37, %v1055_v5 }
 0x15b   :  { %v1280_v38 = vpop.f32.mrf.mxu0 }
 0x15c   :  { %v1363_v40 = vadd.f32 %v1280_v38, %v1208_v34 }
 0x15e   :  { %v2224_v42 = vadd.f32 %v2221_v35, %v1363_v40 }
 0x15f   :  { %v1185_v51 = vpop.f32.mrf.mxu2  ;;  %v1205_v52 = vpop.f32.mrf.mxu3 }
 0x160   :  { %v2227_v46 = vmul.f32 0.70710677, %v2224_v42  ;;  %v1211_v17 = vadd.f32 %v1185_v51, %v1056_v10  ;;  %v1212_v22 = vadd.f32 %v1205_v52, %v1057_v11 }
 0x162   :  { %v1389_v50 = vand.u32 2147483647, %v2227_v46 }
 0x163   :  { %v1300_v54 = vpop.f32.mrf.mxu1 }
 0x164   :  { %v1394_v56 = vmul.f32 0.3275911, %v1389_v50  ;;  %v1364_v58 = vadd.f32 %v1300_v54, %v1209_v49  ;;  %v1524_v27 = vsub.f32 0.0, %v1389_v50 }
 0x166   :  { %v1399_v62 = vadd.f32 1.0, %v1394_v56  ;;  %v2232_v63 = vadd.f32 %v2221_v35, %v1364_v58  ;;  %v1529_v37 = vmul.f32 %v1524_v27, %v1389_v50 }
 0x168   :  { %1868 = vrcp.f32 %v1399_v62  ;;  %v2235_v16 = vmul.f32 0.70710677, %v2232_v63  ;;  %v1415_v26 = vand.u32 2147483648, %v1399_v62  ;;  %v1413_v29 = vand.u32 2147483647, %v1399_v62 }
 0x169   :  { %vm1409_vm10 = vweird.f32 %v1399_v62  ;;  %v1534_v48 = vmul.f32 1.442695, %v1529_v37 }
 0x16a   :  { %v1320_v18 = vpop.f32.mrf.mxu2  ;;  %v1340_v1 = vpop.f32.mrf.mxu3  ;;  %v1390_v59 = vand.u32 2147483647, %v2235_v16  ;;  %v1416_v36 = vor.u32 1.1754944e-38, %v1415_v26  ;;  %vm1414_vm12 = vcmp.eq.f32.partialorder %v1413_v29, 8.507059e+37 }
 0x16b   :  { %v1365_v14 = vadd.f32 %v1320_v18, %v1210_v15  ;;  %v1366_v8 = vadd.f32 %v1340_v1, %v1211_v17  ;;  %v1360_v20 = vpop.f32.mrf.mxu0 }
 0x16c   :  { %v1395_v6 = vmul.f32 0.3275911, %v1390_v59  ;;  %v1367_v9 = vadd.f32 %v1360_v20, %v1212_v22  ;;  %v1525_v38 = vsub.f32 0.0, %v1390_v59 }
 0x16d   :  { %v2239_v4 = vadd.f32 %v2221_v35, %v1365_v14  ;;  %v2242_v0 = vadd.f32 %v2221_v35, %v1366_v8 }
 0x16e   :  { %v1869_v12 = vpop.eup %1868  ;;  %v1400_v23 = vadd.f32 1.0, %v1395_v6  ;;  %v2259_v34 = vadd.f32 %v2221_v35, %v1367_v9  ;;  %v1530_v50 = vmul.f32 %v1525_v38, %v1390_v59 }
 0x16f   :  { %v1405_v21 = vmul.f32 %v1869_v12, %v1399_v62  ;;  %v2245_v24 = vmul.f32 0.70710677, %v2239_v4  ;;  %v2248_v19 = vmul.f32 0.70710677, %v2242_v0  ;;  %vm1410_vm9 = vweird.f32 %v1869_v12 }
 0x170   :  { %1870 = vrcp.f32 %v1400_v23  ;;  %vm1411_vm11 = vmor %vm1409_vm10, %vm1410_vm9  ;;  %v2270_v35 = vmul.f32 0.70710677, %v2259_v34  ;;  %v1430_v52 = vand.u32 2147483648, %v1400_v23  ;;  %v1428_v54 = vand.u32 2147483647, %v1400_v23 }
 0x171   :  { %v1406_v25 = vsub.f32 1.0, %v1405_v21  ;;  %v2251_v7 = vand.u32 2147483647, %v2245_v24  ;;  %v2254_v30 = vand.u32 2147483647, %v2248_v19  ;;  %vm1424_vm14 = vweird.f32 %v1400_v23 }
 0x172   :  { %v2275_v56 = vand.u32 2147483647, %v2270_v35  ;;  %v1536_v61 = vmul.f32 1.442695, %v1530_v50  ;;  %v1431_v62 = vor.u32 1.1754944e-38, %v1430_v52  ;;  %vm1429_vm0 = vcmp.eq.f32.partialorder %v1428_v54, 8.507059e+37 }
 0x173   :  { %v1407_v28 = vmul.f32 %v1869_v12, %v1406_v25  ;;  %v1396_v31 = vmul.f32 0.3275911, %v2251_v7  ;;  %v1397_v33 = vmul.f32 0.3275911, %v2254_v30  ;;  %v1526_v15 = vsub.f32 0.0, %v2251_v7 }
 0x174   :  { %v1398_v5 = vmul.f32 0.3275911, %v2275_v56  ;;  %vm1554_vm10 = vcmp.lt.f32.partialorder %v2227_v46, 0.0 }
 0x175   :  { %v1408_v32 = vadd.f32 %v1869_v12, %v1407_v28  ;;  %v2261_v39 = vadd.f32 1.0, %v1396_v31  ;;  %v2263_v43 = vadd.f32 1.0, %v1397_v33  ;;  %v1527_v31 = vsub.f32 0.0, %v2254_v30 }
 0x176   :  { %v1871_v40 = vpop.eup %1870  ;;  %v2288_v11 = vadd.f32 1.0, %v1398_v5 }
 0x177   :  { %v1412_v41 = vsel %vm1411_vm11, %v1869_v12, %v1408_v32  ;;  %v1420_v45 = vmul.f32 %v1871_v40, %v1400_v23  ;;  %1872 = vrcp.f32 %v2261_v39  ;;  %vm1425_vm13 = vweird.f32 %v1871_v40 }
 0x178   :  { %v2265_v44 = vsel %vm1414_vm12, %v1416_v36, %v1412_v41  ;;  %1874 = vrcp.f32 %v2263_v43  ;;  %vm1426_vm15 = vmor %vm1424_vm14, %vm1425_vm13  ;;  %vm1439_vm1 = vweird.f32 %v2261_v39  ;;  %v1443_v14 = vand.u32 2147483647, %v2261_v39 }
 0x179   :  { %v1479_v47 = vmul.f32 1.0614054, %v2265_v44  ;;  %v1421_v49 = vsub.f32 1.0, %v1420_v45  ;;  %1876 = vpow2.f32 %v1534_v48  ;;  %v1445_v8 = vand.u32 2147483648, %v2261_v39 }
 0x17a   :  { %v1458_v23 = vand.u32 2147483647, %v2263_v43  ;;  %v1460_v25 = vand.u32 2147483648, %v2263_v43  ;;  %1878 = vrcp.f32 %v2288_v11  ;;  %vm1454_vm5 = vweird.f32 %v2263_v43 }
 0x17b   :  { %v1484_v51 = vadd.f32 -1.4531521, %v1479_v47  ;;  %v1422_v53 = vmul.f32 %v1871_v40, %v1421_v49  ;;  %v1446_v29 = vor.u32 1.1754944e-38, %v1445_v8  ;;  %vm1444_vm6 = vcmp.eq.f32.partialorder %v1443_v14, 8.507059e+37 }
 0x17c   :  { %v1461_v41 = vor.u32 1.1754944e-38, %v1460_v25  ;;  %vm1459_vm8 = vcmp.eq.f32.partialorder %v1458_v23, 8.507059e+37  ;;  %v1379_v48 = vmul.f32 0.5, %v2224_v42  ;;  %1880 = vpow2.f32 %v1536_v61 }
 0x17d   :  { %v1489_v55 = vmul.f32 %v1484_v51, %v2265_v44  ;;  %v1873_v58 = vpop.eup %1872  ;;  %v1423_v60 = vadd.f32 %v1871_v40, %v1422_v53  ;;  %v1475_v5 = vand.u32 2147483648, %v2288_v11  ;;  %vm1469_vm11 = vweird.f32 %v2288_v11 }
 0x17e   :  { %v1435_v3 = vmul.f32 %v1873_v58, %v2261_v39  ;;  %v1875_v10 = vpop.eup %1874  ;;  %vm1440_vm2 = vweird.f32 %v1873_v58  ;;  %vm1555_vm14 = vcmp.lt.f32.partialorder %v2235_v16, 0.0 }
 0x17f   :  { %v1494_v57 = vadd.f32 1.4214138, %v1489_v55  ;;  %v1427_v13 = vsel %vm1426_vm15, %v1871_v40, %v1423_v60  ;;  %v1450_v2 = vmul.f32 %v1875_v10, %v2263_v43  ;;  %v1877_v21 = vpop.eup %1876  ;;  %vm1455_vm3 = vweird.f32 %v1875_v10  ;;  %vm1441_vm4 = vmor %vm1439_vm1, %vm1440_vm2 }
 0x180   :  { %v2282_v18 = vsel %vm1429_vm0, %v1431_v62, %v1427_v13  ;;  %v1436_v1 = vsub.f32 1.0, %v1435_v3  ;;  %v1531_v40 = vmul.f32 %v1526_v15, %v2251_v7  ;;  %vm1456_vm7 = vmor %vm1454_vm5, %vm1455_vm3  ;;  %v1879_v43 = vpop.eup %1878  ;;  %v1532_v55 = vmul.f32 %v1527_v31, %v2254_v30 }
 0x181   :  { %v1499_v17 = vmul.f32 %v1494_v57, %v2265_v44  ;;  %v1480_v59 = vmul.f32 1.0614054, %v2282_v18  ;;  %v1451_v20 = vsub.f32 1.0, %v1450_v2  ;;  %v1465_v7 = vmul.f32 %v1879_v43, %v2288_v11 }
 0x182   :  { %v1437_v12 = vmul.f32 %v1873_v58, %v1436_v1  ;;  %vm1470_vm9 = vweird.f32 %v1879_v43  ;;  %v1473_v3 = vand.u32 2147483647, %v2288_v11  ;;  %v1881_v14 = vpop.eup %1880  ;;  %vm1556_vm15 = vcmp.lt.f32.partialorder %v2245_v24, 0.0 }
 0x183   :  { %v1504_v6 = vadd.f32 -0.28449672, %v1499_v17  ;;  %v1485_v22 = vadd.f32 -1.4531521, %v1480_v59  ;;  %v1452_v27 = vmul.f32 %v1875_v10, %v1451_v20  ;;  %v1466_v42 = vsub.f32 1.0, %v1465_v7  ;;  %vm1471_vm12 = vmor %vm1469_vm11, %vm1470_vm9 }
 0x184   :  { %v1438_v26 = vadd.f32 %v1873_v58, %v1437_v12  ;;  %v1540_v12 = vmul.f32 1.442695, %v1532_v55  ;;  %v1476_v20 = vor.u32 1.1754944e-38, %v1475_v5  ;;  %vm1474_vm13 = vcmp.eq.f32.partialorder %v1473_v3, 8.507059e+37 }
 0x185   :  { %v1509_v9 = vmul.f32 %v1504_v6, %v2265_v44  ;;  %v1490_v28 = vmul.f32 %v1485_v22, %v2282_v18  ;;  %v1453_v36 = vadd.f32 %v1875_v10, %v1452_v27  ;;  %v1467_v61 = vmul.f32 %v1879_v43, %v1466_v42 }
 0x186   :  { %v1442_v33 = vsel %vm1441_vm4, %v1873_v58, %v1438_v26  ;;  %vm1557_vm0 = vcmp.lt.f32.partialorder %v2248_v19, 0.0  ;;  %v1382_v5 = vmul.f32 0.5, %v2242_v0  ;;  %vm1558_vm1 = vcmp.lt.f32.partialorder %v2270_v35, 0.0 }
 0x187   :  { %v1514_v32 = vadd.f32 0.2548296, %v1509_v9  ;;  %v1495_v37 = vadd.f32 1.4214138, %v1490_v28  ;;  %v2299_v38 = vsel %vm1444_vm6, %v1446_v29, %v1442_v33  ;;  %v1457_v47 = vsel %vm1456_vm7, %v1875_v10, %v1453_v36 }
 0x188   :  { %v1481_v39 = vmul.f32 1.0614054, %v2299_v38  ;;  %v2306_v50 = vsel %vm1459_vm8, %v1461_v41, %v1457_v47  ;;  %v1468_v59 = vadd.f32 %v1879_v43, %v1467_v61  ;;  %v1528_v9 = vsub.f32 0.0, %v2275_v56 }
 0x189   :  { %v1519_v45 = vmul.f32 %v1514_v32, %v2265_v44  ;;  %v1500_v49 = vmul.f32 %v1495_v37, %v2282_v18  ;;  %v1482_v53 = vmul.f32 1.0614054, %v2306_v50  ;;  %v1538_v44 = vmul.f32 1.442695, %v1531_v40 }
 0x18a   :  { %v1486_v52 = vadd.f32 -1.4531521, %v1481_v39  ;;  %v1472_v22 = vsel %vm1471_vm12, %v1879_v43, %v1468_v59  ;;  %v1533_v37 = vmul.f32 %v1528_v9, %v2275_v56  ;;  %v1380_v39 = vmul.f32 0.5, %v2232_v63 }
 0x18b   :  { %v1544_v51 = vmul.f32 %v1877_v21, %v1519_v45  ;;  %v1505_v54 = vadd.f32 -0.28449672, %v1500_v49  ;;  %v1487_v57 = vadd.f32 -1.4531521, %v1482_v53  ;;  %1882 = vpow2.f32 %v1538_v44 }
 0x18c   :  { %v1491_v60 = vmul.f32 %v1486_v52, %v2299_v38  ;;  %v1477_v25 = vsel %vm1474_vm13, %v1476_v20, %v1472_v22  ;;  %1884 = vpow2.f32 %v1540_v12  ;;  %v1542_v53 = vmul.f32 1.442695, %v1533_v37 }
 0x18d   :  { %v1549_v58 = vsub.f32 1.0, %v1544_v51  ;;  %v1510_v62 = vmul.f32 %v1505_v54, %v2282_v18  ;;  %v1492_v15 = vmul.f32 %v1487_v57, %v2306_v50  ;;  %v1483_v28 = vmul.f32 1.0614054, %v1477_v25 }
 0x18e   :  { %v1496_v13 = vadd.f32 1.4214138, %v1491_v60  ;;  %1886 = vpow2.f32 %v1542_v53  ;;  %v1381_v60 = vmul.f32 0.5, %v2239_v4  ;;  %v1383_v0 = vmul.f32 0.5, %v2259_v34 }
 0x18f   :  { %v1559_v10 = vsub.f32 0.0, %v1549_v58  ;;  %v1515_v30 = vadd.f32 0.2548296, %v1510_v62  ;;  %v1497_v2 = vadd.f32 1.4214138, %v1492_v15  ;;  %vm1583_vm2 = vcmask 801792  }
 0x190   :  { %v1501_v1 = vmul.f32 %v1496_v13, %v2299_v38  ;;  %v1488_v33 = vadd.f32 -1.4531521, %v1483_v28 }
 0x191   :  { %v1564_v17 = vsel %vm1554_vm10, %v1559_v10, %v1549_v58  ;;  %v1520_v6 = vmul.f32 %v1515_v30, %v2282_v18  ;;  %v1502_v46 = vmul.f32 %v1497_v2, %v2306_v50  ;;  %v1883_v29 = vpop.eup %1882 }
 0x192   :  { %v1569_v8 = vadd.f32 1.0, %v1564_v17  ;;  %v1506_v21 = vadd.f32 -0.28449672, %v1501_v1  ;;  %v1493_v45 = vmul.f32 %v1488_v33, %v1477_v25  ;;  %v1885_v52 = vpop.eup %1884 }
 0x193   :  { %v1545_v11 = vmul.f32 %v1881_v14, %v1520_v6  ;;  %v1507_v27 = vadd.f32 -0.28449672, %v1502_v46 }
 0x194   :  { %v1574_v23 = vmul.f32 %v1569_v8, %v1379_v48  ;;  %v1511_v26 = vmul.f32 %v1506_v21, %v2299_v38  ;;  %v1498_v51 = vadd.f32 1.4214138, %v1493_v45  ;;  %v1887_v15 = vpop.eup %1886 }
 0x195   :  { %v1550_v18 = vsub.f32 1.0, %v1545_v11  ;;  %v1512_v32 = vmul.f32 %v1507_v27, %v2306_v50 }
 0x196   :  { %1579 = vst [vmem:[%s2354_s3] sm:$0xff] %v1574_v23  ;;  %v1516_v31 = vadd.f32 0.2548296, %v1511_v26  ;;  %v1503_v56 = vmul.f32 %v1498_v51, %v1477_v25 }
 0x197   :  { %v1560_v36 = vsub.f32 0.0, %v1550_v18  ;;  %v1517_v41 = vadd.f32 0.2548296, %v1512_v32 }
 0x198   :  { %v1521_v40 = vmul.f32 %v1516_v31, %v2299_v38  ;;  %v1508_v55 = vadd.f32 -0.28449672, %v1503_v56 }
 0x199   :  { %v1565_v47 = vsel %vm1555_vm14, %v1560_v36, %v1550_v18  ;;  %v1522_v49 = vmul.f32 %v1517_v41, %v2306_v50 }
 0x19a   :  { %v1570_v43 = vadd.f32 1.0, %v1565_v47  ;;  %v1546_v48 = vmul.f32 %v1883_v29, %v1521_v40  ;;  %v1513_v50 = vmul.f32 %v1508_v55, %v1477_v25 }
 0x19b   :  { %v1547_v44 = vmul.f32 %v1885_v52, %v1522_v49 }
 0x19c   :  { %v1575_v7 = vmul.f32 %v1570_v43, %v1380_v39  ;;  %v1551_v54 = vsub.f32 1.0, %v1546_v48  ;;  %v1518_v62 = vadd.f32 0.2548296, %v1513_v50 }
 0x19d   :  { %v1552_v38 = vsub.f32 1.0, %v1547_v44 }
 0x19e   :  { %1580 = vst [vmem:[%s2354_s3 + $0x8] sm:$0xff] %v1575_v7  ;;  %v1561_v16 = vsub.f32 0.0, %v1551_v54  ;;  %v1523_v13 = vmul.f32 %v1518_v62, %v1477_v25 }
 0x19f   :  { %v1562_v58 = vsub.f32 0.0, %v1552_v38 }
 0x1a0   :  { %v1566_v63 = vsel %vm1556_vm15, %v1561_v16, %v1551_v54  ;;  %v1548_v61 = vmul.f32 %v1887_v15, %v1523_v13 }
 0x1a1   :  { %v1571_v57 = vadd.f32 1.0, %v1566_v63  ;;  %v1567_v42 = vsel %vm1557_vm0, %v1562_v58, %v1552_v38 }
 0x1a2   :  { %v1572_v10 = vadd.f32 1.0, %v1567_v42  ;;  %v1553_v4 = vsub.f32 1.0, %v1548_v61 }
 0x1a3   :  { %v1576_v3 = vmul.f32 %v1571_v57, %v1381_v60 }
 0x1a4   :  { %v1577_v24 = vmul.f32 %v1572_v10, %v1382_v5  ;;  %v1563_v19 = vsub.f32 0.0, %v1553_v4 }
 0x1a5   :  { %1581 = vst [vmem:[%s2354_s3 + $0x10] sm:$0xff] %v1576_v3 }
 0x1a6   :  { %1582 = vst [vmem:[%s2354_s3 + $0x18] sm:$0xff] %v1577_v24  ;;  %v1568_v30 = vsel %vm1558_vm1, %v1563_v19, %v1553_v4 }
 0x1a7   :  { %v1573_v17 = vadd.f32 1.0, %v1568_v30 }
 0x1a9   :  { %v1578_v1 = vmul.f32 %v1573_v17, %v1383_v0 }
 0x1ab   :  { %1584 = vst.msk [vmem:[%s2354_s3 + $0x20] sm:$0xff] %vm1583_vm2, %v1578_v1 }

// kernel: decoder_forward.10
= control target key start
LH: loop header
LB: loop body
LE: loop exit
PB: predicated region body
PF: predicated region fallthrough
CT: control target
= control target key end

     0   :  { %s1272_s16 = smov 127   ;;  %s1273_s17 = smov 126   ;;  %vm33_vm0 = vcmask 1039360   ;;  %vm41_vm1 = vcmask 64512   ;;  %vm218_vm2 = vcmask 1031168   ;;  %vm323_vm3 = vcmask 916480   ;;  %s1505_s0 = inlined_call_operand.vmem [shape: f32[8,512], index: 0, kind: input, shape index: {}]   ;;  %s1506_s1 = inlined_call_operand.vmem [shape: f32[9,8,8], index: 1, kind: input, shape index: {}]   ;;  %s1507_s2 = inlined_call_operand.vmem [shape: f32[8,1], index: 2, kind: input, shape index: {}]   ;;  %s1508_s3 = inlined_call_operand.vmem [shape: f32[8,478], index: 3, kind: output, shape index: {}]  }
   0x1   :  { %v17_v0 = vld [vmem:[%s1505_s0 + $0x10] sm:$0xff]  ;;  %v18_v1 = vld [vmem:[%s1505_s0 + $0x18] sm:$0xff]  ;;  %v1310_v3 = vld [vmem:[%s1505_s0] sm:$0xff]  ;;  %s1274_s22 = smov 112   ;;  %s1275_s23 = smov 111   ;;  %vm428_vm4 = vcmask 908288  }
   0x2   :  { %v1174_v2 = vpack.i.bf16 %v18_v1, %v17_v0  ;;  %v1315_v4 = vld [vmem:[%s1505_s0 + $0x8] sm:$0xff]  ;;  %s1276_s24 = smov 110   ;;  %s1277_s25 = smov 96   ;;  %v14_v24 = vld [vmem:[%s1506_s1] sm:$0xff]  ;;  %v1130_v36 = vld [vmem:[%s1506_s1 + $0x10] sm:$0xff]  ;;  %vm533_vm5 = vcmask 900096  }
   0x3   :  { %v1179_v5 = vpack.i.bf16 %v1315_v4, %v1310_v3  ;;  %s1278_s26 = smov 95   ;;  %s1279_s0 = smov 94   ;;  %v1121_v12 = vld [vmem:[%s1506_s1 + $0x8] sm:$0xff]  ;;  %v1135_v46 = vld [vmem:[%s1506_s1 + $0x18] sm:$0xff]  ;;  %v1140_v56 = vld [vmem:[%s1506_s1 + $0x20] sm:$0xff]  ;;  %vm638_vm6 = vcmask 785408  }
   0x4   :  { %1175 = vrot.lane.b32.xlu0 %v1174_v2, %s1272_s16  ;;  %1185 = vrot.lane.b32.xlu1 %v1174_v2, %s1273_s17  ;;  %vm743_vm7 = vcmask 777216   ;;  %vm848_vm8 = vcmask 769024  }
   0x5   :  { %1195 = vrot.lane.b32.xlu2 %v1174_v2, %s1274_s22 }
   0xc   :  { %1180 = vrot.lane.b32.xlu0 %v1179_v5, %s1272_s16  ;;  %1190 = vrot.lane.b32.xlu1 %v1179_v5, %s1273_s17 }
   0xd   :  { %1200 = vrot.lane.b32.xlu2 %v1179_v5, %s1274_s22 }
  0x14   :  { %1210 = vrot.lane.b32.xlu1 %v1179_v5, %s1275_s23  ;;  %1205 = vrot.lane.b32.xlu0 %v1174_v2, %s1275_s23 }
  0x15   :  { %1215 = vrot.lane.b32.xlu2 %v1174_v2, %s1276_s24 }
  0x1c   :  { %1220 = vrot.lane.b32.xlu0 %v1179_v5, %s1276_s24  ;;  %1225 = vrot.lane.b32.xlu1 %v1174_v2, %s1277_s25 }
  0x1d   :  { %1230 = vrot.lane.b32.xlu2 %v1179_v5, %s1277_s25 }
  0x24   :  { %1240 = vrot.lane.b32.xlu1 %v1179_v5, %s1278_s26  ;;  %1235 = vrot.lane.b32.xlu0 %v1174_v2, %s1278_s26 }
  0x25   :  { %1245 = vrot.lane.b32.xlu2 %v1174_v2, %s1279_s0  ;;  %v1145_v2 = vld [vmem:[%s1506_s1 + $0x28] sm:$0xff] }
  0x2c   :  { %1250 = vrot.lane.b32.xlu0 %v1179_v5, %s1279_s0 }
  0x5f   :  { %v1196_v14 = vpop.permute.xlu2 %1195 }
  0x60   :  { %v1198_v21 = vunpack.i.h.bf16 %v1196_v14  ;;  %v1197_v22 = vunpack.i.l.bf16 %v1196_v14  ;;  %v1150_v14 = vld [vmem:[%s1506_s1 + $0x30] sm:$0xff] }
  0x62   :  { %v326_v30 = vsel %vm323_vm3, %v1197_v22, %v1198_v21 }
  0x67   :  { %v1201_v28 = vpop.permute.xlu2 %1200 }
  0x68   :  { %v1202_v31 = vunpack.i.l.bf16 %v1201_v28  ;;  %v1203_v32 = vunpack.i.h.bf16 %v1201_v28 }
  0x6a   :  { %v324_v37 = vsel %vm323_vm3, %v1202_v31, %v1203_v32  ;;  %v325_v38 = vsel %vm323_vm3, %v1203_v32, %v1197_v22 }
  0x6f   :  { %v1216_v41 = vpop.permute.xlu2 %1215 }
  0x70   :  { %v1218_v44 = vunpack.i.h.bf16 %v1216_v41  ;;  %v1217_v45 = vunpack.i.l.bf16 %v1216_v41 }
  0x72   :  { %v536_v50 = vsel %vm533_vm5, %v1217_v45, %v1218_v44 }
  0x76   :  { %v1176_v6 = vpop.permute.xlu0 %1175  ;;  %v1186_v7 = vpop.permute.xlu1 %1185 }
  0x77   :  { %v1177_v8 = vunpack.i.l.bf16 %v1176_v6  ;;  %v1188_v9 = vunpack.i.h.bf16 %v1186_v7  ;;  %v1187_v10 = vunpack.i.l.bf16 %v1186_v7  ;;  %v1178_v11 = vunpack.i.h.bf16 %v1176_v6  ;;  %v1231_v59 = vpop.permute.xlu2 %1230 }
  0x78   :  { %v1232_v62 = vunpack.i.l.bf16 %v1231_v59  ;;  %v1233_v63 = vunpack.i.h.bf16 %v1231_v59 }
  0x79   :  { %120 = vmatpush.msra.mxu3 %v1178_v11  ;;  %v36_v13 = vsel %vm33_vm0, %v1177_v8, %v1178_v11  ;;  %v221_v15 = vsel %vm218_vm2, %v1187_v10, %v1188_v9 }
  0x7a   :  { %100 = vmatpush.msra.mxu2 %v36_v13  ;;  %1125 = vmatmul.msk.f32.vlgmr.msra.gmra.mxu3 %vm41_vm1, %v1121_v12  ;;  %v1280_v13 = vmov 0  }
  0x7b   :  { %1124 = vmatmul.msk.f32.vlgmr.msra.gmra.mxu2 %vm41_vm1, %v1121_v12  ;;  %203 = vmatpush.msrb.mxu3 %v18_v1 }
  0x7c   :  { %183 = vmatpush.msrb.mxu2 %v17_v0  ;;  %1254 = vset.pattern.permute.xlu1 %v1280_v13 }
  0x7d   :  { %304 = vmatpush.msra.mxu3 %v1188_v9  ;;  %v943_v9 = vld [vmem:[%s1507_s2] sm:$0xff]  ;;  %1255 = vset.pattern.permute.xlu0 %v1280_v13 }
  0x7e   :  { %284 = vmatpush.msra.mxu2 %v221_v15  ;;  %v1181_v16 = vpop.permute.xlu0 %1180  ;;  %v1191_v17 = vpop.permute.xlu1 %1190  ;;  %946 = vperm.xlu1 %1254, %v943_v9  }
  0x7f   :  { %v1183_v18 = vunpack.i.h.bf16 %v1181_v16  ;;  %v1182_v19 = vunpack.i.l.bf16 %v1181_v16  ;;  %v1193_v20 = vunpack.i.h.bf16 %v1191_v17  ;;  %v1192_v23 = vunpack.i.l.bf16 %v1191_v17  ;;  %v1246_v7 = vpop.permute.xlu2 %1245 }
  0x80   :  { %v1248_v11 = vunpack.i.h.bf16 %v1246_v7 }
  0x81   :  { %v34_v25 = vsel %vm33_vm0, %v1182_v19, %v1183_v18  ;;  %v35_v26 = vsel %vm33_vm0, %v1183_v18, %v1177_v8  ;;  %v220_v27 = vsel %vm218_vm2, %v1193_v20, %v1187_v10  ;;  %v219_v29 = vsel %vm218_vm2, %v1192_v23, %v1193_v20 }
  0x82   :  { %60 = vmatpush.msra.mxu0 %v34_v25  ;;  %80 = vmatpush.msra.mxu1 %v35_v26 }
  0x83   :  { %1129 = vmatmul.msk.f32.vlgmr.msrb.gmra.mxu3 %vm41_vm1, %v14_v24  ;;  %1122 = vmatmul.msk.f32.vlgmr.msra.gmra.mxu0 %vm41_vm1, %v1121_v12 }
  0x84   :  { %1123 = vmatmul.msk.f32.vlgmr.msra.gmra.mxu1 %vm41_vm1, %v1121_v12  ;;  %143 = vmatpush.msrb.mxu0 %v1310_v3  ;;  %v639_v3 = vsel %vm638_vm6, %v1232_v62, %v1233_v63  ;;  %v1247_v12 = vunpack.i.l.bf16 %v1246_v7 }
  0x85   :  { %163 = vmatpush.msrb.mxu1 %v1315_v4  ;;  %1128 = vmatmul.msk.f32.vlgmr.msrb.gmra.mxu2 %vm41_vm1, %v14_v24 }
  0x86   :  { %409 = vmatpush.msrb.mxu3 %v1198_v21  ;;  %v1206_v33 = vpop.permute.xlu0 %1205  ;;  %244 = vmatpush.msra.mxu0 %v219_v29  ;;  %v1211_v39 = vpop.permute.xlu1 %1210  ;;  %v851_v18 = vsel %vm848_vm8, %v1247_v12, %v1248_v11  ;;  %v1155_v21 = vld [vmem:[%s1506_s1 + $0x38] sm:$0xff] }
  0x87   :  { %264 = vmatpush.msra.mxu1 %v220_v27  ;;  %389 = vmatpush.msrb.mxu2 %v326_v30  ;;  %v1208_v34 = vunpack.i.h.bf16 %v1206_v33  ;;  %v1207_v35 = vunpack.i.l.bf16 %v1206_v33  ;;  %v1212_v42 = vunpack.i.l.bf16 %v1211_v39  ;;  %v1213_v43 = vunpack.i.h.bf16 %v1211_v39 }
  0x89   :  { %v431_v40 = vsel %vm428_vm4, %v1207_v35, %v1208_v34  ;;  %v429_v47 = vsel %vm428_vm4, %v1212_v42, %v1213_v43  ;;  %v430_v48 = vsel %vm428_vm4, %v1213_v43, %v1207_v35 }
  0x8b   :  { %1134 = vmatmul.msk.f32.vlgmr.msra.gmra.mxu3 %vm41_vm1, %v1130_v36  ;;  %1126 = vmatmul.msk.f32.vlgmr.msrb.gmra.mxu0 %vm41_vm1, %v14_v24 }
  0x8c   :  { %1127 = vmatmul.msk.f32.vlgmr.msrb.gmra.mxu1 %vm41_vm1, %v14_v24  ;;  %349 = vmatpush.msrb.mxu0 %v324_v37  ;;  %v1160_v24 = vld [vmem:[%s1506_s1 + $0x40] sm:$0xff] }
  0x8d   :  { %1133 = vmatmul.msk.f32.vlgmr.msra.gmra.mxu2 %vm41_vm1, %v1130_v36  ;;  %369 = vmatpush.msrb.mxu1 %v325_v38 }
  0x8e   :  { %514 = vmatpush.msra.mxu3 %v1208_v34  ;;  %494 = vmatpush.msra.mxu2 %v431_v40  ;;  %v1221_v49 = vpop.permute.xlu0 %1220  ;;  %v1226_v51 = vpop.permute.xlu1 %1225 }
  0x8f   :  { %v1222_v52 = vunpack.i.l.bf16 %v1221_v49  ;;  %v1223_v53 = vunpack.i.h.bf16 %v1221_v49  ;;  %v1228_v54 = vunpack.i.h.bf16 %v1226_v51  ;;  %v1227_v55 = vunpack.i.l.bf16 %v1226_v51 }
  0x91   :  { %v534_v57 = vsel %vm533_vm5, %v1222_v52, %v1223_v53  ;;  %v535_v58 = vsel %vm533_vm5, %v1223_v53, %v1217_v45  ;;  %v641_v60 = vsel %vm638_vm6, %v1227_v55, %v1228_v54  ;;  %v640_v4 = vsel %vm638_vm6, %v1233_v63, %v1227_v55 }
  0x93   :  { %1139 = vmatmul.msk.f32.vlgmr.msrb.gmra.mxu3 %vm41_vm1, %v1135_v46  ;;  %1131 = vmatmul.msk.f32.vlgmr.msra.gmra.mxu0 %vm41_vm1, %v1130_v36 }
  0x94   :  { %1132 = vmatmul.msk.f32.vlgmr.msra.gmra.mxu1 %vm41_vm1, %v1130_v36  ;;  %454 = vmatpush.msra.mxu0 %v429_v47 }
  0x95   :  { %1138 = vmatmul.msk.f32.vlgmr.msrb.gmra.mxu2 %vm41_vm1, %v1135_v46  ;;  %474 = vmatpush.msra.mxu1 %v430_v48 }
  0x96   :  { %619 = vmatpush.msrb.mxu3 %v1218_v44  ;;  %599 = vmatpush.msrb.mxu2 %v536_v50  ;;  %v1236_v61 = vpop.permute.xlu0 %1235  ;;  %v1241_v5 = vpop.permute.xlu1 %1240 }
  0x97   :  { %v1238_v0 = vunpack.i.h.bf16 %v1236_v61  ;;  %v1237_v1 = vunpack.i.l.bf16 %v1236_v61  ;;  %v1242_v8 = vunpack.i.l.bf16 %v1241_v5  ;;  %v1243_v10 = vunpack.i.h.bf16 %v1241_v5 }
  0x99   :  { %v746_v6 = vsel %vm743_vm7, %v1237_v1, %v1238_v0  ;;  %v744_v15 = vsel %vm743_vm7, %v1242_v8, %v1243_v10  ;;  %v745_v16 = vsel %vm743_vm7, %v1243_v10, %v1237_v1 }
  0x9b   :  { %1144 = vmatmul.msk.f32.vlgmr.msra.gmra.mxu3 %vm41_vm1, %v1140_v56  ;;  %1136 = vmatmul.msk.f32.vlgmr.msrb.gmra.mxu0 %vm41_vm1, %v1135_v46 }
  0x9c   :  { %1137 = vmatmul.msk.f32.vlgmr.msrb.gmra.mxu1 %vm41_vm1, %v1135_v46  ;;  %559 = vmatpush.msrb.mxu0 %v534_v57 }
  0x9d   :  { %1143 = vmatmul.msk.f32.vlgmr.msra.gmra.mxu2 %vm41_vm1, %v1140_v56  ;;  %579 = vmatpush.msrb.mxu1 %v535_v58 }
  0x9e   :  { %724 = vmatpush.msra.mxu3 %v1228_v54  ;;  %704 = vmatpush.msra.mxu2 %v641_v60  ;;  %v1251_v17 = vpop.permute.xlu0 %1250 }
  0x9f   :  { %v1252_v19 = vunpack.i.l.bf16 %v1251_v17  ;;  %v1253_v20 = vunpack.i.h.bf16 %v1251_v17 }
  0xa1   :  { %v849_v22 = vsel %vm848_vm8, %v1252_v19, %v1253_v20  ;;  %v850_v23 = vsel %vm848_vm8, %v1253_v20, %v1247_v12 }
  0xa3   :  { %1149 = vmatmul.msk.f32.vlgmr.msrb.gmra.mxu3 %vm41_vm1, %v1145_v2  ;;  %1141 = vmatmul.msk.f32.vlgmr.msra.gmra.mxu0 %vm41_vm1, %v1140_v56 }
  0xa4   :  { %1142 = vmatmul.msk.f32.vlgmr.msra.gmra.mxu1 %vm41_vm1, %v1140_v56  ;;  %664 = vmatpush.msra.mxu0 %v639_v3 }
  0xa5   :  { %1148 = vmatmul.msk.f32.vlgmr.msrb.gmra.mxu2 %vm41_vm1, %v1145_v2  ;;  %684 = vmatpush.msra.mxu1 %v640_v4 }
  0xa6   :  { %829 = vmatpush.msrb.mxu3 %v1238_v0  ;;  %809 = vmatpush.msrb.mxu2 %v746_v6 }
  0xab   :  { %1154 = vmatmul.msk.f32.vlgmr.msra.gmra.mxu3 %vm41_vm1, %v1150_v14  ;;  %1146 = vmatmul.msk.f32.vlgmr.msrb.gmra.mxu0 %vm41_vm1, %v1145_v2 }
  0xac   :  { %1147 = vmatmul.msk.f32.vlgmr.msrb.gmra.mxu1 %vm41_vm1, %v1145_v2  ;;  %769 = vmatpush.msrb.mxu0 %v744_v15 }
  0xad   :  { %1153 = vmatmul.msk.f32.vlgmr.msra.gmra.mxu2 %vm41_vm1, %v1150_v14  ;;  %789 = vmatpush.msrb.mxu1 %v745_v16 }
  0xae   :  { %934 = vmatpush.msra.mxu3 %v1248_v11  ;;  %914 = vmatpush.msra.mxu2 %v851_v18 }
  0xb3   :  { %1159 = vmatmul.msk.f32.vlgmr.msrb.gmra.mxu3 %vm41_vm1, %v1155_v21  ;;  %1151 = vmatmul.msk.f32.vlgmr.msra.gmra.mxu0 %vm41_vm1, %v1150_v14 }
  0xb4   :  { %1152 = vmatmul.msk.f32.vlgmr.msra.gmra.mxu1 %vm41_vm1, %v1150_v14  ;;  %874 = vmatpush.msra.mxu0 %v849_v22 }
  0xb5   :  { %1158 = vmatmul.msk.f32.vlgmr.msrb.gmra.mxu2 %vm41_vm1, %v1155_v21  ;;  %894 = vmatpush.msra.mxu1 %v850_v23 }
  0xbb   :  { %1164 = vmatmul.msk.f32.vlgmr.msra.gmra.mxu3 %vm41_vm1, %v1160_v24  ;;  %1156 = vmatmul.msk.f32.vlgmr.msrb.gmra.mxu0 %vm41_vm1, %v1155_v21 }
  0xbc   :  { %1157 = vmatmul.msk.f32.vlgmr.msrb.gmra.mxu1 %vm41_vm1, %v1155_v21 }
  0xbd   :  { %1163 = vmatmul.msk.f32.vlgmr.msra.gmra.mxu2 %vm41_vm1, %v1160_v24 }
  0xc3   :  { %1161 = vmatmul.msk.f32.vlgmr.msra.gmra.mxu0 %vm41_vm1, %v1160_v24 }
  0xc4   :  { %1162 = vmatmul.msk.f32.vlgmr.msra.gmra.mxu1 %vm41_vm1, %v1160_v24 }
  0xf0   :  { %v947_v19 = vpop.permute.xlu1 %946 }
  0xfd   :  { %v122_v25 = vpop.f32.mrf.mxu3 }
  0xfe   :  { %v102_v26 = vpop.f32.mrf.mxu2 }
 0x100   :  { %v62_v27 = vpop.f32.mrf.mxu0 }
 0x101   :  { %v82_v28 = vpop.f32.mrf.mxu1 }
 0x106   :  { %v205_v29 = vpop.f32.mrf.mxu3 }
 0x107   :  { %v206_v52 = vadd.f32 %v205_v29, %v122_v25 }
 0x108   :  { %v185_v30 = vpop.f32.mrf.mxu2  ;;  %v145_v31 = vpop.f32.mrf.mxu0 }
 0x109   :  { %v165_v32 = vpop.f32.mrf.mxu1  ;;  %v186_v54 = vadd.f32 %v185_v30, %v102_v26  ;;  %v146_v55 = vadd.f32 %v145_v31, %v62_v27 }
 0x10a   :  { %v166_v57 = vadd.f32 %v165_v32, %v82_v28 }
 0x10e   :  { %v306_v33 = vpop.f32.mrf.mxu3 }
 0x10f   :  { %v312_v56 = vadd.f32 %v306_v33, %v206_v52 }
 0x110   :  { %v286_v34 = vpop.f32.mrf.mxu2  ;;  %v246_v35 = vpop.f32.mrf.mxu0 }
 0x111   :  { %v266_v36 = vpop.f32.mrf.mxu1  ;;  %v311_v58 = vadd.f32 %v286_v34, %v186_v54  ;;  %v309_v59 = vadd.f32 %v246_v35, %v146_v55 }
 0x112   :  { %v310_v61 = vadd.f32 %v266_v36, %v166_v57 }
 0x116   :  { %v411_v37 = vpop.f32.mrf.mxu3 }
 0x117   :  { %v417_v60 = vadd.f32 %v411_v37, %v312_v56 }
 0x118   :  { %v391_v38 = vpop.f32.mrf.mxu2  ;;  %v351_v39 = vpop.f32.mrf.mxu0 }
 0x119   :  { %v371_v40 = vpop.f32.mrf.mxu1  ;;  %v416_v63 = vadd.f32 %v391_v38, %v311_v58  ;;  %v414_v0 = vadd.f32 %v351_v39, %v309_v59 }
 0x11a   :  { %v415_v2 = vadd.f32 %v371_v40, %v310_v61 }
 0x11e   :  { %v516_v41 = vpop.f32.mrf.mxu3 }
 0x11f   :  { %v522_v1 = vadd.f32 %v516_v41, %v417_v60 }
 0x120   :  { %v496_v42 = vpop.f32.mrf.mxu2  ;;  %v456_v43 = vpop.f32.mrf.mxu0 }
 0x121   :  { %v476_v44 = vpop.f32.mrf.mxu1  ;;  %v521_v5 = vadd.f32 %v496_v42, %v416_v63  ;;  %v519_v6 = vadd.f32 %v456_v43, %v414_v0 }
 0x122   :  { %v520_v9 = vadd.f32 %v476_v44, %v415_v2 }
 0x126   :  { %v621_v45 = vpop.f32.mrf.mxu3 }
 0x127   :  { %v627_v7 = vadd.f32 %v621_v45, %v522_v1 }
 0x128   :  { %v601_v46 = vpop.f32.mrf.mxu2  ;;  %v561_v47 = vpop.f32.mrf.mxu0 }
 0x129   :  { %v581_v48 = vpop.f32.mrf.mxu1  ;;  %v626_v10 = vadd.f32 %v601_v46, %v521_v5  ;;  %v624_v11 = vadd.f32 %v561_v47, %v519_v6 }
 0x12a   :  { %v625_v13 = vadd.f32 %v581_v48, %v520_v9 }
 0x12e   :  { %v726_v49 = vpop.f32.mrf.mxu3 }
 0x12f   :  { %v732_v12 = vadd.f32 %v726_v49, %v627_v7 }
 0x130   :  { %v706_v50 = vpop.f32.mrf.mxu2  ;;  %v666_v51 = vpop.f32.mrf.mxu0 }
 0x131   :  { %v686_v53 = vpop.f32.mrf.mxu1  ;;  %v731_v14 = vadd.f32 %v706_v50, %v626_v10  ;;  %v729_v15 = vadd.f32 %v666_v51, %v624_v11 }
 0x132   :  { %v730_v17 = vadd.f32 %v686_v53, %v625_v13 }
 0x136   :  { %v831_v62 = vpop.f32.mrf.mxu3 }
 0x137   :  { %v837_v16 = vadd.f32 %v831_v62, %v732_v12 }
 0x138   :  { %v811_v3 = vpop.f32.mrf.mxu2  ;;  %v771_v4 = vpop.f32.mrf.mxu0 }
 0x139   :  { %v791_v8 = vpop.f32.mrf.mxu1  ;;  %v836_v20 = vadd.f32 %v811_v3, %v731_v14  ;;  %v834_v21 = vadd.f32 %v771_v4, %v729_v15 }
 0x13a   :  { %v835_v23 = vadd.f32 %v791_v8, %v730_v17 }
 0x13e   :  { %v936_v18 = vpop.f32.mrf.mxu3 }
 0x13f   :  { %v942_v22 = vadd.f32 %v936_v18, %v837_v16 }
 0x140   :  { %v916_v24 = vpop.f32.mrf.mxu2  ;;  %v876_v25 = vpop.f32.mrf.mxu0 }
 0x141   :  { %v941_v26 = vadd.f32 %v916_v24, %v836_v20  ;;  %v1411_v27 = vadd.f32 %v947_v19, %v942_v22  ;;  %v939_v28 = vadd.f32 %v876_v25, %v834_v21  ;;  %v896_v29 = vpop.f32.mrf.mxu1 }
 0x142   :  { %v940_v30 = vadd.f32 %v896_v29, %v835_v23 }
 0x143   :  { %v1413_v31 = vadd.f32 %v947_v19, %v941_v26  ;;  %v1416_v32 = vmul.f32 0.70710677, %v1411_v27  ;;  %v1418_v33 = vadd.f32 %v947_v19, %v939_v28 }
 0x144   :  { %v1420_v34 = vadd.f32 %v947_v19, %v940_v30 }
 0x145   :  { %v1423_v35 = vmul.f32 0.70710677, %v1413_v31  ;;  %v1426_v36 = vand.u32 2147483647, %v1416_v32  ;;  %v1429_v37 = vmul.f32 0.70710677, %v1418_v33 }
 0x146   :  { %v1432_v38 = vmul.f32 0.70710677, %v1420_v34 }
 0x147   :  { %v1435_v39 = vand.u32 2147483647, %v1423_v35  ;;  %v968_v40 = vmul.f32 0.3275911, %v1426_v36  ;;  %v1439_v41 = vand.u32 2147483647, %v1429_v37 }
 0x148   :  { %v1443_v44 = vand.u32 2147483647, %v1432_v38  ;;  %v1072_v57 = vsub.f32 0.0, %v1426_v36 }
 0x149   :  { %v967_v42 = vmul.f32 0.3275911, %v1435_v39  ;;  %v972_v43 = vadd.f32 1.0, %v968_v40  ;;  %v965_v45 = vmul.f32 0.3275911, %v1439_v41  ;;  %v1071_v56 = vsub.f32 0.0, %v1435_v39 }
 0x14a   :  { %v966_v48 = vmul.f32 0.3275911, %v1443_v44  ;;  %v1076_v30 = vmul.f32 %v1072_v57, %v1426_v36 }
 0x14b   :  { %v971_v46 = vadd.f32 1.0, %v967_v42  ;;  %1256 = vrcp.f32 %v972_v43  ;;  %v969_v47 = vadd.f32 1.0, %v965_v45  ;;  %v1027_v53 = vand.u32 2147483647, %v972_v43 }
 0x14c   :  { %v1447_v50 = vadd.f32 1.0, %v966_v48  ;;  %vm1023_vm9 = vweird.f32 %v972_v43  ;;  %v1029_v61 = vand.u32 2147483648, %v972_v43  ;;  %v1069_v42 = vsub.f32 0.0, %v1439_v41 }
 0x14d   :  { %1258 = vrcp.f32 %v971_v46  ;;  %v1012_v59 = vand.u32 2147483647, %v971_v46  ;;  %v1014_v60 = vand.u32 2147483648, %v971_v46  ;;  %vm1008_vm11 = vweird.f32 %v971_v46 }
 0x14e   :  { %1260 = vrcp.f32 %v969_v47  ;;  %vm1452_vm12 = vcmp.eq.f32.partialorder %v1027_v53, 8.507059e+37  ;;  %v982_v2 = vand.u32 2147483647, %v969_v47  ;;  %v984_v3 = vand.u32 2147483648, %v969_v47 }
 0x14f   :  { %1262 = vrcp.f32 %v1447_v50  ;;  %vm1456_vm14 = vcmp.eq.f32.partialorder %v1012_v59, 8.507059e+37  ;;  %v1015_v9 = vor.u32 1.1754944e-38, %v1014_v60  ;;  %v1030_v10 = vor.u32 1.1754944e-38, %v1029_v61 }
 0x150   :  { %vm978_vm2 = vweird.f32 %v969_v47  ;;  %vm1465_vm3 = vcmp.eq.f32.partialorder %v982_v2, 8.507059e+37  ;;  %v985_v17 = vor.u32 1.1754944e-38, %v984_v3  ;;  %v997_v23 = vand.u32 2147483647, %v1447_v50 }
 0x151   :  { %v1257_v49 = vpop.eup %1256  ;;  %v999_v24 = vand.u32 2147483648, %v1447_v50  ;;  %vm993_vm6 = vweird.f32 %v1447_v50  ;;  %v1075_v48 = vmul.f32 %v1071_v56, %v1435_v39 }
 0x152   :  { %v1019_v51 = vmul.f32 %v1257_v49, %v972_v43  ;;  %vm1024_vm10 = vweird.f32 %v1257_v49 }
 0x153   :  { %v1259_v52 = vpop.eup %1258  ;;  %vm1025_vm15 = vmor %vm1023_vm9, %vm1024_vm10  ;;  %vm998_vm9 = vcmp.eq.f32.partialorder %v997_v23, 8.507059e+37  ;;  %vm1096_vm10 = vcmp.lt.f32.partialorder %v1416_v32, 0.0 }
 0x154   :  { %v1004_v54 = vmul.f32 %v1259_v52, %v971_v46  ;;  %v1020_v55 = vsub.f32 1.0, %v1019_v51  ;;  %v1261_v58 = vpop.eup %1260  ;;  %vm1009_vm13 = vweird.f32 %v1259_v52 }
 0x155   :  { %v974_v0 = vmul.f32 %v1261_v58, %v969_v47  ;;  %v1263_v7 = vpop.eup %1262  ;;  %vm979_vm0 = vweird.f32 %v1261_v58  ;;  %vm1010_vm1 = vmor %vm1008_vm11, %vm1009_vm13  ;;  %vm1095_vm11 = vcmp.lt.f32.partialorder %v1423_v35, 0.0  ;;  %vm1094_vm13 = vcmp.lt.f32.partialorder %v1432_v38, 0.0 }
 0x156   :  { %v1005_v62 = vsub.f32 1.0, %v1004_v54  ;;  %v1021_v63 = vmul.f32 %v1257_v49, %v1020_v55  ;;  %v989_v14 = vmul.f32 %v1263_v7, %v1447_v50  ;;  %vm980_vm4 = vmor %vm978_vm2, %vm979_vm0  ;;  %vm994_vm5 = vweird.f32 %v1263_v7 }
 0x157   :  { %v975_v6 = vsub.f32 1.0, %v974_v0  ;;  %vm995_vm7 = vmor %vm993_vm6, %vm994_vm5  ;;  %v1083_v54 = vmul.f32 1.442695, %v1076_v30  ;;  %v1073_v55 = vmul.f32 %v1069_v42, %v1439_v41  ;;  %v1070_v50 = vsub.f32 0.0, %v1443_v44 }
 0x158   :  { %v1006_v4 = vmul.f32 %v1259_v52, %v1005_v62  ;;  %v1022_v5 = vadd.f32 %v1257_v49, %v1021_v63  ;;  %v990_v21 = vsub.f32 1.0, %v989_v14  ;;  %v1081_v62 = vmul.f32 1.442695, %v1075_v48 }
 0x159   :  { %v976_v13 = vmul.f32 %v1261_v58, %v975_v6  ;;  %1264 = vpow2.f32 %v1083_v54  ;;  %v1077_v1 = vmul.f32 1.442695, %v1073_v55  ;;  %v1074_v2 = vmul.f32 %v1070_v50, %v1443_v44 }
 0x15a   :  { %v1007_v11 = vadd.f32 %v1259_v52, %v1006_v4  ;;  %v1026_v12 = vsel %vm1025_vm15, %v1257_v49, %v1022_v5  ;;  %v991_v29 = vmul.f32 %v1263_v7, %v990_v21  ;;  %v1000_v49 = vor.u32 1.1754944e-38, %v999_v24 }
 0x15b   :  { %v1031_v15 = vsel %vm1452_vm12, %v1030_v10, %v1026_v12  ;;  %v977_v20 = vadd.f32 %v1261_v58, %v976_v13  ;;  %1266 = vpow2.f32 %v1081_v62  ;;  %v1079_v10 = vmul.f32 1.442695, %v1074_v2 }
 0x15c   :  { %v1011_v18 = vsel %vm1010_vm1, %v1259_v52, %v1007_v11  ;;  %v1036_v19 = vmul.f32 1.0614054, %v1031_v15  ;;  %v992_v47 = vadd.f32 %v1263_v7, %v991_v29  ;;  %1268 = vpow2.f32 %v1077_v1 }
 0x15d   :  { %v1016_v22 = vsel %vm1456_vm14, %v1015_v9, %v1011_v18  ;;  %v981_v28 = vsel %vm980_vm4, %v1261_v58, %v977_v20  ;;  %1270 = vpow2.f32 %v1079_v10  ;;  %vm1093_vm12 = vcmp.lt.f32.partialorder %v1429_v37, 0.0 }
 0x15e   :  { %v1035_v25 = vmul.f32 1.0614054, %v1016_v22  ;;  %v1040_v26 = vadd.f32 -1.4531521, %v1036_v19  ;;  %v986_v40 = vsel %vm1465_vm3, %v985_v17, %v981_v28  ;;  %v996_v53 = vsel %vm995_vm7, %v1263_v7, %v992_v47 }
 0x15f   :  { %v1033_v46 = vmul.f32 1.0614054, %v986_v40  ;;  %v1001_v57 = vsel %vm998_vm9, %v1000_v49, %v996_v53  ;;  %v1265_v16 = vpop.eup %1264  ;;  %v956_v47 = vmul.f32 0.5, %v1411_v27  ;;  %v953_v27 = vmul.f32 0.5, %v1418_v33 }
 0x160   :  { %v1039_v43 = vadd.f32 -1.4531521, %v1035_v25  ;;  %v1044_v45 = vmul.f32 %v1040_v26, %v1031_v15  ;;  %v1034_v61 = vmul.f32 1.0614054, %v1001_v57  ;;  %v954_v50 = vmul.f32 0.5, %v1420_v34 }
 0x161   :  { %v1037_v36 = vadd.f32 -1.4531521, %v1033_v46  ;;  %v1267_v20 = vpop.eup %1266 }
 0x162   :  { %v1043_v51 = vmul.f32 %v1039_v43, %v1016_v22  ;;  %v1048_v52 = vadd.f32 1.4214138, %v1044_v45  ;;  %v1038_v0 = vadd.f32 -1.4531521, %v1034_v61  ;;  %v1269_v26 = vpop.eup %1268 }
 0x163   :  { %v1041_v60 = vmul.f32 %v1037_v36, %v986_v40  ;;  %v1271_v46 = vpop.eup %1270 }
 0x164   :  { %v1047_v58 = vadd.f32 1.4214138, %v1043_v51  ;;  %v1052_v59 = vmul.f32 %v1048_v52, %v1031_v15  ;;  %v1042_v41 = vmul.f32 %v1038_v0, %v1001_v57  ;;  %v955_v52 = vmul.f32 0.5, %v1413_v31 }
 0x165   :  { %v1045_v63 = vadd.f32 1.4214138, %v1041_v60 }
 0x166   :  { %v1051_v39 = vmul.f32 %v1047_v58, %v1016_v22  ;;  %v1056_v56 = vadd.f32 -0.28449672, %v1052_v59  ;;  %v1046_v9 = vadd.f32 1.4214138, %v1042_v41 }
 0x167   :  { %v1049_v5 = vmul.f32 %v1045_v63, %v986_v40 }
 0x168   :  { %v1055_v3 = vadd.f32 -0.28449672, %v1051_v39  ;;  %v1060_v4 = vmul.f32 %v1056_v56, %v1031_v15  ;;  %v1050_v14 = vmul.f32 %v1046_v9, %v1001_v57 }
 0x169   :  { %v1053_v8 = vadd.f32 -0.28449672, %v1049_v5 }
 0x16a   :  { %v1059_v6 = vmul.f32 %v1055_v3, %v1016_v22  ;;  %v1064_v7 = vadd.f32 0.2548296, %v1060_v4  ;;  %v1054_v44 = vadd.f32 -0.28449672, %v1050_v14 }
 0x16b   :  { %v1057_v13 = vmul.f32 %v1053_v8, %v986_v40 }
 0x16c   :  { %v1063_v11 = vadd.f32 0.2548296, %v1059_v6  ;;  %v1068_v12 = vmul.f32 %v1064_v7, %v1031_v15  ;;  %v1058_v25 = vmul.f32 %v1054_v44, %v1001_v57 }
 0x16d   :  { %v1061_v19 = vadd.f32 0.2548296, %v1057_v13 }
 0x16e   :  { %v1067_v17 = vmul.f32 %v1063_v11, %v1016_v22  ;;  %v1088_v18 = vmul.f32 %v1265_v16, %v1068_v12  ;;  %v1062_v42 = vadd.f32 0.2548296, %v1058_v25 }
 0x16f   :  { %v1065_v24 = vmul.f32 %v1061_v19, %v986_v40 }
 0x170   :  { %v1087_v21 = vmul.f32 %v1267_v20, %v1067_v17  ;;  %v1092_v23 = vsub.f32 1.0, %v1088_v18  ;;  %v1066_v22 = vmul.f32 %v1062_v42, %v1001_v57 }
 0x171   :  { %v1085_v30 = vmul.f32 %v1269_v26, %v1065_v24 }
 0x172   :  { %v1091_v28 = vsub.f32 1.0, %v1087_v21  ;;  %v1100_v29 = vsub.f32 0.0, %v1092_v23  ;;  %v1086_v51 = vmul.f32 %v1271_v46, %v1066_v22 }
 0x173   :  { %v1089_v45 = vsub.f32 1.0, %v1085_v30 }
 0x174   :  { %v1099_v15 = vsub.f32 0.0, %v1091_v28  ;;  %v1104_v43 = vsel %vm1096_vm10, %v1100_v29, %v1092_v23  ;;  %v1090_v54 = vsub.f32 1.0, %v1086_v51 }
 0x175   :  { %v1108_v48 = vadd.f32 1.0, %v1104_v43  ;;  %v1097_v40 = vsub.f32 0.0, %v1089_v45 }
 0x176   :  { %v1103_v49 = vsel %vm1095_vm11, %v1099_v15, %v1091_v28  ;;  %v1098_v57 = vsub.f32 0.0, %v1090_v54 }
 0x177   :  { %v1107_v36 = vadd.f32 1.0, %v1103_v49  ;;  %v1112_v53 = vmul.f32 %v1108_v48, %v956_v47  ;;  %v1101_v32 = vsel %vm1093_vm12, %v1097_v40, %v1089_v45 }
 0x178   :  { %v1105_v35 = vadd.f32 1.0, %v1101_v32  ;;  %v1102_v37 = vsel %vm1094_vm13, %v1098_v57, %v1090_v54 }
 0x179   :  { %v1111_v55 = vmul.f32 %v1107_v36, %v955_v52  ;;  %1116 = vst.msk [vmem:[%s1508_s3 + $0x18] sm:$0xff] %vm848_vm8, %v1112_v53  ;;  %v1106_v58 = vadd.f32 1.0, %v1102_v37 }
 0x17a   :  { %v1109_v31 = vmul.f32 %v1105_v35, %v953_v27 }
 0x17b   :  { %1115 = vst [vmem:[%s1508_s3 + $0x10] sm:$0xff] %v1111_v55  ;;  %v1110_v59 = vmul.f32 %v1106_v58, %v954_v50 }
 0x17c   :  { %1113 = vst [vmem:[%s1508_s3] sm:$0xff] %v1109_v31 }
 0x17d   :  { %1114 = vst [vmem:[%s1508_s3 + $0x8] sm:$0xff] %v1110_v59 }

// kernel: decoder_forward.11
= control target key start
LH: loop header
LB: loop body
LE: loop exit
PB: predicated region body
PF: predicated region fallthrough
CT: control target
= control target key end

     0   :  { %s3729_s20 = smov 127   ;;  %s3730_s14 = smov 126   ;;  %vm73_vm0 = vcmask 1039360   ;;  %vm101_vm1 = vcmask 64512   ;;  %vm698_vm2 = vcmask 1031168   ;;  %vm1053_vm3 = vcmask 801792   ;;  %s4583_s0 = inlined_call_operand.vmem [shape: f32[8,1800], index: 0, kind: input, shape index: {}]   ;;  %s4584_s1 = inlined_call_operand.vmem [shape: f32[9,3,8], index: 1, kind: input, shape index: {}]   ;;  %s4585_s2 = inlined_call_operand.vmem [shape: f32[3,1], index: 2, kind: input, shape index: {}]   ;;  %s4586_s3 = inlined_call_operand.vmem [shape: f32[3,1738], index: 3, kind: output, shape index: {}]  }
   0x1   :  { %v3761_v0 = vld [vmem:[%s4583_s0 + $0x20] sm:$0xff]  ;;  %v3766_v1 = vld [vmem:[%s4583_s0 + $0x28] sm:$0xff]  ;;  %v3780_v4 = vld [vmem:[%s4583_s0 + $0x10] sm:$0xff]  ;;  %s3731_s15 = smov 98   ;;  %s3732_s16 = smov 97   ;;  %vm1408_vm4 = vcmask 793600  }
   0x2   :  { %v3771_v2 = vld [vmem:[%s4583_s0 + $0x8] sm:$0xff]  ;;  %v3775_v3 = vpack.i.bf16 %v3766_v1, %v3761_v0  ;;  %v3790_v6 = vld [vmem:[%s4583_s0 + $0x40] sm:$0xff]  ;;  %v3801_v8 = vld [vmem:[%s4583_s0 + $0x30] sm:$0xff]  ;;  %s3733_s17 = smov 96   ;;  %s3734_s18 = smov 68   ;;  %vm1763_vm5 = vcmask 785408  }
   0x3   :  { %v3784_v5 = vpack.i.bf16 %v3780_v4, %v3771_v2  ;;  %v3795_v7 = vld [vmem:[%s4583_s0 + $0x48] sm:$0xff]  ;;  %v3806_v9 = vld [vmem:[%s4583_s0 + $0x38] sm:$0xff]  ;;  %v3815_v11 = vld [vmem:[%s4583_s0] sm:$0xff]  ;;  %s3735_s19 = smov 67   ;;  %s3736_s22 = smov 66   ;;  %vm2150_vm6 = vcmask 556032  }
   0x4   :  { %3430 = vrot.lane.b32.xlu1 %v3775_v3, %s3729_s20  ;;  %v3810_v10 = vpack.i.bf16 %v3795_v7, %v3790_v6  ;;  %v3820_v12 = vld [vmem:[%s4583_s0 + $0x18] sm:$0xff]  ;;  %v3825_v13 = vpack.i.bf16 %v3806_v9, %v3801_v8  ;;  %v3830_v14 = vld [vmem:[%s4583_s0 + $0x50] sm:$0xff]  ;;  %v3850_v18 = vld [vmem:[%s4583_s0 + $0x60] sm:$0xff]  ;;  %vm2508_vm7 = vcmask 547840   ;;  %vm2866_vm8 = vcmask 539648  }
   0x5   :  { %3420 = vrot.lane.b32.xlu0 %v3784_v5, %s3729_s20  ;;  %v3835_v15 = vld [vmem:[%s4583_s0 + $0x58] sm:$0xff]  ;;  %v3839_v16 = vpack.i.bf16 %v3820_v12, %v3815_v11  ;;  %v3855_v19 = vld [vmem:[%s4583_s0 + $0x68] sm:$0xff]  ;;  %v3912_v26 = vld [vmem:[%s4584_s1 + $0x4] sm:$0x7]  ;;  %vm3247_vm9 = vcmask 1043456   ;;  %vm3268_vm10 = vcmask 1042432  }
   0x6   :  { %3440 = vrot.lane.b32.xlu2 %v3810_v10, %s3729_s20  ;;  %v3843_v17 = vpack.i.bf16 %v3835_v15, %v3830_v14  ;;  %v3860_v20 = vpack.i.bf16 %v3855_v19, %v3850_v18  ;;  %v14_v56 = vld [vmem:[%s4584_s1] sm:$0x7]  ;;  %v3982_v58 = vld [vmem:[%s4583_s0 + $0x70] sm:$0xff]  ;;  %vm3269_vm11 = vcmask 604164  }
   0x7   :  { %vm3270_vm12 = vmor %vm3269_vm11, %vm3268_vm10 }
   0xc   :  { %3435 = vrot.lane.b32.xlu1 %v3825_v13, %s3729_s20 }
   0xd   :  { %3425 = vrot.lane.b32.xlu0 %v3839_v16, %s3729_s20 }
   0xe   :  { %3445 = vrot.lane.b32.xlu2 %v3843_v17, %s3729_s20 }
  0x14   :  { %3455 = vrot.lane.b32.xlu1 %v3784_v5, %s3730_s14 }
  0x15   :  { %3450 = vrot.lane.b32.xlu0 %v3860_v20, %s3729_s20 }
  0x16   :  { %3460 = vrot.lane.b32.xlu2 %v3839_v16, %s3730_s14 }
  0x1c   :  { %3470 = vrot.lane.b32.xlu1 %v3825_v13, %s3730_s14 }
  0x1d   :  { %3465 = vrot.lane.b32.xlu0 %v3775_v3, %s3730_s14 }
  0x1e   :  { %3475 = vrot.lane.b32.xlu2 %v3810_v10, %s3730_s14 }
  0x24   :  { %3485 = vrot.lane.b32.xlu1 %v3860_v20, %s3730_s14 }
  0x25   :  { %3480 = vrot.lane.b32.xlu0 %v3843_v17, %s3730_s14 }
  0x26   :  { %3490 = vrot.lane.b32.xlu2 %v3784_v5, %s3731_s15 }
  0x2c   :  { %3500 = vrot.lane.b32.xlu1 %v3775_v3, %s3731_s15 }
  0x2d   :  { %3495 = vrot.lane.b32.xlu0 %v3839_v16, %s3731_s15 }
  0x2e   :  { %3505 = vrot.lane.b32.xlu2 %v3825_v13, %s3731_s15 }
  0x34   :  { %3515 = vrot.lane.b32.xlu1 %v3843_v17, %s3731_s15 }
  0x35   :  { %3510 = vrot.lane.b32.xlu0 %v3810_v10, %s3731_s15 }
  0x36   :  { %3520 = vrot.lane.b32.xlu2 %v3860_v20, %s3731_s15 }
  0x3c   :  { %3530 = vrot.lane.b32.xlu1 %v3839_v16, %s3732_s16 }
  0x3d   :  { %3525 = vrot.lane.b32.xlu0 %v3784_v5, %s3732_s16 }
  0x3e   :  { %3535 = vrot.lane.b32.xlu2 %v3775_v3, %s3732_s16 }
  0x44   :  { %3545 = vrot.lane.b32.xlu1 %v3810_v10, %s3732_s16 }
  0x45   :  { %3540 = vrot.lane.b32.xlu0 %v3825_v13, %s3732_s16 }
  0x46   :  { %3550 = vrot.lane.b32.xlu2 %v3843_v17, %s3732_s16 }
  0x4c   :  { %3560 = vrot.lane.b32.xlu1 %v3784_v5, %s3733_s17 }
  0x4d   :  { %3555 = vrot.lane.b32.xlu0 %v3860_v20, %s3732_s16 }
  0x4e   :  { %3565 = vrot.lane.b32.xlu2 %v3839_v16, %s3733_s17 }
  0x54   :  { %3575 = vrot.lane.b32.xlu1 %v3825_v13, %s3733_s17 }
  0x55   :  { %3570 = vrot.lane.b32.xlu0 %v3775_v3, %s3733_s17 }
  0x56   :  { %3580 = vrot.lane.b32.xlu2 %v3810_v10, %s3733_s17 }
  0x5c   :  { %3590 = vrot.lane.b32.xlu1 %v3860_v20, %s3733_s17 }
  0x5d   :  { %3585 = vrot.lane.b32.xlu0 %v3843_v17, %s3733_s17 }
  0x5e   :  { %3595 = vrot.lane.b32.xlu2 %v3784_v5, %s3734_s18 }
  0x60   :  { %v3441_v21 = vpop.permute.xlu2 %3440 }
  0x61   :  { %v3442_v30 = vunpack.i.l.bf16 %v3441_v21  ;;  %v3443_v38 = vunpack.i.h.bf16 %v3441_v21  ;;  %v4018_v21 = vld [vmem:[%s4584_s1 + $0x8] sm:$0x7] }
  0x63   :  { %v82_v49 = vsel %vm73_vm0, %v3442_v30, %v3443_v38 }
  0x64   :  { %3605 = vrot.lane.b32.xlu1 %v3775_v3, %s3734_s18 }
  0x65   :  { %3600 = vrot.lane.b32.xlu0 %v3839_v16, %s3734_s18 }
  0x66   :  { %3610 = vrot.lane.b32.xlu2 %v3825_v13, %s3734_s18 }
  0x68   :  { %v3446_v28 = vpop.permute.xlu2 %3445 }
  0x69   :  { %v3447_v39 = vunpack.i.l.bf16 %v3446_v28  ;;  %v3448_v41 = vunpack.i.h.bf16 %v3446_v28 }
  0x6b   :  { %v83_v48 = vsel %vm73_vm0, %v3443_v38, %v3447_v39  ;;  %v84_v50 = vsel %vm73_vm0, %v3447_v39, %v3448_v41 }
  0x6c   :  { %3620 = vrot.lane.b32.xlu1 %v3843_v17, %s3734_s18 }
  0x6d   :  { %3615 = vrot.lane.b32.xlu0 %v3810_v10, %s3734_s18 }
  0x6e   :  { %3625 = vrot.lane.b32.xlu2 %v3860_v20, %s3734_s18 }
  0x70   :  { %v3461_v61 = vpop.permute.xlu2 %3460 }
  0x74   :  { %3630 = vrot.lane.b32.xlu1 %v3784_v5, %s3735_s19 }
  0x75   :  { %2148 = vrot.lane.b32.xlu0 %v3982_v58, %s3734_s18 }
  0x76   :  { %v3431_v22 = vpop.permute.xlu1 %3430  ;;  %3635 = vrot.lane.b32.xlu2 %v3839_v16, %s3735_s19 }
  0x77   :  { %v3421_v23 = vpop.permute.xlu0 %3420  ;;  %v3433_v31 = vunpack.i.h.bf16 %v3431_v22  ;;  %v3432_v34 = vunpack.i.l.bf16 %v3431_v22 }
  0x78   :  { %v3423_v24 = vunpack.i.h.bf16 %v3421_v23  ;;  %v3422_v25 = vunpack.i.l.bf16 %v3421_v23 }
  0x79   :  { %v78_v47 = vsel %vm73_vm0, %v3432_v34, %v3433_v31 }
  0x7a   :  { %v75_v27 = vsel %vm73_vm0, %v3422_v25, %v3423_v24 }
  0x7b   :  { %140 = vmatpush.msra.mxu1 %v75_v27 }
  0x7c   :  { %3278 = vmatmul.msk.f32.vlgmr.msra.gmra.mxu1 %vm101_vm1, %v3912_v26  ;;  %3645 = vrot.lane.b32.xlu1 %v3825_v13, %s3735_s19 }
  0x7d   :  { %3640 = vrot.lane.b32.xlu0 %v3775_v3, %s3735_s19 }
  0x7e   :  { %v3436_v29 = vpop.permute.xlu1 %3435  ;;  %3650 = vrot.lane.b32.xlu2 %v3810_v10, %s3735_s19 }
  0x7f   :  { %v3437_v32 = vunpack.i.l.bf16 %v3436_v29  ;;  %v3426_v33 = vpop.permute.xlu0 %3425  ;;  %v3438_v35 = vunpack.i.h.bf16 %v3436_v29 }
  0x80   :  { %v3428_v36 = vunpack.i.h.bf16 %v3426_v33  ;;  %v3427_v37 = vunpack.i.l.bf16 %v3426_v33 }
  0x81   :  { %v79_v40 = vsel %vm73_vm0, %v3433_v31, %v3437_v32  ;;  %v80_v45 = vsel %vm73_vm0, %v3437_v32, %v3438_v35  ;;  %v81_v46 = vsel %vm73_vm0, %v3438_v35, %v3442_v30 }
  0x82   :  { %v74_v42 = vsel %vm73_vm0, %v3427_v37, %v3422_v25  ;;  %v76_v43 = vsel %vm73_vm0, %v3423_v24, %v3428_v36  ;;  %v77_v44 = vsel %vm73_vm0, %v3428_v36, %v3432_v34  ;;  %220 = vmatpush.msrb.mxu1 %v79_v40 }
  0x83   :  { %120 = vmatpush.msra.mxu0 %v74_v42  ;;  %160 = vmatpush.msra.mxu2 %v76_v43 }
  0x84   :  { %180 = vmatpush.msra.mxu3 %v77_v44  ;;  %3277 = vmatmul.msk.f32.vlgmr.msra.gmra.mxu0 %vm101_vm1, %v3912_v26 }
  0x85   :  { %3279 = vmatmul.msk.f32.vlgmr.msra.gmra.mxu2 %vm101_vm1, %v3912_v26  ;;  %3280 = vmatmul.msk.f32.vlgmr.msra.gmra.mxu3 %vm101_vm1, %v3912_v26 }
  0x86   :  { %200 = vmatpush.msrb.mxu0 %v78_v47  ;;  %3282 = vmatmul.msk.f32.vlgmr.msrb.gmra.mxu1 %vm101_vm1, %v3912_v26  ;;  %v3456_v57 = vpop.permute.xlu1 %3455 }
  0x87   :  { %240 = vmatpush.msrb.mxu2 %v80_v45  ;;  %260 = vmatpush.msrb.mxu3 %v81_v46  ;;  %v3451_v51 = vpop.permute.xlu0 %3450  ;;  %v3458_v59 = vunpack.i.h.bf16 %v3456_v57  ;;  %v3457_v60 = vunpack.i.l.bf16 %v3456_v57  ;;  %v4073_v57 = vld [vmem:[%s4584_s1 + $0xc] sm:$0x7] }
  0x88   :  { %300 = vmatpush.msra.mxu1 %v83_v48  ;;  %280 = vmatpush.msra.mxu0 %v82_v49  ;;  %v3453_v52 = vunpack.i.h.bf16 %v3451_v51  ;;  %v3452_v53 = vunpack.i.l.bf16 %v3451_v51 }
  0x89   :  { %320 = vmatpush.msra.mxu2 %v84_v50  ;;  %3660 = vrot.lane.b32.xlu1 %v3860_v20, %s3735_s19  ;;  %v700_v63 = vsel %vm698_vm2, %v3457_v60, %v3458_v59 }
  0x8a   :  { %v85_v54 = vsel %vm73_vm0, %v3448_v41, %v3452_v53  ;;  %380 = vmatpush.msrb.mxu1 %v3453_v52  ;;  %v86_v55 = vsel %vm73_vm0, %v3452_v53, %v3453_v52  ;;  %2506 = vrot.lane.b32.xlu2 %v3982_v58, %s3735_s19 }
  0x8b   :  { %340 = vmatpush.msra.mxu3 %v85_v54  ;;  %3655 = vrot.lane.b32.xlu0 %v3843_v17, %s3735_s19 }
  0x8c   :  { %3281 = vmatmul.msk.f32.vlgmr.msrb.gmra.mxu0 %vm101_vm1, %v3912_v26 }
  0x8d   :  { %3283 = vmatmul.msk.f32.vlgmr.msrb.gmra.mxu2 %vm101_vm1, %v3912_v26  ;;  %3284 = vmatmul.msk.f32.vlgmr.msrb.gmra.mxu3 %vm101_vm1, %v3912_v26 }
  0x8e   :  { %3286 = vmatmul.msk.f32.vlgmr.msra.gmra.mxu1 %vm101_vm1, %v3912_v26  ;;  %360 = vmatpush.msrb.mxu0 %v86_v55 }
  0x8f   :  { %423 = vmatpush.msrb.mxu3 %v3771_v2  ;;  %403 = vmatpush.msrb.mxu2 %v3815_v11  ;;  %v3466_v62 = vpop.permute.xlu0 %3465  ;;  %v3463_v2 = vunpack.i.h.bf16 %v3461_v61 }
  0x90   :  { %463 = vmatpush.msra.mxu1 %v3820_v12  ;;  %v3476_v12 = vpop.permute.xlu2 %3475 }
  0x91   :  { %3670 = vrot.lane.b32.xlu1 %v3839_v16, %s3736_s22  ;;  %v3478_v16 = vunpack.i.h.bf16 %v3476_v12 }
  0x92   :  { %3675 = vrot.lane.b32.xlu2 %v3775_v3, %s3736_s22 }
  0x93   :  { %3665 = vrot.lane.b32.xlu0 %v3784_v5, %s3736_s22 }
  0x94   :  { %3285 = vmatmul.msk.f32.vlgmr.msra.gmra.mxu0 %vm101_vm1, %v3912_v26 }
  0x95   :  { %3287 = vmatmul.msk.f32.vlgmr.msra.gmra.mxu2 %vm101_vm1, %v3912_v26  ;;  %3288 = vmatmul.msk.f32.vlgmr.msra.gmra.mxu3 %vm101_vm1, %v3912_v26 }
  0x96   :  { %3290 = vmatmul.msk.f32.vlgmr.msrb.gmra.mxu1 %vm101_vm1, %v3912_v26  ;;  %443 = vmatpush.msra.mxu0 %v3780_v4  ;;  %v3467_v4 = vunpack.i.l.bf16 %v3466_v62 }
  0x97   :  { %503 = vmatpush.msra.mxu3 %v3766_v1  ;;  %483 = vmatpush.msra.mxu2 %v3761_v0  ;;  %v3471_v0 = vpop.permute.xlu1 %3470  ;;  %v3462_v1 = vunpack.i.l.bf16 %v3461_v61 }
  0x98   :  { %543 = vmatpush.msrb.mxu1 %v3806_v9  ;;  %v701_v9 = vsel %vm698_vm2, %v3458_v59, %v3463_v2  ;;  %v3473_v3 = vunpack.i.h.bf16 %v3471_v0  ;;  %v3491_v29 = vpop.permute.xlu2 %3490 }
  0x99   :  { %3685 = vrot.lane.b32.xlu1 %v3810_v10, %s3736_s22  ;;  %v702_v10 = vsel %vm698_vm2, %v3463_v2, %v3467_v4  ;;  %v3493_v34 = vunpack.i.h.bf16 %v3491_v29  ;;  %v3492_v35 = vunpack.i.l.bf16 %v3491_v29 }
  0x9a   :  { %3690 = vrot.lane.b32.xlu2 %v3843_v17, %s3736_s22 }
  0x9b   :  { %3680 = vrot.lane.b32.xlu0 %v3825_v13, %s3736_s22  ;;  %v1055_v41 = vsel %vm1053_vm3, %v3492_v35, %v3493_v34 }
  0x9c   :  { %3289 = vmatmul.msk.f32.vlgmr.msrb.gmra.mxu0 %vm101_vm1, %v3912_v26 }
  0x9d   :  { %3291 = vmatmul.msk.f32.vlgmr.msrb.gmra.mxu2 %vm101_vm1, %v14_v56  ;;  %3292 = vmatmul.msk.f32.vlgmr.msrb.gmra.mxu3 %vm101_vm1, %v14_v56 }
  0x9e   :  { %3294 = vmatmul.msk.f32.vlgmr.msra.gmra.mxu1 %vm101_vm1, %v14_v56  ;;  %523 = vmatpush.msrb.mxu0 %v3801_v8  ;;  %v699_v8 = vsel %vm698_vm2, %v3462_v1, %v3457_v60 }
  0x9f   :  { %583 = vmatpush.msrb.mxu3 %v3795_v7  ;;  %563 = vmatpush.msrb.mxu2 %v3790_v6  ;;  %v3472_v6 = vunpack.i.l.bf16 %v3471_v0  ;;  %v3468_v7 = vunpack.i.h.bf16 %v3466_v62  ;;  %v3486_v17 = vpop.permute.xlu1 %3485  ;;  %v3694_v0 = vpack.i.bf16 %v3982_v58, %v3855_v19 }
  0xa0   :  { %623 = vmatpush.msra.mxu1 %v3835_v15  ;;  %v3477_v15 = vunpack.i.l.bf16 %v3476_v12  ;;  %v3487_v27 = vunpack.i.l.bf16 %v3486_v17  ;;  %v3488_v30 = vunpack.i.h.bf16 %v3486_v17  ;;  %v3506_v42 = vpop.permute.xlu2 %3505 }
  0xa1   :  { %v704_v11 = vsel %vm698_vm2, %v3468_v7, %v3472_v6  ;;  %v703_v22 = vsel %vm698_vm2, %v3467_v4, %v3468_v7  ;;  %v705_v23 = vsel %vm698_vm2, %v3472_v6, %v3473_v3  ;;  %v3507_v45 = vunpack.i.l.bf16 %v3506_v42  ;;  %3695 = vrot.lane.b32.xlu1 %v3694_v0, %s3736_s22 }
  0xa2   :  { %v706_v24 = vsel %vm698_vm2, %v3473_v3, %v3477_v15  ;;  %v707_v28 = vsel %vm698_vm2, %v3477_v15, %v3478_v16  ;;  %v711_v39 = vsel %vm698_vm2, %v3487_v27, %v3488_v30  ;;  %v3508_v46 = vunpack.i.h.bf16 %v3506_v42 }
  0xa3   :  { %2860 = vrot.lane.b32.xlu0 %v3850_v18, %s3736_s22 }
  0xa4   :  { %3293 = vmatmul.msk.f32.vlgmr.msra.gmra.mxu0 %vm101_vm1, %v14_v56  ;;  %v1060_v59 = vsel %vm1053_vm3, %v3507_v45, %v3508_v46 }
  0xa5   :  { %3295 = vmatmul.msk.f32.vlgmr.msra.gmra.mxu2 %vm101_vm1, %v14_v56  ;;  %3296 = vmatmul.msk.f32.vlgmr.msra.gmra.mxu3 %vm101_vm1, %v14_v56 }
  0xa6   :  { %3298 = vmatmul.msk.f32.vlgmr.msrb.gmra.mxu1 %vm101_vm1, %v14_v56  ;;  %603 = vmatpush.msra.mxu0 %v3830_v14  ;;  %v3481_v14 = vpop.permute.xlu0 %3480 }
  0xa7   :  { %663 = vmatpush.msra.mxu3 %v3855_v19  ;;  %643 = vmatpush.msra.mxu2 %v3850_v18  ;;  %v3482_v20 = vunpack.i.l.bf16 %v3481_v14  ;;  %v3483_v26 = vunpack.i.h.bf16 %v3481_v14  ;;  %v3501_v5 = vpop.permute.xlu1 %3500 }
  0xa8   :  { %764 = vmatpush.msrb.mxu1 %v700_v63  ;;  %v3502_v38 = vunpack.i.l.bf16 %v3501_v5  ;;  %v3503_v44 = vunpack.i.h.bf16 %v3501_v5  ;;  %v3521_v52 = vpop.permute.xlu2 %3520 }
  0xa9   :  { %v708_v25 = vsel %vm698_vm2, %v3478_v16, %v3482_v20  ;;  %v709_v31 = vsel %vm698_vm2, %v3482_v20, %v3483_v26  ;;  %v710_v32 = vsel %vm698_vm2, %v3483_v26, %v3487_v27  ;;  %v3523_v1 = vunpack.i.h.bf16 %v3521_v52  ;;  %v4116_v27 = vld [vmem:[%s4584_s1 + $0x10] sm:$0x7] }
  0xaa   :  { %v1058_v49 = vsel %vm1053_vm3, %v3502_v38, %v3503_v44  ;;  %v1059_v50 = vsel %vm1053_vm3, %v3503_v44, %v3507_v45 }
  0xac   :  { %3297 = vmatmul.msk.f32.vlgmr.msrb.gmra.mxu0 %vm101_vm1, %v14_v56 }
  0xad   :  { %3299 = vmatmul.msk.f32.vlgmr.msrb.gmra.mxu2 %vm101_vm1, %v14_v56  ;;  %3300 = vmatmul.msk.f32.vlgmr.msrb.gmra.mxu3 %vm101_vm1, %v14_v56 }
  0xae   :  { %3302 = vmatmul.msk.f32.vlgmr.msra.gmra.mxu1 %vm101_vm1, %v14_v56  ;;  %744 = vmatpush.msrb.mxu0 %v699_v8  ;;  %v3496_v33 = vpop.permute.xlu0 %3495 }
  0xaf   :  { %784 = vmatpush.msrb.mxu2 %v701_v9  ;;  %804 = vmatpush.msrb.mxu3 %v702_v10  ;;  %v3497_v36 = vunpack.i.l.bf16 %v3496_v33  ;;  %v3498_v37 = vunpack.i.h.bf16 %v3496_v33  ;;  %v3516_v18 = vpop.permute.xlu1 %3515 }
  0xb0   :  { %844 = vmatpush.msra.mxu1 %v704_v11  ;;  %v3517_v54 = vunpack.i.l.bf16 %v3516_v18  ;;  %v3518_v55 = vunpack.i.h.bf16 %v3516_v18  ;;  %v3536_v9 = vpop.permute.xlu2 %3535 }
  0xb1   :  { %v1054_v40 = vsel %vm1053_vm3, %v3497_v36, %v3492_v35  ;;  %v1057_v13 = vsel %vm1053_vm3, %v3498_v37, %v3502_v38  ;;  %v1056_v48 = vsel %vm1053_vm3, %v3493_v34, %v3498_v37  ;;  %v3537_v12 = vunpack.i.l.bf16 %v3536_v9 }
  0xb2   :  { %v1064_v6 = vsel %vm1053_vm3, %v3517_v54, %v3518_v55  ;;  %v3538_v14 = vunpack.i.h.bf16 %v3536_v9  ;;  %v4180_v9 = vld [vmem:[%s4584_s1 + $0x14] sm:$0x7] }
  0xb4   :  { %3301 = vmatmul.msk.f32.vlgmr.msra.gmra.mxu0 %vm101_vm1, %v14_v56 }
  0xb5   :  { %3303 = vmatmul.msk.f32.vlgmr.msra.gmra.mxu2 %vm101_vm1, %v14_v56  ;;  %3304 = vmatmul.msk.f32.vlgmr.msra.gmra.mxu3 %vm101_vm1, %v14_v56  ;;  %v3522_v56 = vunpack.i.l.bf16 %v3521_v52 }
  0xb6   :  { %3307 = vmatmul.msk.f32.vlgmr.msrb.gmra.mxu1 %vm101_vm1, %v4018_v21  ;;  %824 = vmatpush.msra.mxu0 %v703_v22  ;;  %v3511_v43 = vpop.permute.xlu0 %3510 }
  0xb7   :  { %864 = vmatpush.msra.mxu2 %v705_v23  ;;  %884 = vmatpush.msra.mxu3 %v706_v24  ;;  %v3512_v47 = vunpack.i.l.bf16 %v3511_v43  ;;  %v3513_v53 = vunpack.i.h.bf16 %v3511_v43  ;;  %v1065_v63 = vsel %vm1053_vm3, %v3518_v55, %v3522_v56  ;;  %v3531_v7 = vpop.permute.xlu1 %3530  ;;  %v1066_v8 = vsel %vm1053_vm3, %v3522_v56, %v3523_v1 }
  0xb8   :  { %924 = vmatpush.msrb.mxu1 %v708_v25  ;;  %v3532_v10 = vunpack.i.l.bf16 %v3531_v7  ;;  %v3533_v11 = vunpack.i.h.bf16 %v3531_v7  ;;  %v3551_v23 = vpop.permute.xlu2 %3550 }
  0xb9   :  { %v1061_v51 = vsel %vm1053_vm3, %v3508_v46, %v3512_v47  ;;  %v1062_v60 = vsel %vm1053_vm3, %v3512_v47, %v3513_v53  ;;  %v1063_v61 = vsel %vm1053_vm3, %v3513_v53, %v3517_v54  ;;  %v3552_v26 = vunpack.i.l.bf16 %v3551_v23 }
  0xba   :  { %v1412_v20 = vsel %vm1408_vm4, %v3533_v11, %v3537_v12  ;;  %v3553_v33 = vunpack.i.h.bf16 %v3551_v23 }
  0xbc   :  { %3306 = vmatmul.msk.f32.vlgmr.msrb.gmra.mxu0 %vm101_vm1, %v4018_v21  ;;  %v1419_v37 = vsel %vm1408_vm4, %v3552_v26, %v3553_v33 }
  0xbd   :  { %3308 = vmatmul.msk.f32.vlgmr.msrb.gmra.mxu2 %vm101_vm1, %v4018_v21  ;;  %3309 = vmatmul.msk.f32.vlgmr.msrb.gmra.mxu3 %vm101_vm1, %v4018_v21 }
  0xbe   :  { %3311 = vmatmul.msk.f32.vlgmr.msra.gmra.mxu1 %vm101_vm1, %v4018_v21  ;;  %904 = vmatpush.msrb.mxu0 %v707_v28  ;;  %v3526_v62 = vpop.permute.xlu0 %3525  ;;  %v1413_v28 = vsel %vm1408_vm4, %v3537_v12, %v3538_v14 }
  0xbf   :  { %944 = vmatpush.msrb.mxu2 %v709_v31  ;;  %964 = vmatpush.msrb.mxu3 %v710_v32  ;;  %v3528_v2 = vunpack.i.h.bf16 %v3526_v62  ;;  %v3527_v4 = vunpack.i.l.bf16 %v3526_v62  ;;  %v3546_v22 = vpop.permute.xlu1 %3545 }
  0xc0   :  { %1004 = vmatpush.msra.mxu1 %v3488_v30  ;;  %v3547_v25 = vunpack.i.l.bf16 %v3546_v22  ;;  %v3548_v17 = vunpack.i.h.bf16 %v3546_v22 }
  0xc1   :  { %v1410_v19 = vsel %vm1408_vm4, %v3527_v4, %v3528_v2  ;;  %v1409_v15 = vsel %vm1408_vm4, %v3532_v10, %v3527_v4  ;;  %v1411_v16 = vsel %vm1408_vm4, %v3528_v2, %v3533_v11 }
  0xc2   :  { %v1418_v31 = vsel %vm1408_vm4, %v3548_v17, %v3552_v26  ;;  %v1417_v34 = vsel %vm1408_vm4, %v3547_v25, %v3548_v17 }
  0xc4   :  { %3310 = vmatmul.msk.f32.vlgmr.msra.gmra.mxu0 %vm101_vm1, %v4018_v21 }
  0xc5   :  { %3312 = vmatmul.msk.f32.vlgmr.msra.gmra.mxu2 %vm101_vm1, %v4018_v21  ;;  %3313 = vmatmul.msk.f32.vlgmr.msra.gmra.mxu3 %vm101_vm1, %v4018_v21 }
  0xc6   :  { %3315 = vmatmul.msk.f32.vlgmr.msrb.gmra.mxu1 %vm101_vm1, %v4018_v21  ;;  %984 = vmatpush.msra.mxu0 %v711_v39  ;;  %v3541_v58 = vpop.permute.xlu0 %3540  ;;  %v3566_v39 = vpop.permute.xlu2 %3565 }
  0xc7   :  { %1099 = vmatpush.msra.mxu2 %v1054_v40  ;;  %1119 = vmatpush.msra.mxu3 %v1055_v41  ;;  %v3542_v3 = vunpack.i.l.bf16 %v3541_v58  ;;  %v3543_v24 = vunpack.i.h.bf16 %v3541_v58  ;;  %v3561_v35 = vpop.permute.xlu1 %3560  ;;  %v3568_v44 = vunpack.i.h.bf16 %v3566_v39 }
  0xc8   :  { %1159 = vmatpush.msrb.mxu1 %v1057_v13  ;;  %v3563_v41 = vunpack.i.h.bf16 %v3561_v35  ;;  %v3562_v42 = vunpack.i.l.bf16 %v3561_v35  ;;  %v3567_v13 = vunpack.i.l.bf16 %v3566_v39 }
  0xc9   :  { %v1415_v29 = vsel %vm1408_vm4, %v3542_v3, %v3543_v24  ;;  %v1416_v30 = vsel %vm1408_vm4, %v3543_v24, %v3547_v25 }
  0xca   :  { %v1764_v47 = vsel %vm1763_vm5, %v3567_v13, %v3562_v42 }
  0xcc   :  { %3314 = vmatmul.msk.f32.vlgmr.msrb.gmra.mxu0 %vm101_vm1, %v4018_v21 }
  0xcd   :  { %3316 = vmatmul.msk.f32.vlgmr.msrb.gmra.mxu2 %vm101_vm1, %v4018_v21  ;;  %3317 = vmatmul.msk.f32.vlgmr.msrb.gmra.mxu3 %vm101_vm1, %v4018_v21 }
  0xce   :  { %3319 = vmatmul.msk.f32.vlgmr.msra.gmra.mxu1 %vm101_vm1, %v4018_v21  ;;  %1139 = vmatpush.msrb.mxu0 %v1056_v48  ;;  %v3556_v32 = vpop.permute.xlu0 %3555  ;;  %v1765_v48 = vsel %vm1763_vm5, %v3562_v42, %v3563_v41 }
  0xcf   :  { %1179 = vmatpush.msrb.mxu2 %v1058_v49  ;;  %1199 = vmatpush.msrb.mxu3 %v1059_v50  ;;  %v3557_v5 = vunpack.i.l.bf16 %v3556_v32  ;;  %v3558_v36 = vunpack.i.h.bf16 %v3556_v32  ;;  %v3576_v49 = vpop.permute.xlu1 %3575 }
  0xd0   :  { %1239 = vmatpush.msra.mxu1 %v1061_v51  ;;  %v3581_v51 = vpop.permute.xlu2 %3580  ;;  %v3577_v52 = vunpack.i.l.bf16 %v3576_v49  ;;  %v3578_v54 = vunpack.i.h.bf16 %v3576_v49 }
  0xd1   :  { %v1420_v38 = vsel %vm1408_vm4, %v3553_v33, %v3557_v5  ;;  %v1421_v46 = vsel %vm1408_vm4, %v3557_v5, %v3558_v36  ;;  %v3582_v55 = vunpack.i.l.bf16 %v3581_v51  ;;  %v3583_v2 = vunpack.i.h.bf16 %v3581_v51 }
  0xd2   :  { %v1770_v58 = vsel %vm1763_vm5, %v3577_v52, %v3578_v54 }
  0xd3   :  { %v1772_v10 = vsel %vm1763_vm5, %v3582_v55, %v3583_v2 }
  0xd4   :  { %3318 = vmatmul.msk.f32.vlgmr.msra.gmra.mxu0 %vm101_vm1, %v4018_v21  ;;  %v1414_v21 = vsel %vm1408_vm4, %v3538_v14, %v3542_v3 }
  0xd5   :  { %3321 = vmatmul.msk.f32.vlgmr.msra.gmra.mxu2 %vm101_vm1, %v4073_v57  ;;  %3322 = vmatmul.msk.f32.vlgmr.msra.gmra.mxu3 %vm101_vm1, %v4073_v57 }
  0xd6   :  { %3324 = vmatmul.msk.f32.vlgmr.msrb.gmra.mxu1 %vm101_vm1, %v4073_v57  ;;  %1219 = vmatpush.msra.mxu0 %v1060_v59  ;;  %v3571_v40 = vpop.permute.xlu0 %3570 }
  0xd7   :  { %1259 = vmatpush.msra.mxu2 %v1062_v60  ;;  %1279 = vmatpush.msra.mxu3 %v1063_v61  ;;  %v3572_v45 = vunpack.i.l.bf16 %v3571_v40  ;;  %v3573_v18 = vunpack.i.h.bf16 %v3571_v40  ;;  %v1771_v61 = vsel %vm1763_vm5, %v3578_v54, %v3582_v55 }
  0xd8   :  { %1319 = vmatpush.msrb.mxu1 %v1065_v63  ;;  %v3591_v63 = vpop.permute.xlu1 %3590  ;;  %v3596_v12 = vpop.permute.xlu2 %3595 }
  0xd9   :  { %v1767_v50 = vsel %vm1763_vm5, %v3568_v44, %v3572_v45  ;;  %v1768_v59 = vsel %vm1763_vm5, %v3572_v45, %v3573_v18  ;;  %v1769_v60 = vsel %vm1763_vm5, %v3573_v18, %v3577_v52  ;;  %v3597_v22 = vunpack.i.l.bf16 %v3596_v12  ;;  %v4248_v52 = vld [vmem:[%s4584_s1 + $0x18] sm:$0x7] }
  0xdc   :  { %3323 = vmatmul.msk.f32.vlgmr.msrb.gmra.mxu0 %vm101_vm1, %v4073_v57 }
  0xdd   :  { %3325 = vmatmul.msk.f32.vlgmr.msrb.gmra.mxu2 %vm101_vm1, %v4073_v57  ;;  %3326 = vmatmul.msk.f32.vlgmr.msrb.gmra.mxu3 %vm101_vm1, %v4073_v57 }
  0xde   :  { %3328 = vmatmul.msk.f32.vlgmr.msra.gmra.mxu1 %vm101_vm1, %v4073_v57  ;;  %1299 = vmatpush.msrb.mxu0 %v1064_v6  ;;  %v3586_v62 = vpop.permute.xlu0 %3585 }
  0xdf   :  { %1359 = vmatpush.msrb.mxu3 %v3523_v1  ;;  %1339 = vmatpush.msrb.mxu2 %v1066_v8  ;;  %v3587_v4 = vunpack.i.l.bf16 %v3586_v62  ;;  %v3588_v7 = vunpack.i.h.bf16 %v3586_v62  ;;  %v3592_v8 = vunpack.i.l.bf16 %v3591_v63 }
  0xe0   :  { %1474 = vmatpush.msra.mxu1 %v1410_v19  ;;  %v3606_v26 = vpop.permute.xlu1 %3605 }
  0xe1   :  { %v1773_v11 = vsel %vm1763_vm5, %v3583_v2, %v3587_v4  ;;  %v1775_v14 = vsel %vm1763_vm5, %v3588_v7, %v3592_v8  ;;  %v1774_v25 = vsel %vm1763_vm5, %v3587_v4, %v3588_v7  ;;  %v3607_v33 = vunpack.i.l.bf16 %v3606_v26 }
  0xe4   :  { %3327 = vmatmul.msk.f32.vlgmr.msra.gmra.mxu0 %vm101_vm1, %v4073_v57 }
  0xe5   :  { %3329 = vmatmul.msk.f32.vlgmr.msra.gmra.mxu2 %vm101_vm1, %v4073_v57  ;;  %3330 = vmatmul.msk.f32.vlgmr.msra.gmra.mxu3 %vm101_vm1, %v4073_v57 }
  0xe6   :  { %3332 = vmatmul.msk.f32.vlgmr.msrb.gmra.mxu1 %vm101_vm1, %v4073_v57  ;;  %1454 = vmatpush.msra.mxu0 %v1409_v15  ;;  %v3601_v23 = vpop.permute.xlu0 %3600 }
  0xe7   :  { %1494 = vmatpush.msra.mxu2 %v1411_v16  ;;  %1514 = vmatpush.msra.mxu3 %v1412_v20  ;;  %v3593_v16 = vunpack.i.h.bf16 %v3591_v63  ;;  %v3603_v32 = vunpack.i.h.bf16 %v3601_v23 }
  0xe8   :  { %1554 = vmatpush.msrb.mxu1 %v1414_v21  ;;  %v3598_v21 = vunpack.i.h.bf16 %v3596_v12  ;;  %v3621_v42 = vpop.permute.xlu1 %3620 }
  0xe9   :  { %v1776_v17 = vsel %vm1763_vm5, %v3592_v8, %v3593_v16  ;;  %v2154_v39 = vsel %vm2150_vm6, %v3603_v32, %v3607_v33  ;;  %v3622_v51 = vunpack.i.l.bf16 %v3621_v42  ;;  %v3623_v62 = vunpack.i.h.bf16 %v3621_v42 }
  0xec   :  { %3331 = vmatmul.msk.f32.vlgmr.msrb.gmra.mxu0 %vm101_vm1, %v4073_v57 }
  0xed   :  { %3333 = vmatmul.msk.f32.vlgmr.msrb.gmra.mxu2 %vm101_vm1, %v4073_v57  ;;  %3334 = vmatmul.msk.f32.vlgmr.msrb.gmra.mxu3 %vm101_vm1, %v4073_v57  ;;  %v1766_v57 = vsel %vm1763_vm5, %v3563_v41, %v3568_v44 }
  0xee   :  { %3337 = vmatmul.msk.f32.vlgmr.msra.gmra.mxu1 %vm101_vm1, %v4116_v27  ;;  %1534 = vmatpush.msrb.mxu0 %v1413_v28  ;;  %v3611_v28 = vpop.permute.xlu2 %3610  ;;  %v3616_v40 = vpop.permute.xlu0 %3615 }
  0xef   :  { %1574 = vmatpush.msrb.mxu2 %v1415_v29  ;;  %1594 = vmatpush.msrb.mxu3 %v1416_v30  ;;  %v3602_v29 = vunpack.i.l.bf16 %v3601_v23  ;;  %v3612_v35 = vunpack.i.l.bf16 %v3611_v28  ;;  %v3613_v45 = vunpack.i.h.bf16 %v3611_v28 }
  0xf0   :  { %1634 = vmatpush.msra.mxu1 %v1418_v31 }
  0xf4   :  { %3336 = vmatmul.msk.f32.vlgmr.msra.gmra.mxu0 %vm101_vm1, %v4116_v27 }
  0xf5   :  { %3338 = vmatmul.msk.f32.vlgmr.msra.gmra.mxu2 %vm101_vm1, %v4116_v27  ;;  %3339 = vmatmul.msk.f32.vlgmr.msra.gmra.mxu3 %vm101_vm1, %v4116_v27 }
  0xf6   :  { %3341 = vmatmul.msk.f32.vlgmr.msrb.gmra.mxu1 %vm101_vm1, %v4116_v27  ;;  %1614 = vmatpush.msra.mxu0 %v1417_v34  ;;  %v3608_v34 = vunpack.i.h.bf16 %v3606_v26  ;;  %v3626_v55 = vpop.permute.xlu2 %3625 }
  0xf7   :  { %1654 = vmatpush.msra.mxu2 %v1419_v37  ;;  %1674 = vmatpush.msra.mxu3 %v1420_v38  ;;  %v2151_v37 = vsel %vm2150_vm6, %v3602_v29, %v3597_v22  ;;  %v2153_v38 = vsel %vm2150_vm6, %v3598_v21, %v3603_v32  ;;  %v3627_v63 = vunpack.i.l.bf16 %v3626_v55  ;;  %v3628_v8 = vunpack.i.h.bf16 %v3626_v55 }
  0xf8   :  { %1714 = vmatpush.msrb.mxu1 %v3558_v36  ;;  %v2156_v41 = vsel %vm2150_vm6, %v3608_v34, %v3612_v35  ;;  %v2155_v54 = vsel %vm2150_vm6, %v3607_v33, %v3608_v34 }
  0xf9   :  { %v4141_v43 = vpop.f32.mrf.mxu1  ;;  %v2162_v12 = vsel %vm2150_vm6, %v3623_v62, %v3627_v63  ;;  %v2163_v33 = vsel %vm2150_vm6, %v3627_v63, %v3628_v8 }
  0xfc   :  { %3340 = vmatmul.msk.f32.vlgmr.msrb.gmra.mxu0 %vm101_vm1, %v4116_v27 }
  0xfd   :  { %3342 = vmatmul.msk.f32.vlgmr.msrb.gmra.mxu2 %vm101_vm1, %v4116_v27  ;;  %3343 = vmatmul.msk.f32.vlgmr.msrb.gmra.mxu3 %vm101_vm1, %v4116_v27 }
  0xfe   :  { %3345 = vmatmul.msk.f32.vlgmr.msra.gmra.mxu1 %vm101_vm1, %v4116_v27  ;;  %1694 = vmatpush.msrb.mxu0 %v1421_v46  ;;  %v3617_v46 = vunpack.i.l.bf16 %v3616_v40 }
  0xff   :  { %1809 = vmatpush.msrb.mxu2 %v1764_v47  ;;  %1829 = vmatpush.msrb.mxu3 %v1765_v48 }
 0x100   :  { %1869 = vmatpush.msra.mxu1 %v1767_v50  ;;  %v3618_v50 = vunpack.i.h.bf16 %v3616_v40 }
 0x101   :  { %v4155_v53 = vpop.f32.mrf.mxu0 }
 0x103   :  { %v4157_v56 = vpop.f32.mrf.mxu1 }
 0x104   :  { %3344 = vmatmul.msk.f32.vlgmr.msra.gmra.mxu0 %vm101_vm1, %v4116_v27 }
 0x105   :  { %3346 = vmatmul.msk.f32.vlgmr.msra.gmra.mxu2 %vm101_vm1, %v4116_v27  ;;  %3347 = vmatmul.msk.f32.vlgmr.msra.gmra.mxu3 %vm101_vm1, %v4116_v27 }
 0x106   :  { %3349 = vmatmul.msk.f32.vlgmr.msrb.gmra.mxu1 %vm101_vm1, %v4116_v27  ;;  %1849 = vmatpush.msra.mxu0 %v1766_v57  ;;  %v2149_v57 = vpop.permute.xlu0 %2148 }
 0x107   :  { %1889 = vmatpush.msra.mxu2 %v1768_v59  ;;  %1909 = vmatpush.msra.mxu3 %v1769_v60  ;;  %v2160_v59 = vsel %vm2150_vm6, %v3618_v50, %v3622_v51 }
 0x108   :  { %v4171_v0 = vpop.f32.mrf.mxu2  ;;  %v4173_v1 = vpop.f32.mrf.mxu3  ;;  %1949 = vmatpush.msrb.mxu1 %v1771_v61 }
 0x109   :  { %v4175_v6 = vpop.f32.mrf.mxu0 }
 0x10b   :  { %v4182_v19 = vpop.f32.mrf.mxu1 }
 0x10c   :  { %3348 = vmatmul.msk.f32.vlgmr.msrb.gmra.mxu0 %vm101_vm1, %v4116_v27  ;;  %v2152_v27 = vsel %vm2150_vm6, %v3597_v22, %v3598_v21 }
 0x10d   :  { %3351 = vmatmul.msk.f32.vlgmr.msrb.gmra.mxu2 %vm101_vm1, %v4180_v9  ;;  %3352 = vmatmul.msk.f32.vlgmr.msrb.gmra.mxu3 %vm101_vm1, %v4180_v9 }
 0x10e   :  { %3354 = vmatmul.msk.f32.vlgmr.msra.gmra.mxu1 %vm101_vm1, %v4180_v9  ;;  %1929 = vmatpush.msrb.mxu0 %v1770_v58  ;;  %v2159_v58 = vsel %vm2150_vm6, %v3617_v46, %v3618_v50 }
 0x10f   :  { %1969 = vmatpush.msrb.mxu2 %v1772_v10  ;;  %1989 = vmatpush.msrb.mxu3 %v1773_v11  ;;  %v3631_v10 = vpop.permute.xlu1 %3630  ;;  %v2161_v11 = vsel %vm2150_vm6, %v3622_v51, %v3623_v62 }
 0x110   :  { %v4196_v3 = vpop.f32.mrf.mxu2  ;;  %v4198_v15 = vpop.f32.mrf.mxu3  ;;  %2029 = vmatpush.msra.mxu1 %v1775_v14  ;;  %v3633_v22 = vunpack.i.h.bf16 %v3631_v10  ;;  %v3632_v23 = vunpack.i.l.bf16 %v3631_v10 }
 0x111   :  { %v4200_v20 = vpop.f32.mrf.mxu0  ;;  %v3636_v14 = vpop.permute.xlu2 %3635 }
 0x113   :  { %v4202_v24 = vpop.f32.mrf.mxu1 }
 0x114   :  { %3353 = vmatmul.msk.f32.vlgmr.msra.gmra.mxu0 %vm101_vm1, %v4180_v9 }
 0x115   :  { %3355 = vmatmul.msk.f32.vlgmr.msra.gmra.mxu2 %vm101_vm1, %v4180_v9  ;;  %3356 = vmatmul.msk.f32.vlgmr.msra.gmra.mxu3 %vm101_vm1, %v4180_v9 }
 0x116   :  { %3358 = vmatmul.msk.f32.vlgmr.msrb.gmra.mxu1 %vm101_vm1, %v4180_v9  ;;  %2009 = vmatpush.msra.mxu0 %v1774_v25  ;;  %v3638_v25 = vunpack.i.h.bf16 %v3636_v14 }
 0x117   :  { %2069 = vmatpush.msra.mxu3 %v3593_v16  ;;  %2049 = vmatpush.msra.mxu2 %v1776_v17  ;;  %v3637_v17 = vunpack.i.l.bf16 %v3636_v14 }
 0x118   :  { %v4215_v30 = vpop.f32.mrf.mxu2  ;;  %v4217_v31 = vpop.f32.mrf.mxu3  ;;  %2217 = vmatpush.msrb.mxu1 %v2152_v27  ;;  %v2511_v51 = vsel %vm2508_vm7, %v3633_v22, %v3638_v25 }
 0x119   :  { %v4219_v5 = vpop.f32.mrf.mxu0  ;;  %v2509_v34 = vsel %vm2508_vm7, %v3637_v17, %v3632_v23 }
 0x11b   :  { %v4221_v36 = vpop.f32.mrf.mxu1 }
 0x11c   :  { %3357 = vmatmul.msk.f32.vlgmr.msrb.gmra.mxu0 %vm101_vm1, %v4180_v9 }
 0x11d   :  { %3359 = vmatmul.msk.f32.vlgmr.msrb.gmra.mxu2 %vm101_vm1, %v4180_v9  ;;  %3360 = vmatmul.msk.f32.vlgmr.msrb.gmra.mxu3 %vm101_vm1, %v4180_v9 }
 0x11e   :  { %3362 = vmatmul.msk.f32.vlgmr.msra.gmra.mxu1 %vm101_vm1, %v4180_v9  ;;  %2197 = vmatpush.msrb.mxu0 %v2151_v37  ;;  %v3651_v37 = vpop.permute.xlu2 %3650 }
 0x11f   :  { %2237 = vmatpush.msrb.mxu2 %v2153_v38  ;;  %2257 = vmatpush.msrb.mxu3 %v2154_v39  ;;  %v3653_v62 = vunpack.i.h.bf16 %v3651_v37 }
 0x120   :  { %v405_v13 = vpop.f32.mrf.mxu2  ;;  %v425_v44 = vpop.f32.mrf.mxu3  ;;  %2297 = vmatpush.msra.mxu1 %v2156_v41 }
 0x121   :  { %v4236_v47 = vadd.f32 %v405_v13, %v4155_v53  ;;  %v4239_v48 = vadd.f32 %v425_v44, %v4141_v43  ;;  %v4241_v49 = vpop.f32.mrf.mxu0  ;;  %v2157_v53 = vsel %vm2150_vm6, %v3612_v35, %v3613_v45  ;;  %v2158_v43 = vsel %vm2150_vm6, %v3613_v45, %v3617_v46 }
 0x122   :  { %v2510_v35 = vsel %vm2508_vm7, %v3632_v23, %v3633_v22  ;;  %v3652_v46 = vunpack.i.l.bf16 %v3651_v37 }
 0x123   :  { %v4243_v18 = vpop.f32.mrf.mxu1 }
 0x124   :  { %3361 = vmatmul.msk.f32.vlgmr.msra.gmra.mxu0 %vm101_vm1, %v4180_v9 }
 0x125   :  { %3363 = vmatmul.msk.f32.vlgmr.msra.gmra.mxu2 %vm101_vm1, %v4180_v9  ;;  %3364 = vmatmul.msk.f32.vlgmr.msra.gmra.mxu3 %vm101_vm1, %v4180_v9 }
 0x126   :  { %3367 = vmatmul.msk.f32.vlgmr.msrb.gmra.mxu1 %vm101_vm1, %v4248_v52  ;;  %2277 = vmatpush.msra.mxu0 %v2155_v54 }
 0x127   :  { %2317 = vmatpush.msra.mxu2 %v2157_v53  ;;  %2337 = vmatpush.msra.mxu3 %v2158_v43 }
 0x128   :  { %v485_v60 = vpop.f32.mrf.mxu2  ;;  %v505_v61 = vpop.f32.mrf.mxu3  ;;  %2377 = vmatpush.msrb.mxu1 %v2160_v59  ;;  %v446_v59 = vadd.f32 %v4241_v49, %v4171_v0  ;;  %v4338_v0 = vld [vmem:[%s4584_s1 + $0x1c] sm:$0x7] }
 0x129   :  { %v4263_v2 = vadd.f32 %v485_v60, %v4175_v6  ;;  %v506_v4 = vadd.f32 %v505_v61, %v4157_v56  ;;  %v4266_v7 = vpop.f32.mrf.mxu0  ;;  %v2164_v56 = vsel %vm2150_vm6, %v3628_v8, %v2149_v57  ;;  %v3641_v6 = vpop.permute.xlu0 %3640  ;;  %v466_v57 = vadd.f32 %v4221_v36, %v4173_v1 }
 0x12a   :  { %v3642_v29 = vunpack.i.l.bf16 %v3641_v6  ;;  %v3643_v40 = vunpack.i.h.bf16 %v3641_v6  ;;  %v2507_v1 = vpop.permute.xlu2 %2506 }
 0x12b   :  { %v4268_v9 = vpop.f32.mrf.mxu1 }
 0x12c   :  { %3366 = vmatmul.msk.f32.vlgmr.msrb.gmra.mxu0 %vm101_vm1, %v4248_v52  ;;  %v2513_v53 = vsel %vm2508_vm7, %v3642_v29, %v3643_v40 }
 0x12d   :  { %3368 = vmatmul.msk.f32.vlgmr.msrb.gmra.mxu2 %vm101_vm1, %v4248_v52  ;;  %3369 = vmatmul.msk.f32.vlgmr.msrb.gmra.mxu3 %vm101_vm1, %v4248_v52 }
 0x12e   :  { %3371 = vmatmul.msk.f32.vlgmr.msra.gmra.mxu1 %vm101_vm1, %v4248_v52  ;;  %2357 = vmatpush.msrb.mxu0 %v2159_v58 }
 0x12f   :  { %2397 = vmatpush.msrb.mxu2 %v2161_v11  ;;  %2417 = vmatpush.msrb.mxu3 %v2162_v12 }
 0x130   :  { %v565_v16 = vpop.f32.mrf.mxu2  ;;  %v585_v21 = vpop.f32.mrf.mxu3  ;;  %2457 = vmatpush.msra.mxu1 %v2164_v56  ;;  %v2517_v56 = vsel %vm2508_vm7, %v3652_v46, %v3653_v62 }
 0x131   :  { %v4283_v26 = vadd.f32 %v565_v16, %v4200_v20  ;;  %v586_v27 = vadd.f32 %v585_v21, %v4182_v19  ;;  %v4286_v28 = vpop.f32.mrf.mxu0  ;;  %v3646_v19 = vpop.permute.xlu1 %3645  ;;  %v2512_v20 = vsel %vm2508_vm7, %v3638_v25, %v3642_v29  ;;  %v526_v21 = vadd.f32 %v4266_v7, %v4196_v3 }
 0x132   :  { %v3647_v41 = vunpack.i.l.bf16 %v3646_v19  ;;  %v3648_v45 = vunpack.i.h.bf16 %v3646_v19  ;;  %v3656_v43 = vpop.permute.xlu0 %3655  ;;  %v3676_v37 = vpop.permute.xlu2 %3675 }
 0x133   :  { %v4288_v32 = vpop.f32.mrf.mxu1  ;;  %v3657_v63 = vunpack.i.l.bf16 %v3656_v43  ;;  %v3658_v10 = vunpack.i.h.bf16 %v3656_v43  ;;  %v3678_v43 = vunpack.i.h.bf16 %v3676_v37 }
 0x134   :  { %3370 = vmatmul.msk.f32.vlgmr.msra.gmra.mxu0 %vm101_vm1, %v4248_v52  ;;  %v2515_v49 = vsel %vm2508_vm7, %v3647_v41, %v3648_v45 }
 0x135   :  { %3372 = vmatmul.msk.f32.vlgmr.msra.gmra.mxu2 %vm101_vm1, %v4248_v52  ;;  %3373 = vmatmul.msk.f32.vlgmr.msra.gmra.mxu3 %vm101_vm1, %v4248_v52  ;;  %v2518_v6 = vsel %vm2508_vm7, %v3653_v62, %v3657_v63  ;;  %v2519_v3 = vsel %vm2508_vm7, %v3657_v63, %v3658_v10 }
 0x136   :  { %3375 = vmatmul.msk.f32.vlgmr.msrb.gmra.mxu1 %vm101_vm1, %v4248_v52  ;;  %2437 = vmatpush.msra.mxu0 %v2163_v33 }
 0x137   :  { %2555 = vmatpush.msra.mxu2 %v2509_v34  ;;  %2575 = vmatpush.msra.mxu3 %v2510_v35 }
 0x138   :  { %v645_v38 = vpop.f32.mrf.mxu2  ;;  %v665_v39 = vpop.f32.mrf.mxu3  ;;  %2615 = vmatpush.msrb.mxu1 %v2512_v20 }
 0x139   :  { %v4303_v42 = vadd.f32 %v645_v38, %v4219_v5  ;;  %v4306_v13 = vadd.f32 %v665_v39, %v4202_v24  ;;  %v4308_v44 = vpop.f32.mrf.mxu0  ;;  %v2514_v5 = vsel %vm2508_vm7, %v3643_v40, %v3647_v41  ;;  %v2516_v24 = vsel %vm2508_vm7, %v3648_v45, %v3652_v46  ;;  %v3661_v55 = vpop.permute.xlu1 %3660 }
 0x13a   :  { %v3662_v11 = vunpack.i.l.bf16 %v3661_v55  ;;  %v3663_v25 = vunpack.i.h.bf16 %v3661_v55  ;;  %v626_v39 = vadd.f32 %v4268_v9, %v4217_v31  ;;  %v606_v40 = vadd.f32 %v4286_v28, %v4215_v30 }
 0x13b   :  { %v846_v50 = vpop.f32.mrf.mxu1  ;;  %v1009_v62 = vadd.f32 %v4308_v44, %v4236_v47  ;;  %v4418_v47 = vld [vmem:[%s4584_s1 + $0x20] sm:$0x7] }
 0x13c   :  { %v4311_v54 = vadd.f32 %v846_v50, %v506_v4  ;;  %3374 = vmatmul.msk.f32.vlgmr.msrb.gmra.mxu0 %vm101_vm1, %v4248_v52  ;;  %v2520_v16 = vsel %vm2508_vm7, %v3658_v10, %v3662_v11  ;;  %v2522_v19 = vsel %vm2508_vm7, %v3663_v25, %v2507_v1  ;;  %v2521_v20 = vsel %vm2508_vm7, %v3662_v11, %v3663_v25 }
 0x13d   :  { %3376 = vmatmul.msk.f32.vlgmr.msrb.gmra.mxu2 %vm101_vm1, %v4248_v52  ;;  %3377 = vmatmul.msk.f32.vlgmr.msrb.gmra.mxu3 %vm101_vm1, %v4248_v52  ;;  %v3677_v50 = vunpack.i.l.bf16 %v3676_v37 }
 0x13e   :  { %3379 = vmatmul.msk.f32.vlgmr.msra.gmra.mxu1 %vm101_vm1, %v4248_v52  ;;  %2595 = vmatpush.msrb.mxu0 %v2511_v51 }
 0x13f   :  { %2635 = vmatpush.msrb.mxu2 %v2513_v53  ;;  %2655 = vmatpush.msrb.mxu3 %v2514_v5 }
 0x140   :  { %v786_v60 = vpop.f32.mrf.mxu2  ;;  %v806_v61 = vpop.f32.mrf.mxu3  ;;  %2695 = vmatpush.msra.mxu1 %v2516_v24 }
 0x141   :  { %v4328_v4 = vadd.f32 %v786_v60, %v446_v59  ;;  %v4330_v8 = vadd.f32 %v806_v61, %v466_v57  ;;  %v826_v58 = vpop.f32.mrf.mxu0  ;;  %v3691_v60 = vpop.permute.xlu2 %3690  ;;  %v1010_v61 = vadd.f32 %v4288_v32, %v4239_v48  ;;  %v2871_v32 = vsel %vm2866_vm8, %v3677_v50, %v3678_v43 }
 0x142   :  { %v4333_v12 = vadd.f32 %v826_v58, %v4263_v2  ;;  %v3666_v2 = vpop.permute.xlu0 %3665 }
 0x143   :  { %v926_v36 = vpop.f32.mrf.mxu1  ;;  %v3668_v33 = vunpack.i.h.bf16 %v3666_v2  ;;  %v3667_v34 = vunpack.i.l.bf16 %v3666_v2 }
 0x144   :  { %v4341_v14 = vadd.f32 %v926_v36, %v586_v27  ;;  %3378 = vmatmul.msk.f32.vlgmr.msra.gmra.mxu0 %vm101_vm1, %v4248_v52  ;;  %v546_v52 = vadd.f32 %v4243_v18, %v4198_v15  ;;  %v3671_v18 = vpop.permute.xlu1 %3670 }
 0x145   :  { %3381 = vmatmul.msk.f32.vlgmr.msra.gmra.mxu2 %vm101_vm1, %v4338_v0  ;;  %3382 = vmatmul.msk.f32.vlgmr.msra.gmra.mxu3 %vm101_vm1, %v4338_v0  ;;  %v3672_v41 = vunpack.i.l.bf16 %v3671_v18  ;;  %v3673_v46 = vunpack.i.h.bf16 %v3671_v18  ;;  %v3737_v18 = vmov 0  }
 0x146   :  { %3384 = vmatmul.msk.f32.vlgmr.msrb.gmra.mxu1 %vm101_vm1, %v4338_v0  ;;  %2675 = vmatpush.msra.mxu0 %v2515_v49 }
 0x147   :  { %2715 = vmatpush.msra.mxu2 %v2517_v56  ;;  %2735 = vmatpush.msra.mxu3 %v2518_v6  ;;  %v2867_v30 = vsel %vm2866_vm8, %v3672_v41, %v3667_v34  ;;  %v2869_v55 = vsel %vm2866_vm8, %v3668_v33, %v3673_v46  ;;  %v2870_v57 = vsel %vm2866_vm8, %v3673_v46, %v3677_v50  ;;  %v3692_v56 = vunpack.i.l.bf16 %v3691_v60 }
 0x148   :  { %v866_v22 = vpop.f32.mrf.mxu2  ;;  %v886_v23 = vpop.f32.mrf.mxu3  ;;  %2775 = vmatpush.msrb.mxu1 %v2520_v16  ;;  %3699 = vset.pattern.permute.xlu2 %v3737_v18 }
 0x149   :  { %v4358_v17 = vadd.f32 %v866_v22, %v526_v21  ;;  %v4360_v27 = vadd.f32 %v886_v23, %v546_v52  ;;  %v906_v29 = vpop.f32.mrf.mxu0  ;;  %v3693_v23 = vunpack.i.h.bf16 %v3691_v60  ;;  %3700 = vset.pattern.permute.xlu0 %v3737_v18 }
 0x14a   :  { %v4363_v35 = vadd.f32 %v906_v29, %v4283_v26  ;;  %v2868_v26 = vsel %vm2866_vm8, %v3667_v34, %v3668_v33  ;;  %v3681_v38 = vpop.permute.xlu0 %3680 }
 0x14b   :  { %v1006_v15 = vpop.f32.mrf.mxu1  ;;  %v3682_v24 = vunpack.i.l.bf16 %v3681_v38  ;;  %v3683_v58 = vunpack.i.h.bf16 %v3681_v38  ;;  %v2877_v37 = vsel %vm2866_vm8, %v3692_v56, %v3693_v23 }
 0x14c   :  { %v4367_v7 = vadd.f32 %v1006_v15, %v4306_v13  ;;  %3383 = vmatmul.msk.f32.vlgmr.msrb.gmra.mxu0 %vm101_vm1, %v4338_v0  ;;  %v3686_v59 = vpop.permute.xlu1 %3685  ;;  %v3192_v15 = vld [vmem:[%s4585_s2] sm:$0x7] }
 0x14d   :  { %3385 = vmatmul.msk.f32.vlgmr.msrb.gmra.mxu2 %vm101_vm1, %v4338_v0  ;;  %3386 = vmatmul.msk.f32.vlgmr.msrb.gmra.mxu3 %vm101_vm1, %v4338_v0  ;;  %v3687_v10 = vunpack.i.l.bf16 %v3686_v59  ;;  %v3688_v49 = vunpack.i.h.bf16 %v3686_v59  ;;  %v2873_v2 = vsel %vm2866_vm8, %v3682_v24, %v3683_v58 }
 0x14e   :  { %3388 = vmatmul.msk.f32.vlgmr.msra.gmra.mxu1 %vm101_vm1, %v4338_v0  ;;  %2755 = vmatpush.msrb.mxu0 %v2519_v3 }
 0x14f   :  { %2795 = vmatpush.msrb.mxu2 %v2521_v20  ;;  %2815 = vmatpush.msrb.mxu3 %v2522_v19  ;;  %v2874_v16 = vsel %vm2866_vm8, %v3683_v58, %v3687_v10  ;;  %v2875_v20 = vsel %vm2866_vm8, %v3687_v10, %v3688_v49 }
 0x150   :  { %v946_v13 = vpop.f32.mrf.mxu2  ;;  %v966_v45 = vpop.f32.mrf.mxu3  ;;  %2933 = vmatpush.msra.mxu1 %v2868_v26  ;;  %3195 = vperm.xlu2 %3699, %v3192_v15  }
 0x151   :  { %v4384_v51 = vadd.f32 %v946_v13, %v606_v40  ;;  %v4386_v53 = vadd.f32 %v966_v45, %v626_v39  ;;  %v986_v5 = vpop.f32.mrf.mxu0 }
 0x152   :  { %v4389_v31 = vadd.f32 %v986_v5, %v4303_v42  ;;  %v2872_v42 = vsel %vm2866_vm8, %v3678_v43, %v3682_v24  ;;  %v2861_v34 = vpop.permute.xlu0 %2860 }
 0x153   :  { %v1161_v9 = vpop.f32.mrf.mxu1 }
 0x154   :  { %v4393_v28 = vadd.f32 %v1161_v9, %v4330_v8  ;;  %3387 = vmatmul.msk.f32.vlgmr.msra.gmra.mxu0 %vm101_vm1, %v4338_v0  ;;  %v3696_v52 = vpop.permute.xlu1 %3695 }
 0x155   :  { %3389 = vmatmul.msk.f32.vlgmr.msra.gmra.mxu2 %vm101_vm1, %v4338_v0  ;;  %3390 = vmatmul.msk.f32.vlgmr.msra.gmra.mxu3 %vm101_vm1, %v4338_v0  ;;  %v3698_v25 = vunpack.i.h.bf16 %v3696_v52 }
 0x156   :  { %3392 = vmatmul.msk.f32.vlgmr.msrb.gmra.mxu1 %vm101_vm1, %v4338_v0  ;;  %2913 = vmatpush.msra.mxu0 %v2867_v30 }
 0x157   :  { %2953 = vmatpush.msra.mxu2 %v2869_v55  ;;  %2973 = vmatpush.msra.mxu3 %v2870_v57 }
 0x158   :  { %v1101_v63 = vpop.f32.mrf.mxu2  ;;  %v1121_v8 = vpop.f32.mrf.mxu3  ;;  %3013 = vmatpush.msrb.mxu1 %v2872_v42 }
 0x159   :  { %v4410_v11 = vadd.f32 %v1101_v63, %v1009_v62  ;;  %v1365_v1 = vadd.f32 %v1121_v8, %v1010_v61  ;;  %v1141_v36 = vpop.f32.mrf.mxu0 }
 0x15a   :  { %v4413_v6 = vadd.f32 %v1141_v36, %v4328_v4  ;;  %v2876_v4 = vsel %vm2866_vm8, %v3688_v49, %v3692_v56 }
 0x15b   :  { %v1241_v48 = vpop.f32.mrf.mxu1 }
 0x15c   :  { %v4422_v44 = vadd.f32 %v1241_v48, %v4360_v27  ;;  %3391 = vmatmul.msk.f32.vlgmr.msrb.gmra.mxu0 %vm101_vm1, %v4338_v0 }
 0x15d   :  { %3393 = vmatmul.msk.f32.vlgmr.msrb.gmra.mxu2 %vm101_vm1, %v4338_v0  ;;  %3394 = vmatmul.msk.f32.vlgmr.msrb.gmra.mxu3 %vm101_vm1, %v4338_v0  ;;  %v3697_v0 = vunpack.i.l.bf16 %v3696_v52 }
 0x15e   :  { %3397 = vmatmul.msk.f32.vlgmr.msra.gmra.mxu1 %vm101_vm1, %v4418_v47  ;;  %2993 = vmatpush.msrb.mxu0 %v2871_v32 }
 0x15f   :  { %3033 = vmatpush.msrb.mxu2 %v2873_v2  ;;  %3053 = vmatpush.msrb.mxu3 %v2874_v16  ;;  %v2879_v45 = vsel %vm2866_vm8, %v2861_v34, %v3697_v0 }
 0x160   :  { %v1181_v21 = vpop.f32.mrf.mxu2  ;;  %v1201_v22 = vpop.f32.mrf.mxu3  ;;  %3093 = vmatpush.msra.mxu1 %v2876_v4 }
 0x161   :  { %v1368_v27 = vadd.f32 %v1181_v21, %v4333_v12  ;;  %v1369_v29 = vadd.f32 %v1201_v22, %v4311_v54  ;;  %v1221_v33 = vpop.f32.mrf.mxu0  ;;  %v2878_v54 = vsel %vm2866_vm8, %v3693_v23, %v2861_v34 }
 0x162   :  { %v1370_v3 = vadd.f32 %v1221_v33, %v4358_v17  ;;  %v2880_v17 = vsel %vm2866_vm8, %v3697_v0, %v3698_v25 }
 0x163   :  { %v1321_v19 = vpop.f32.mrf.mxu1 }
 0x164   :  { %v1375_v12 = vadd.f32 %v1321_v19, %v4386_v53  ;;  %3396 = vmatmul.msk.f32.vlgmr.msra.gmra.mxu0 %vm101_vm1, %v4418_v47 }
 0x165   :  { %3398 = vmatmul.msk.f32.vlgmr.msra.gmra.mxu2 %vm101_vm1, %v4418_v47  ;;  %3399 = vmatmul.msk.f32.vlgmr.msra.gmra.mxu3 %vm101_vm1, %v4418_v47 }
 0x166   :  { %3401 = vmatmul.msk.f32.vlgmr.msrb.gmra.mxu1 %vm101_vm1, %v4418_v47  ;;  %3073 = vmatpush.msra.mxu0 %v2875_v20 }
 0x167   :  { %3113 = vmatpush.msra.mxu2 %v2877_v37  ;;  %3133 = vmatpush.msra.mxu3 %v2878_v54 }
 0x168   :  { %v1261_v26 = vpop.f32.mrf.mxu2  ;;  %v1281_v38 = vpop.f32.mrf.mxu3  ;;  %3173 = vmatpush.msrb.mxu1 %v2880_v17 }
 0x169   :  { %v1372_v39 = vadd.f32 %v1261_v26, %v4363_v35  ;;  %v1373_v40 = vadd.f32 %v1281_v38, %v4341_v14  ;;  %v1301_v41 = vpop.f32.mrf.mxu0 }
 0x16a   :  { %v1374_v13 = vadd.f32 %v1301_v41, %v4384_v51 }
 0x16b   :  { %v1476_v46 = vpop.f32.mrf.mxu1 }
 0x16c   :  { %v1720_v50 = vadd.f32 %v1476_v46, %v1365_v1  ;;  %3400 = vmatmul.msk.f32.vlgmr.msrb.gmra.mxu0 %vm101_vm1, %v4418_v47 }
 0x16d   :  { %3402 = vmatmul.msk.f32.vlgmr.msrb.gmra.mxu2 %vm101_vm1, %v4418_v47  ;;  %3403 = vmatmul.msk.f32.vlgmr.msrb.gmra.mxu3 %vm101_vm1, %v4418_v47 }
 0x16e   :  { %3405 = vmatmul.msk.f32.vlgmr.msra.gmra.mxu1 %vm101_vm1, %v4418_v47  ;;  %3153 = vmatpush.msrb.mxu0 %v2879_v45 }
 0x170   :  { %v1341_v14 = vpop.f32.mrf.mxu2  ;;  %v1361_v35 = vpop.f32.mrf.mxu3 }
 0x171   :  { %v1376_v51 = vadd.f32 %v1341_v14, %v4389_v31  ;;  %v1377_v53 = vadd.f32 %v1361_v35, %v4367_v7  ;;  %v1456_v5 = vpop.f32.mrf.mxu0 }
 0x172   :  { %v1719_v43 = vadd.f32 %v1456_v5, %v4410_v11 }
 0x173   :  { %v1556_v24 = vpop.f32.mrf.mxu1 }
 0x174   :  { %v1724_v9 = vadd.f32 %v1556_v24, %v1369_v29  ;;  %3404 = vmatmul.msk.f32.vlgmr.msra.gmra.mxu0 %vm101_vm1, %v4418_v47 }
 0x175   :  { %3406 = vmatmul.msk.f32.vlgmr.msra.gmra.mxu2 %vm101_vm1, %v4418_v47  ;;  %3407 = vmatmul.msk.f32.vlgmr.msra.gmra.mxu3 %vm101_vm1, %v4418_v47 }
 0x176   :  { %3409 = vmatmul.msk.f32.vlgmr.msrb.gmra.mxu1 %vm101_vm1, %v4418_v47 }
 0x178   :  { %v1496_v31 = vpop.f32.mrf.mxu2  ;;  %v1516_v30 = vpop.f32.mrf.mxu3 }
 0x179   :  { %v1721_v7 = vadd.f32 %v1496_v31, %v4413_v6  ;;  %v1722_v55 = vadd.f32 %v1516_v30, %v4393_v28  ;;  %v1536_v57 = vpop.f32.mrf.mxu0 }
 0x17a   :  { %v1723_v42 = vadd.f32 %v1536_v57, %v1368_v27 }
 0x17b   :  { %v1636_v59 = vpop.f32.mrf.mxu1 }
 0x17c   :  { %v1728_v60 = vadd.f32 %v1636_v59, %v1373_v40  ;;  %3408 = vmatmul.msk.f32.vlgmr.msrb.gmra.mxu0 %vm101_vm1, %v4418_v47 }
 0x180   :  { %v1576_v61 = vpop.f32.mrf.mxu2  ;;  %v1596_v62 = vpop.f32.mrf.mxu3 }
 0x181   :  { %v1725_v63 = vadd.f32 %v1576_v61, %v1370_v3  ;;  %v1726_v8 = vadd.f32 %v1596_v62, %v4422_v44  ;;  %v1616_v58 = vpop.f32.mrf.mxu0 }
 0x182   :  { %v1727_v10 = vadd.f32 %v1616_v58, %v1372_v39 }
 0x183   :  { %v1716_v11 = vpop.f32.mrf.mxu1 }
 0x184   :  { %v1732_v1 = vadd.f32 %v1716_v11, %v1377_v53 }
 0x188   :  { %v1656_v36 = vpop.f32.mrf.mxu2  ;;  %v1676_v49 = vpop.f32.mrf.mxu3 }
 0x189   :  { %v1729_v56 = vadd.f32 %v1656_v36, %v1374_v13  ;;  %v1730_v28 = vadd.f32 %v1676_v49, %v1375_v12  ;;  %v1696_v6 = vpop.f32.mrf.mxu0 }
 0x18a   :  { %v1731_v48 = vadd.f32 %v1696_v6, %v1376_v51 }
 0x18b   :  { %v1871_v32 = vpop.f32.mrf.mxu1 }
 0x18c   :  { %v4482_v2 = vadd.f32 %v1871_v32, %v1722_v55 }
 0x190   :  { %v1811_v16 = vpop.f32.mrf.mxu2  ;;  %v1831_v47 = vpop.f32.mrf.mxu3 }
 0x191   :  { %v2074_v4 = vadd.f32 %v1811_v16, %v1719_v43  ;;  %v2075_v52 = vadd.f32 %v1831_v47, %v1720_v50  ;;  %v1851_v21 = vpop.f32.mrf.mxu0 }
 0x192   :  { %v4484_v22 = vadd.f32 %v1851_v21, %v1721_v7 }
 0x193   :  { %v1951_v44 = vpop.f32.mrf.mxu1 }
 0x194   :  { %v4486_v23 = vadd.f32 %v1951_v44, %v1726_v8 }
 0x198   :  { %v1891_v25 = vpop.f32.mrf.mxu2  ;;  %v1911_v27 = vpop.f32.mrf.mxu3 }
 0x199   :  { %v2078_v29 = vadd.f32 %v1891_v25, %v1723_v42  ;;  %v2079_v33 = vadd.f32 %v1911_v27, %v1724_v9  ;;  %v1931_v0 = vpop.f32.mrf.mxu0 }
 0x19a   :  { %v4488_v34 = vadd.f32 %v1931_v0, %v1725_v63 }
 0x19b   :  { %v2031_v15 = vpop.f32.mrf.mxu1 }
 0x19c   :  { %v4490_v3 = vadd.f32 %v2031_v15, %v1730_v28 }
 0x1a0   :  { %v1971_v18 = vpop.f32.mrf.mxu2  ;;  %v1991_v19 = vpop.f32.mrf.mxu3 }
 0x1a1   :  { %v4492_v20 = vadd.f32 %v1971_v18, %v1727_v10  ;;  %v2083_v12 = vadd.f32 %v1991_v19, %v1728_v60  ;;  %v2011_v54 = vpop.f32.mrf.mxu0 }
 0x1a2   :  { %v4494_v37 = vadd.f32 %v2011_v54, %v1729_v56 }
 0x1a3   :  { %v2219_v17 = vpop.f32.mrf.mxu1 }
 0x1a4   :  { %v2463_v62 = vadd.f32 %v2219_v17, %v2075_v52 }
 0x1a8   :  { %v2051_v26 = vpop.f32.mrf.mxu2  ;;  %v2071_v38 = vpop.f32.mrf.mxu3 }
 0x1a9   :  { %v4496_v39 = vadd.f32 %v2051_v26, %v1731_v48  ;;  %v4498_v40 = vadd.f32 %v2071_v38, %v1732_v1  ;;  %v2199_v41 = vpop.f32.mrf.mxu0 }
 0x1aa   :  { %v4518_v1 = vpop.permute.xlu2 %3195  ;;  %v2462_v49 = vadd.f32 %v2199_v41, %v2074_v4 }
 0x1ab   :  { %v2299_v13 = vpop.f32.mrf.mxu1 }
 0x1ac   :  { %v2467_v28 = vadd.f32 %v2299_v13, %v2079_v33 }
 0x1b0   :  { %v2239_v45 = vpop.f32.mrf.mxu2  ;;  %v2259_v46 = vpop.f32.mrf.mxu3 }
 0x1b1   :  { %v2279_v50 = vpop.f32.mrf.mxu0  ;;  %v2464_v27 = vadd.f32 %v2239_v45, %v4484_v22  ;;  %v2465_v0 = vadd.f32 %v2259_v46, %v4482_v2 }
 0x1b2   :  { %v2466_v4 = vadd.f32 %v2279_v50, %v2078_v29 }
 0x1b3   :  { %v2379_v14 = vpop.f32.mrf.mxu1 }
 0x1b4   :  { %v2471_v54 = vadd.f32 %v2379_v14, %v2083_v12 }
 0x1b8   :  { %v4500_v35 = vpop.f32.mrf.mxu2  ;;  %v4502_v51 = vpop.f32.mrf.mxu3 }
 0x1b9   :  { %v4504_v53 = vpop.f32.mrf.mxu0  ;;  %v2468_v14 = vadd.f32 %v4500_v35, %v4488_v34 }
 0x1bb   :  { %v4506_v5 = vpop.f32.mrf.mxu1 }
 0x1bc   :  { %v2475_v34 = vadd.f32 %v4506_v5, %v4498_v40 }
 0x1c0   :  { %v4508_v43 = vpop.f32.mrf.mxu2  ;;  %v4510_v24 = vpop.f32.mrf.mxu3 }
 0x1c1   :  { %v4512_v9 = vpop.f32.mrf.mxu0 }
 0x1c3   :  { %v2617_v31 = vpop.f32.mrf.mxu1 }
 0x1c4   :  { %v2823_v15 = vadd.f32 %v2617_v31, %v2465_v0  ;;  %v2469_v31 = vadd.f32 %v4502_v51, %v4486_v23 }
 0x1c8   :  { %v2557_v30 = vpop.f32.mrf.mxu2  ;;  %v2577_v7 = vpop.f32.mrf.mxu3 }
 0x1c9   :  { %v2597_v55 = vpop.f32.mrf.mxu0  ;;  %v2821_v10 = vadd.f32 %v2577_v7, %v2463_v62  ;;  %v2820_v6 = vadd.f32 %v2557_v30, %v2462_v49 }
 0x1ca   :  { %v2822_v33 = vadd.f32 %v2597_v55, %v2464_v27 }
 0x1cb   :  { %v2697_v57 = vpop.f32.mrf.mxu1 }
 0x1cc   :  { %v2827_v62 = vadd.f32 %v2697_v57, %v2469_v31  ;;  %v2473_v57 = vadd.f32 %v4510_v24, %v4490_v3  ;;  %v2474_v3 = vadd.f32 %v4512_v9, %v4496_v39 }
 0x1d0   :  { %v2637_v42 = vpop.f32.mrf.mxu2  ;;  %v2657_v59 = vpop.f32.mrf.mxu3 }
 0x1d1   :  { %v2677_v60 = vpop.f32.mrf.mxu0  ;;  %v2825_v47 = vadd.f32 %v2657_v59, %v2467_v28  ;;  %v2824_v17 = vadd.f32 %v2637_v42, %v2466_v4  ;;  %v2470_v42 = vadd.f32 %v4504_v53, %v4492_v20 }
 0x1d3   :  { %v4514_v61 = vpop.f32.mrf.mxu1 }
 0x1d4   :  { %v2831_v24 = vadd.f32 %v4514_v61, %v2473_v57 }
 0x1d8   :  { %v2717_v63 = vpop.f32.mrf.mxu2  ;;  %v2737_v8 = vpop.f32.mrf.mxu3 }
 0x1d9   :  { %v4516_v58 = vpop.f32.mrf.mxu0  ;;  %v2829_v7 = vadd.f32 %v2737_v8, %v2471_v54  ;;  %v2826_v8 = vadd.f32 %v2677_v60, %v2468_v14  ;;  %v2828_v35 = vadd.f32 %v2717_v63, %v2470_v42 }
 0x1db   :  { %v2935_v11 = vpop.f32.mrf.mxu1 }
 0x1dc   :  { %v3179_v36 = vadd.f32 %v2935_v11, %v2821_v10 }
 0x1de   :  { %v3199_v56 = vadd.f32 %v4518_v1, %v3179_v36 }
 0x1e0   :  { %v4521_v48 = vpop.f32.mrf.mxu2  ;;  %v2817_v32 = vpop.f32.mrf.mxu3  ;;  %3701 = vtanh.f32 %v3199_v56 }
 0x1e1   :  { %v2915_v16 = vpop.f32.mrf.mxu0  ;;  %v2833_v49 = vadd.f32 %v2817_v32, %v2475_v34 }
 0x1e2   :  { %v3178_v52 = vadd.f32 %v2915_v16, %v2820_v6 }
 0x1e3   :  { %v3015_v21 = vpop.f32.mrf.mxu1 }
 0x1e4   :  { %v3198_v44 = vadd.f32 %v4518_v1, %v3178_v52  ;;  %v3183_v25 = vadd.f32 %v3015_v21, %v2825_v47  ;;  %v2472_v52 = vadd.f32 %v4508_v43, %v4494_v37  ;;  %v2832_v43 = vadd.f32 %v4521_v48, %v2474_v3 }
 0x1e6   :  { %3703 = vtanh.f32 %v3198_v44  ;;  %v3203_v18 = vadd.f32 %v4518_v1, %v3183_v25  ;;  %v3702_v19 = vpop.eup %3701  ;;  %v2830_v25 = vadd.f32 %v4516_v58, %v2472_v52 }
 0x1e7   :  { %v3240_v22 = vrot.slane %v3702_v19, 4 }
 0x1e8   :  { %v2955_v26 = vpop.f32.mrf.mxu2  ;;  %v2975_v38 = vpop.f32.mrf.mxu3  ;;  %3705 = vtanh.f32 %v3203_v18 }
 0x1e9   :  { %v3180_v41 = vadd.f32 %v2955_v26, %v2822_v33  ;;  %v3181_v13 = vadd.f32 %v2975_v38, %v2823_v15  ;;  %v2995_v30 = vpop.f32.mrf.mxu0 }
 0x1ea   :  { %v3182_v59 = vadd.f32 %v2995_v30, %v2824_v17 }
 0x1eb   :  { %v3201_v2 = vadd.f32 %v4518_v1, %v3181_v13  ;;  %v3095_v29 = vpop.f32.mrf.mxu1  ;;  %v3200_v46 = vadd.f32 %v4518_v1, %v3180_v41 }
 0x1ec   :  { %v3704_v45 = vpop.eup %3703  ;;  %v3202_v50 = vadd.f32 %v4518_v1, %v3182_v59  ;;  %v3187_v12 = vadd.f32 %v3095_v29, %v2829_v7 }
 0x1ed   :  { %v3248_v55 = vsel %vm3247_vm9, %v3704_v45, %v3240_v22  ;;  %3707 = vtanh.f32 %v3201_v2 }
 0x1ee   :  { %3262 = vst [vmem:[%s4586_s3] sm:$0x77] %v3248_v55  ;;  %3709 = vtanh.f32 %v3202_v50  ;;  %v3207_v10 = vadd.f32 %v4518_v1, %v3187_v12  ;;  %v3706_v11 = vpop.eup %3705 }
 0x1ef   :  { %3711 = vtanh.f32 %v3200_v46  ;;  %v3242_v16 = vrot.slane %v3706_v11, 4 }
 0x1f0   :  { %v3035_v23 = vpop.f32.mrf.mxu2  ;;  %v3055_v51 = vpop.f32.mrf.mxu3  ;;  %3713 = vtanh.f32 %v3207_v10 }
 0x1f1   :  { %v3184_v36 = vadd.f32 %v3035_v23, %v2826_v8  ;;  %v3185_v20 = vadd.f32 %v3055_v51, %v2827_v62  ;;  %v3075_v53 = vpop.f32.mrf.mxu0 }
 0x1f2   :  { %v3186_v56 = vadd.f32 %v3075_v53, %v2828_v35 }
 0x1f3   :  { %v3205_v60 = vadd.f32 %v4518_v1, %v3185_v20  ;;  %v3175_v28 = vpop.f32.mrf.mxu1  ;;  %v3708_v6 = vpop.eup %3707  ;;  %v3204_v40 = vadd.f32 %v4518_v1, %v3184_v36 }
 0x1f4   :  { %v3206_v5 = vadd.f32 %v4518_v1, %v3186_v56  ;;  %v3191_v63 = vadd.f32 %v3175_v28, %v2833_v49  ;;  %v3710_v47 = vpop.eup %3709  ;;  %v3241_v32 = vrot.slane %v3708_v6, 4 }
 0x1f5   :  { %v3712_v21 = vpop.eup %3711  ;;  %v3250_v44 = vsel %vm3247_vm9, %v3710_v47, %v3242_v16  ;;  %3715 = vtanh.f32 %v3205_v60 }
 0x1f6   :  { %v3249_v27 = vsel %vm3247_vm9, %v3712_v21, %v3241_v32  ;;  %3264 = vst [vmem:[%s4586_s3 + $0x10] sm:$0x77] %v3250_v44  ;;  %3717 = vtanh.f32 %v3206_v5  ;;  %v3211_v37 = vadd.f32 %v4518_v1, %v3191_v63  ;;  %v3714_v61 = vpop.eup %3713 }
 0x1f7   :  { %3263 = vst [vmem:[%s4586_s3 + $0x8] sm:$0x77] %v3249_v27  ;;  %3719 = vtanh.f32 %v3204_v40  ;;  %v3244_v19 = vrot.slane %v3714_v61, 4 }
 0x1f8   :  { %v3115_v39 = vpop.f32.mrf.mxu2  ;;  %v3135_v9 = vpop.f32.mrf.mxu3  ;;  %3721 = vtanh.f32 %v3211_v37 }
 0x1f9   :  { %v3188_v58 = vadd.f32 %v3115_v39, %v2830_v25  ;;  %v3189_v0 = vadd.f32 %v3135_v9, %v2831_v24  ;;  %v3155_v4 = vpop.f32.mrf.mxu0 }
 0x1fa   :  { %v3190_v15 = vadd.f32 %v3155_v4, %v2832_v43 }
 0x1fb   :  { %v3209_v33 = vadd.f32 %v4518_v1, %v3189_v0  ;;  %v3716_v18 = vpop.eup %3715  ;;  %v3208_v54 = vadd.f32 %v4518_v1, %v3188_v58 }
 0x1fc   :  { %v3210_v48 = vadd.f32 %v4518_v1, %v3190_v15  ;;  %v3718_v17 = vpop.eup %3717  ;;  %v3243_v26 = vrot.slane %v3716_v18, 4 }
 0x1fd   :  { %v3720_v38 = vpop.eup %3719  ;;  %v3252_v41 = vsel %vm3247_vm9, %v3718_v17, %v3244_v19  ;;  %3723 = vtanh.f32 %v3209_v33 }
 0x1fe   :  { %v3251_v13 = vsel %vm3247_vm9, %v3720_v38, %v3243_v26  ;;  %3266 = vst [vmem:[%s4586_s3 + $0x20] sm:$0x77] %v3252_v41  ;;  %3725 = vtanh.f32 %v3210_v48  ;;  %v3722_v30 = vpop.eup %3721 }
 0x1ff   :  { %3265 = vst [vmem:[%s4586_s3 + $0x18] sm:$0x77] %v3251_v13  ;;  %3727 = vtanh.f32 %v3208_v54  ;;  %v3246_v7 = vrot.slane %v3722_v30, 4 }
 0x203   :  { %v3724_v1 = vpop.eup %3723 }
 0x204   :  { %v3726_v59 = vpop.eup %3725  ;;  %v3245_v22 = vrot.slane %v3724_v1, 4 }
 0x205   :  { %v3728_v2 = vpop.eup %3727  ;;  %v3254_v29 = vsel %vm3247_vm9, %v3726_v59, %v3246_v7 }
 0x206   :  { %v3253_v45 = vsel %vm3247_vm9, %v3728_v2, %v3245_v22  ;;  %3271 = vst.msk [vmem:[%s4586_s3 + $0x30] sm:$0x77] %vm3270_vm12, %v3254_v29 }
 0x207   :  { %3267 = vst [vmem:[%s4586_s3 + $0x28] sm:$0x77] %v3253_v45 }

</bundles_post_ra>
